<compile_context>
chip_gen: v6e
topology: v6e:2x2x1
jax: 0.10.0
libtpu: 0.0.40
codegen_flags: <defaults>
</compile_context>

<pallas_src>
import functools

import jax
import jax.numpy as jnp
from jax.experimental import pallas as pl
from jax.experimental.pallas import tpu as pltpu

EPS = 1e-5          # nn.BatchNorm2d default
LANE = 128          # lane-dense channel padding


def _vmem_limit_bytes():
    # Per-generation budget: ~3/4 of physical VMEM, capped (v5e/v6e -> 96 MiB,
    # v7x -> 48 MiB). Conservative fallback if the query is unavailable.
    try:
        cap = pltpu.get_tpu_info().vmem_capacity_bytes
        return int(min(cap * 3 // 4, 96 * 1024 * 1024))
    except Exception:
        return 48 * 1024 * 1024


VMEM_LIMIT = _vmem_limit_bytes()


# ------------------------------ small helpers -------------------------------

def _round_up(x, m):
    return (x + m - 1) // m * m


def _pick_tile(dim, prefs, min_blocks=1):
    for p in prefs:
        if dim % p == 0 and dim // p >= min_blocks:
            return p
    return dim


def _compiler_params(n_axes=1):
    return pltpu.CompilerParams(
        dimension_semantics=("parallel",) * n_axes,
        vmem_limit_bytes=VMEM_LIMIT)


# --------------------- in-kernel 3x3 stride-1 convolution --------------------
# Input:  (1, Ho+2, Wo+2, Cin_p) bf16 per grid step (whole padded image).
# Output: lane-dense 2-D slab (Ho*Wo, Cout_p) bf16 + per-image BN sum/sumsq.

def _conv3x3_kernel(x_ref, w_ref, o_ref, stats_ref, acc_ref):
    _, hp, wp, cin = x_ref.shape
    ho, wo = hp - 2, wp - 2
    acc_ref[...] = jnp.zeros_like(acc_ref)
    for t in range(9):                       # static 9-tap accumulation
        dy, dx = divmod(t, 3)
        patch = x_ref[0, pl.ds(dy, ho), pl.ds(dx, wo), :]      # (ho, wo, cin)
        acc_ref[...] += jnp.dot(patch.reshape(ho * wo, cin), w_ref[t],
                                preferred_element_type=jnp.float32)
    acc = acc_ref[...]
    o_ref[...] = acc.astype(o_ref.dtype)
    s = jnp.sum(acc, axis=0, keepdims=True)
    q = jnp.sum(acc * acc, axis=0, keepdims=True)
    stats_ref[...] = jnp.concatenate([s, q], axis=0)[None]


def _conv3x3_bn_relu_kernel(x_ref, w_ref, sc_ref, sh_ref, mask_ref,
                            o_ref, stats_ref, acc_ref):
    # Same as above, but BN1+ReLU of the *input* is fused into the patch read.
    # mask zeroes the halo so the spatial zero-padding stays zero post-BN.
    _, hp, wp, cin = x_ref.shape
    ho, wo = hp - 2, wp - 2
    sc = sc_ref[...]                         # (1, cin) f32
    sh = sh_ref[...]
    acc_ref[...] = jnp.zeros_like(acc_ref)
    for t in range(9):
        dy, dx = divmod(t, 3)
        raw = x_ref[0, pl.ds(dy, ho), pl.ds(dx, wo), :].astype(jnp.float32)
        m = mask_ref[pl.ds(dy, ho), pl.ds(dx, wo), :]          # (ho, wo, 1)
        a = (jnp.maximum(raw * sc + sh, 0.0) * m).astype(jnp.bfloat16)
        acc_ref[...] += jnp.dot(a.reshape(ho * wo, cin), w_ref[t],
                                preferred_element_type=jnp.float32)
    acc = acc_ref[...]
    o_ref[...] = acc.astype(o_ref.dtype)
    s = jnp.sum(acc, axis=0, keepdims=True)
    q = jnp.sum(acc * acc, axis=0, keepdims=True)
    stats_ref[...] = jnp.concatenate([s, q], axis=0)[None]


def conv3x3_s1(x_pad, w9, fuse_bn=None):
    """x_pad: (N, Ho+2, Wo+2, Cin_p) bf16, w9: (9, Cin_p, Cout_p) bf16.

    Returns (y, stats): y (N*Ho*Wo, Cout_p) bf16, stats (2, Cout_p) f32.
    fuse_bn = (scale, shift, mask) applies BN+ReLU to the input in-kernel.
    """
    n, hp, wp, cip = x_pad.shape
    ho, wo = hp - 2, wp - 2
    cop = w9.shape[-1]
    m_img = ho * wo

    x_spec = pl.BlockSpec((1, hp, wp, cip), lambda i: (i, 0, 0, 0))
    w_spec = pl.BlockSpec((9, cip, cop), lambda i: (0, 0, 0))      # resident
    o_spec = pl.BlockSpec((m_img, cop), lambda i: (i, 0))
    s_spec = pl.BlockSpec((1, 2, cop), lambda i: (i, 0, 0))

    if fuse_bn is None:
        kernel = _conv3x3_kernel
        in_specs = [x_spec, w_spec]
        args = (x_pad, w9)
    else:
        scale, shift, mask = fuse_bn
        kernel = _conv3x3_bn_relu_kernel
        vec_spec = pl.BlockSpec((1, cip), lambda i: (0, 0))
        mask_spec = pl.BlockSpec((hp, wp, 1), lambda i: (0, 0, 0))
        in_specs = [x_spec, w_spec, vec_spec, vec_spec, mask_spec]
        args = (x_pad, w9, scale, shift, mask)

    y, stats = pl.pallas_call(
        kernel,
        out_shape=(jax.ShapeDtypeStruct((n * m_img, cop), jnp.bfloat16),
                   jax.ShapeDtypeStruct((n, 2, cop), jnp.float32)),
        grid_spec=pltpu.PrefetchScalarGridSpec(
            num_scalar_prefetch=0, grid=(n,),
            in_specs=in_specs, out_specs=[o_spec, s_spec],
            scratch_shapes=[pltpu.VMEM((m_img, cop), jnp.float32)]),
        compiler_params=_compiler_params(1),
    )(*args)
    return y, jnp.sum(stats, axis=0)


# ----------------- resident-weight matmul with fused BN stats ----------------
# Used for the stride-2 conv1 (im2col done in glue) and the 1x1 projection.

def _matmul_stats_kernel(a_ref, b_ref, o_ref, stats_ref):
    acc = jnp.dot(a_ref[...], b_ref[...], preferred_element_type=jnp.float32)
    o_ref[...] = acc.astype(o_ref.dtype)
    s = jnp.sum(acc, axis=0, keepdims=True)
    q = jnp.sum(acc * acc, axis=0, keepdims=True)
    stats_ref[...] = jnp.concatenate([s, q], axis=0)[None]


def matmul_with_stats(a_bf16, b_bf16):
    """[Mp,Kp] @ [Kp,Np] (bf16) -> (bf16 [Mp,Np], f32 [2,Np] sum/sumsq).

    B is held fully VMEM-resident (single K step, no reduction grid axis).
    TODO(synk): fall back to a K-tiled grid if Kp*Np ever exceeds the budget.
    """
    mp, kdim = a_bf16.shape
    ndim = b_bf16.shape[1]
    tm = _pick_tile(mp, (512, 256, 128, 64), min_blocks=2)
    mt = mp // tm

    y, stats = pl.pallas_call(
        _matmul_stats_kernel,
        out_shape=(jax.ShapeDtypeStruct((mp, ndim), jnp.bfloat16),
                   jax.ShapeDtypeStruct((mt, 2, ndim), jnp.float32)),
        grid_spec=pltpu.PrefetchScalarGridSpec(
            num_scalar_prefetch=0, grid=(mt,),
            in_specs=[pl.BlockSpec((tm, kdim), lambda i: (i, 0)),
                      pl.BlockSpec((kdim, ndim), lambda i: (0, 0))],
            out_specs=[pl.BlockSpec((tm, ndim), lambda i: (i, 0)),
                       pl.BlockSpec((1, 2, ndim), lambda i: (i, 0, 0))]),
        compiler_params=_compiler_params(1),
    )(a_bf16, b_bf16)
    return y, jnp.sum(stats, axis=0)


# -------------------- fused BN apply + residual add passes -------------------

def _bn_add_id_kernel(y_ref, sc_ref, sh_ref, r_ref, o_ref):
    y = y_ref[...].astype(jnp.float32)
    o_ref[...] = (y * sc_ref[...] + sh_ref[...]
                  + r_ref[...]).astype(o_ref.dtype)


def _bn_add_proj_kernel(y_ref, ysc_ref, ysh_ref, r_ref, rsc_ref, rsh_ref,
                        o_ref):
    y = y_ref[...].astype(jnp.float32)
    r = r_ref[...].astype(jnp.float32)
    o_ref[...] = (y * ysc_ref[...] + ysh_ref[...]
                  + r * rsc_ref[...] + rsh_ref[...]).astype(o_ref.dtype)


def _bn_add_call(kernel, y, vec_args, full_args):
    mrows, cp = y.shape
    tm = _pick_tile(mrows, (1024, 512, 256, 128, 64), min_blocks=2)
    full = pl.BlockSpec((tm, cp), lambda i: (i, 0))
    vec = pl.BlockSpec((1, cp), lambda i: (0, 0))
    in_specs, args = [full], [y]
    for v in vec_args[:2]:
        in_specs.append(vec); args.append(v)
    for f in full_args:
        in_specs.append(full); args.append(f)
    for v in vec_args[2:]:
        in_specs.append(vec); args.append(v)
    return pl.pallas_call(
        kernel,
        out_shape=jax.ShapeDtypeStruct((mrows, cp), jnp.float32),
        grid_spec=pltpu.PrefetchScalarGridSpec(
            num_scalar_prefetch=0, grid=(mrows // tm,),
            in_specs=in_specs, out_specs=full),
        compiler_params=_compiler_params(1),
    )(*args)


def bn_add_identity(y, scale, shift, res_f32):
    return _bn_add_call(_bn_add_id_kernel, y, [scale, shift], [res_f32])


def bn_add_projection(y, scale, shift, proj, pscale, pshift):
    return _bn_add_call(_bn_add_proj_kernel, y,
                        [scale, shift, pscale, pshift], [proj])


# -------------------------------- glue (JAX) ---------------------------------

def _scale_shift(stats, gamma, beta, count):
    # BN (training-mode batch stats): stats = [sum; sumsq] per channel (f32,
    # computed from the f32 MXU accumulator -> exact), biased variance.
    mean = stats[0:1] / count
    var = jnp.maximum(stats[1:2] / count - mean * mean, 0.0)
    scale = gamma * jax.lax.rsqrt(var + EPS)
    shift = beta - mean * scale
    return scale, shift                       # (1, Cp) f32 each


def im2col_3x3_s2(x_bf, m_pad, k_pad):
    """3x3 stride-2 pad-1 conv patches -> (m_pad, k_pad) bf16 (zero padded)."""
    n, h, w, c = x_bf.shape
    xp = jnp.pad(x_bf, ((0, 0), (1, 1), (1, 1), (0, 0)))
    ho = (h - 1) // 2 + 1
    wo = (w - 1) // 2 + 1
    cols = [xp[:, dy:dy + 2 * ho - 1:2, dx:dx + 2 * wo - 1:2, :]
            for dy in range(3) for dx in range(3)]
    patches = jnp.concatenate(cols, axis=-1).reshape(n * ho * wo, 9 * c)
    return jnp.pad(patches,
                   ((0, m_pad - n * ho * wo), (0, k_pad - 9 * c)))


def prepare_params(p, in_c, out_c):
    """Hoisted weight repacking -> kernel-layout, lane-padded, bf16."""
    cp = _round_up(out_c, LANE)
    cip = _round_up(in_c, LANE)

    def pad_vec(v):
        return jnp.pad(v, ((0, 0), (0, cp - out_c))).astype(jnp.float32)

    def w_taps(w_oihw, ci, ci_p):
        w = jnp.transpose(w_oihw, (2, 3, 1, 0)).reshape(9, ci, out_c)
        return jnp.pad(w, ((0, 0), (0, ci_p - ci),
                           (0, cp - out_c))).astype(jnp.bfloat16)

    kp = {
        "w2_9": w_taps(p["w2_oihw"], out_c, cp),
        "g1": pad_vec(p["g1"]), "b1": pad_vec(p["b1"]),
        "g2": pad_vec(p["g2"]), "b2": pad_vec(p["b2"]),
    }
    if in_c != out_c:
        k1p = _round_up(9 * in_c, LANE)
        w1 = jnp.transpose(p["w1_oihw"], (2, 3, 1, 0)).reshape(9 * in_c, out_c)
        kp["w1_mat"] = jnp.pad(
            w1, ((0, k1p - 9 * in_c), (0, cp - out_c))).astype(jnp.bfloat16)
        wp = p["wp_oihw"][:, :, 0, 0].T                       # (in_c, out_c)
        kp["wp_mat"] = jnp.pad(
            wp, ((0, cip - in_c), (0, cp - out_c))).astype(jnp.bfloat16)
        kp["gp"] = pad_vec(p["gp"]); kp["bp"] = pad_vec(p["bp"])
    else:
        kp["w1_9"] = w_taps(p["w1_oihw"], in_c, cip)
    return kp


def basic_block_forward(x_nchw, kp, *, in_c, out_c):
    """Matches BasicBlock.forward (training-mode BatchNorm, bias-free convs)."""
    n, _, h, w = x_nchw.shape
    stride = 2 if in_c != out_c else 1
    ho = (h - 1) // stride + 1
    wo = (w - 1) // stride + 1
    m = n * ho * wo
    cp = _round_up(out_c, LANE)
    cip = _round_up(in_c, LANE)

    x_nhwc = jnp.transpose(x_nchw, (0, 2, 3, 1))              # NCHW -> NHWC
    x_bf = x_nhwc.astype(jnp.bfloat16)

    # ---- conv1 (+ fused BN-stats epilogue) ----
    if stride == 1:
        # fully in-kernel 9-tap conv over the padded NHWC slab
        x_pad = jnp.pad(x_bf, ((0, 0), (1, 1), (1, 1), (0, cip - in_c)))
        y1, st1 = conv3x3_s1(x_pad, kp["w1_9"])               # (m, cp) bf16
    else:
        # stride-2 conv1: window gather in glue, resident-weight matmul kernel
        mp = _round_up(m, 64)
        k1p = kp["w1_mat"].shape[0]
        patches = im2col_3x3_s2(x_bf, mp, k1p)
        y1_full, st1 = matmul_with_stats(patches, kp["w1_mat"])
        y1 = y1_full[:m]
    sc1, sh1 = _scale_shift(st1, kp["g1"], kp["b1"], m)

    # ---- conv2: BN1+ReLU fused into the input read (halo masked) ----
    y1_pad = jnp.pad(y1.reshape(n, ho, wo, cp),
                     ((0, 0), (1, 1), (1, 1), (0, 0)))
    mask = jnp.pad(jnp.ones((ho, wo, 1), jnp.float32),
                   ((1, 1), (1, 1), (0, 0)))
    y2, st2 = conv3x3_s1(y1_pad, kp["w2_9"], fuse_bn=(sc1, sh1, mask))
    sc2, sh2 = _scale_shift(st2, kp["g2"], kp["b2"], m)

    # ---- shortcut + BN2 (+BN_proj) + residual add, one streaming pass ----
    if stride == 1:
        res = jnp.pad(x_nhwc, ((0, 0), (0, 0), (0, 0), (0, cp - in_c)))
        out2d = bn_add_identity(y2, sc2, sh2, res.reshape(m, cp))
    else:
        # 1x1 stride-2 projection (valid because H, W are even here)
        mp = _round_up(m, 64)
        xs = x_bf[:, ::2, ::2, :].reshape(m, in_c)
        xs = jnp.pad(xs, ((0, mp - m), (0, cip - in_c)))
        scp_full, stp = matmul_with_stats(xs, kp["wp_mat"])
        scs, shs = _scale_shift(stp, kp["gp"], kp["bp"], m)
        out2d = bn_add_projection(y2, sc2, sh2, scp_full[:m], scs, shs)

    out = out2d.reshape(n, ho, wo, cp)[:, :, :, :out_c]
    return jnp.transpose(out, (0, 3, 1, 2))                   # back to NCHW


# ----------------------------- pure-JAX reference ----------------------------

def ref_forward(x, p, in_c, out_c):
    """Mirrors the kernel's precision policy: bf16 conv inputs, f32 MXU
    accumulation, exact f32 BN statistics, bf16 storage of conv outputs."""
    def conv(a, w, stride, pad):
        return jax.lax.conv_general_dilated(
            a.astype(jnp.bfloat16), w.astype(jnp.bfloat16),
            window_strides=(stride, stride),
            padding=[(pad, pad), (pad, pad)],
            dimension_numbers=("NCHW", "OIHW", "NCHW"),
            preferred_element_type=jnp.float32)

    def bn(y, g, b):
        m = jnp.mean(y, axis=(0, 2, 3), keepdims=True)
        v = jnp.mean((y - m) ** 2, axis=(0, 2, 3), keepdims=True)
        scale = g.reshape(1, -1, 1, 1) * jax.lax.rsqrt(v + EPS)
        shift = b.reshape(1, -1, 1, 1) - m * scale
        yb = y.astype(jnp.bfloat16).astype(jnp.float32)   # bf16 HBM storage
        return yb * scale + shift

    stride = 2 if in_c != out_c else 1
    a1 = jnp.maximum(bn(conv(x, p["w1_oihw"], stride, 1), p["g1"], p["b1"]),
                     0.0)
    y2 = bn(conv(a1, p["w2_oihw"], 1, 1), p["g2"], p["b2"])
    if in_c != out_c:
        sc = bn(conv(x, p["wp_oihw"], 2, 0), p["gp"], p["bp"])
    else:
        sc = x
    return y2 + sc


# ----------------------------------- main ------------------------------------

def make_params(key, in_c, out_c):
    ks = jax.random.split(key, 6)
    p = {
        "w1_oihw": 0.1 * jax.random.normal(ks[0], (out_c, in_c, 3, 3),
                                           jnp.float32),
        "w2_oihw": 0.1 * jax.random.normal(ks[1], (out_c, out_c, 3, 3),
                                           jnp.float32),
        "g1": 1.0 + 0.1 * jax.random.normal(ks[2], (1, out_c), jnp.float32),
        "b1": 0.1 * jax.random.normal(ks[3], (1, out_c), jnp.float32),
        "g2": jnp.ones((1, out_c), jnp.float32),
        "b2": jnp.zeros((1, out_c), jnp.float32),
    }
    if in_c != out_c:
        p["wp_oihw"] = 0.1 * jax.random.normal(ks[4], (out_c, in_c, 1, 1),
                                               jnp.float32)
        p["gp"] = jnp.ones((1, out_c), jnp.float32)
        p["bp"] = 0.1 * jax.random.normal(ks[5], (1, out_c), jnp.float32)
    return p


if __name__ == "__main__":
    key = jax.random.PRNGKey(0)
    k_p1, k_x1, k_p2, k_x2 = jax.random.split(key, 4)

    # Case 1: in_channel != out_channel (stride-2 + 1x1 projection shortcut)
    N, Cin, Cout, H, W = 2, 4, 8, 16, 16
    params1 = make_params(k_p1, Cin, Cout)
    kp1 = prepare_params(params1, Cin, Cout)
    fwd1 = jax.jit(functools.partial(basic_block_forward, in_c=Cin, out_c=Cout))
    x1 = jax.random.normal(k_x1, (N, Cin, H, W), jnp.float32)
    out1 = jax.block_until_ready(fwd1(x1, kp1))
    ref1 = ref_forward(x1, params1, Cin, Cout)
    assert out1.shape == (N, Cout, H // 2, W // 2)
    err1 = float(jnp.max(jnp.abs(out1 - ref1)))
    assert err1 < 1e-2, f"case1 max abs err {err1}"

    # Case 2: in_channel == out_channel (stride-1, identity shortcut)
    C = 8
    params2 = make_params(k_p2, C, C)
    kp2 = prepare_params(params2, C, C)
    fwd2 = jax.jit(functools.partial(basic_block_forward, in_c=C, out_c=C))
    x2 = jax.random.normal(k_x2, (N, C, H, W), jnp.float32)
    out2 = jax.block_until_ready(fwd2(x2, kp2))
    ref2 = ref_forward(x2, params2, C, C)
    assert out2.shape == (N, C, H, W)
    err2 = float(jnp.max(jnp.abs(out2 - ref2)))
    assert err2 < 1e-2, f"case2 max abs err {err2}"

    print("KERNEL_OK")
</pallas_src>

<mosaic_0001>
module attributes {stable_mosaic.version = 11 : i64} {
  func.func @_matmul_stats_kernel(%arg0: i32, %arg1: memref<64x128xbf16, #tpu.memory_space<vmem>>, %arg2: memref<128x128xbf16, #tpu.memory_space<vmem>>, %arg3: memref<64x128xbf16, #tpu.memory_space<vmem>>, %arg4: memref<1x2x128xf32, #tpu.memory_space<vmem>>) attributes {dimension_semantics = [#tpu.dimension_semantics<parallel>], iteration_bounds = array<i64: 2>, scalar_prefetch = 0 : i64, scratch_operands = 0 : i64, tpu.core_type = #tpu.core_type<tc>, window_params = [{transform_indices = @transform_0, window_bounds = array<i64: 64, 128>}, {pipeline_mode = #tpu.pipeline_mode<synchronous>, transform_indices = @transform_1, window_bounds = array<i64: 128, 128>}, {transform_indices = @transform_2, window_bounds = array<i64: 64, 128>}, {transform_indices = @transform_3, window_bounds = array<i64: 1, 2, 128>}]} {
    %c0 = arith.constant 0 : index
    %c0_0 = arith.constant 0 : index
    %0 = vector.load %arg1[%c0, %c0_0] : memref<64x128xbf16, #tpu.memory_space<vmem>>, vector<64x128xbf16>
    %c0_1 = arith.constant 0 : index
    %c0_2 = arith.constant 0 : index
    %1 = vector.load %arg2[%c0_1, %c0_2] : memref<128x128xbf16, #tpu.memory_space<vmem>>, vector<128x128xbf16>
    %cst = arith.constant dense<0.000000e+00> : vector<64x128xf32>
    %2 = tpu.matmul %0, %1, %cst {dimension_numbers = #tpu.dot_dimension_numbers<[1], [0], [0], [1], [0, 0, 1, 1], [], []>} : vector<64x128xbf16>, vector<128x128xbf16>, vector<64x128xf32> -> vector<64x128xf32>
    %3 = arith.truncf %2 : vector<64x128xf32> to vector<64x128xbf16>
    %c0_3 = arith.constant 0 : index
    %c0_4 = arith.constant 0 : index
    %4 = vector.load %arg3[%c0_3, %c0_4] : memref<64x128xbf16, #tpu.memory_space<vmem>>, vector<64x128xbf16>
    tpu.vector_store %arg3[%c0_3, %c0_4], %3 {strides = array<i32>} : memref<64x128xbf16, #tpu.memory_space<vmem>>, vector<64x128xbf16>,
    %cst_5 = arith.constant dense<0.000000e+00> : vector<128xf32>
    %5 = vector.multi_reduction <add>, %2, %cst_5 [0] : vector<64x128xf32> to vector<128xf32>
    %6 = vector.shape_cast %5 : vector<128xf32> to vector<1x128xf32>
    %7 = arith.mulf %2, %2 : vector<64x128xf32>
    %cst_6 = arith.constant dense<0.000000e+00> : vector<128xf32>
    %8 = vector.multi_reduction <add>, %7, %cst_6 [0] : vector<64x128xf32> to vector<128xf32>
    %9 = vector.shape_cast %8 : vector<128xf32> to vector<1x128xf32>
    %10 = tpu.concatenate %6, %9 in 0 : vector<1x128xf32>, vector<1x128xf32> -> vector<2x128xf32>
    %11 = vector.shape_cast %10 : vector<2x128xf32> to vector<1x2x128xf32>
    %c0_7 = arith.constant 0 : index
    %c0_8 = arith.constant 0 : index
    %c0_9 = arith.constant 0 : index
    %12 = vector.load %arg4[%c0_7, %c0_8, %c0_9] : memref<1x2x128xf32, #tpu.memory_space<vmem>>, vector<1x2x128xf32>
    tpu.vector_store %arg4[%c0_7, %c0_8, %c0_9], %11 {strides = array<i32>} : memref<1x2x128xf32, #tpu.memory_space<vmem>>, vector<1x2x128xf32>,
    return
  }
  func.func @transform_0(%arg0: i32) -> (i32, i32) {
    %c0_i32 = arith.constant 0 : i32
    %c0_i32_0 = arith.constant 0 : i32
    return %arg0, %c0_i32 : i32, i32
  }
  func.func @transform_1(%arg0: i32) -> (i32, i32) {
    %c0_i32 = arith.constant 0 : i32
    %c0_i32_0 = arith.constant 0 : i32
    %c0_i32_1 = arith.constant 0 : i32
    return %c0_i32, %c0_i32_0 : i32, i32
  }
  func.func @transform_2(%arg0: i32) -> (i32, i32) {
    %c0_i32 = arith.constant 0 : i32
    %c0_i32_0 = arith.constant 0 : i32
    return %arg0, %c0_i32 : i32, i32
  }
  func.func @transform_3(%arg0: i32) -> (i32, i32, i32) {
    %c0_i32 = arith.constant 0 : i32
    %c0_i32_0 = arith.constant 0 : i32
    %c0_i32_1 = arith.constant 0 : i32
    return %arg0, %c0_i32, %c0_i32_0 : i32, i32, i32
  }
}

module attributes {stable_mosaic.version = 11 : i64} {
  func.func @_conv3x3_bn_relu_kernel(%arg0: i32, %arg1: memref<1x10x10x128xbf16, #tpu.memory_space<vmem>>, %arg2: memref<9x128x128xbf16, #tpu.memory_space<vmem>>, %arg3: memref<1x128xf32, #tpu.memory_space<vmem>>, %arg4: memref<1x128xf32, #tpu.memory_space<vmem>>, %arg5: memref<10x10x1xf32, #tpu.memory_space<vmem>>, %arg6: memref<64x128xbf16, #tpu.memory_space<vmem>>, %arg7: memref<1x2x128xf32, #tpu.memory_space<vmem>>, %arg8: memref<64x128xf32, #tpu.memory_space<vmem>>) attributes {dimension_semantics = [#tpu.dimension_semantics<parallel>], iteration_bounds = array<i64: 2>, scalar_prefetch = 0 : i64, scratch_operands = 1 : i64, tpu.core_type = #tpu.core_type<tc>, window_params = [{transform_indices = @transform_0, window_bounds = array<i64: 1, 10, 10, 128>}, {pipeline_mode = #tpu.pipeline_mode<synchronous>, transform_indices = @transform_1, window_bounds = array<i64: 9, 128, 128>}, {pipeline_mode = #tpu.pipeline_mode<synchronous>, transform_indices = @transform_2, window_bounds = array<i64: 1, 128>}, {pipeline_mode = #tpu.pipeline_mode<synchronous>, transform_indices = @transform_3, window_bounds = array<i64: 1, 128>}, {pipeline_mode = #tpu.pipeline_mode<synchronous>, transform_indices = @transform_4, window_bounds = array<i64: 10, 10, 1>}, {transform_indices = @transform_5, window_bounds = array<i64: 64, 128>}, {transform_indices = @transform_6, window_bounds = array<i64: 1, 2, 128>}]} {
    %c0 = arith.constant 0 : index
    %c0_0 = arith.constant 0 : index
    %0 = vector.load %arg3[%c0, %c0_0] : memref<1x128xf32, #tpu.memory_space<vmem>>, vector<1x128xf32>
    %c0_1 = arith.constant 0 : index
    %c0_2 = arith.constant 0 : index
    %1 = vector.load %arg4[%c0_1, %c0_2] : memref<1x128xf32, #tpu.memory_space<vmem>>, vector<1x128xf32>
    %cst = arith.constant 0.000000e+00 : f32
    %2 = vector.broadcast %cst : f32 to vector<64x128xf32>
    %c0_3 = arith.constant 0 : index
    %c0_4 = arith.constant 0 : index
    %3 = vector.load %arg8[%c0_3, %c0_4] : memref<64x128xf32, #tpu.memory_space<vmem>>, vector<64x128xf32>
    tpu.vector_store %arg8[%c0_3, %c0_4], %2 {strides = array<i32>} : memref<64x128xf32, #tpu.memory_space<vmem>>, vector<64x128xf32>,
    %c0_5 = arith.constant 0 : index
    %c0_6 = arith.constant 0 : index
    %c0_7 = arith.constant 0 : index
    %c0_8 = arith.constant 0 : index
    %4 = vector.load %arg1[%c0_5, %c0_6, %c0_7, %c0_8] : memref<1x10x10x128xbf16, #tpu.memory_space<vmem>>, vector<1x8x8x128xbf16>
    %5 = vector.shape_cast %4 : vector<1x8x8x128xbf16> to vector<8x8x128xbf16>
    %6 = arith.extf %5 : vector<8x8x128xbf16> to vector<8x8x128xf32>
    %c0_9 = arith.constant 0 : index
    %c0_10 = arith.constant 0 : index
    %c0_11 = arith.constant 0 : index
    %7 = vector.load %arg5[%c0_9, %c0_10, %c0_11] : memref<10x10x1xf32, #tpu.memory_space<vmem>>, vector<8x8x1xf32>
    %8 = vector.shape_cast %0 : vector<1x128xf32> to vector<1x1x128xf32>
    %9 = vector.broadcast %8 : vector<1x1x128xf32> to vector<8x8x128xf32>
    %10 = arith.mulf %6, %9 : vector<8x8x128xf32>
    %11 = vector.shape_cast %1 : vector<1x128xf32> to vector<1x1x128xf32>
    %12 = vector.broadcast %11 : vector<1x1x128xf32> to vector<8x8x128xf32>
    %13 = arith.addf %10, %12 : vector<8x8x128xf32>
    %cst_12 = arith.constant 0.000000e+00 : f32
    %14 = vector.broadcast %cst_12 : f32 to vector<8x8x128xf32>
    %15 = arith.maximumf %13, %14 : vector<8x8x128xf32>
    %16 = vector.broadcast %7 : vector<8x8x1xf32> to vector<8x8x128xf32>
    %17 = arith.mulf %15, %16 : vector<8x8x128xf32>
    %18 = arith.truncf %17 : vector<8x8x128xf32> to vector<8x8x128xbf16>
    %c0_13 = arith.constant 0 : index
    %c0_14 = arith.constant 0 : index
    %19 = vector.load %arg8[%c0_13, %c0_14] : memref<64x128xf32, #tpu.memory_space<vmem>>, vector<64x128xf32>
    %20 = vector.shape_cast %18 : vector<8x8x128xbf16> to vector<64x128xbf16>
    %c0_15 = arith.constant 0 : index
    %c0_16 = arith.constant 0 : index
    %c0_17 = arith.constant 0 : index
    %21 = vector.load %arg2[%c0_15, %c0_16, %c0_17] : memref<9x128x128xbf16, #tpu.memory_space<vmem>>, vector<1x128x128xbf16>
    %22 = vector.shape_cast %21 : vector<1x128x128xbf16> to vector<128x128xbf16>
    %cst_18 = arith.constant dense<0.000000e+00> : vector<64x128xf32>
    %23 = tpu.matmul %20, %22, %cst_18 {dimension_numbers = #tpu.dot_dimension_numbers<[1], [0], [0], [1], [0, 0, 1, 1], [], []>} : vector<64x128xbf16>, vector<128x128xbf16>, vector<64x128xf32> -> vector<64x128xf32>
    %24 = arith.addf %19, %23 : vector<64x128xf32>
    %c0_19 = arith.constant 0 : index
    %c0_20 = arith.constant 0 : index
    %25 = vector.load %arg8[%c0_19, %c0_20] : memref<64x128xf32, #tpu.memory_space<vmem>>, vector<64x128xf32>
    tpu.vector_store %arg8[%c0_19, %c0_20], %24 {strides = array<i32>} : memref<64x128xf32, #tpu.memory_space<vmem>>, vector<64x128xf32>,
    %c0_21 = arith.constant 0 : index
    %c0_22 = arith.constant 0 : index
    %c1 = arith.constant 1 : index
    %c0_23 = arith.constant 0 : index
    %26 = vector.load %arg1[%c0_21, %c0_22, %c1, %c0_23] : memref<1x10x10x128xbf16, #tpu.memory_space<vmem>>, vector<1x8x8x128xbf16>
    %27 = vector.shape_cast %26 : vector<1x8x8x128xbf16> to vector<8x8x128xbf16>
    %28 = arith.extf %27 : vector<8x8x128xbf16> to vector<8x8x128xf32>
    %c0_24 = arith.constant 0 : index
    %c1_25 = arith.constant 1 : index
    %c0_26 = arith.constant 0 : index
    %29 = vector.load %arg5[%c0_24, %c1_25, %c0_26] : memref<10x10x1xf32, #tpu.memory_space<vmem>>, vector<8x8x1xf32>
    %30 = vector.shape_cast %0 : vector<1x128xf32> to vector<1x1x128xf32>
    %31 = vector.broadcast %30 : vector<1x1x128xf32> to vector<8x8x128xf32>
    %32 = arith.mulf %28, %31 : vector<8x8x128xf32>
    %33 = vector.shape_cast %1 : vector<1x128xf32> to vector<1x1x128xf32>
    %34 = vector.broadcast %33 : vector<1x1x128xf32> to vector<8x8x128xf32>
    %35 = arith.addf %32, %34 : vector<8x8x128xf32>
    %cst_27 = arith.constant 0.000000e+00 : f32
    %36 = vector.broadcast %cst_27 : f32 to vector<8x8x128xf32>
    %37 = arith.maximumf %35, %36 : vector<8x8x128xf32>
    %38 = vector.broadcast %29 : vector<8x8x1xf32> to vector<8x8x128xf32>
    %39 = arith.mulf %37, %38 : vector<8x8x128xf32>
    %40 = arith.truncf %39 : vector<8x8x128xf32> to vector<8x8x128xbf16>
    %c0_28 = arith.constant 0 : index
    %c0_29 = arith.constant 0 : index
    %41 = vector.load %arg8[%c0_28, %c0_29] : memref<64x128xf32, #tpu.memory_space<vmem>>, vector<64x128xf32>
    %42 = vector.shape_cast %40 : vector<8x8x128xbf16> to vector<64x128xbf16>
    %c1_30 = arith.constant 1 : index
    %c0_31 = arith.constant 0 : index
    %c0_32 = arith.constant 0 : index
    %43 = vector.load %arg2[%c1_30, %c0_31, %c0_32] : memref<9x128x128xbf16, #tpu.memory_space<vmem>>, vector<1x128x128xbf16>
    %44 = vector.shape_cast %43 : vector<1x128x128xbf16> to vector<128x128xbf16>
    %cst_33 = arith.constant dense<0.000000e+00> : vector<64x128xf32>
    %45 = tpu.matmul %42, %44, %cst_33 {dimension_numbers = #tpu.dot_dimension_numbers<[1], [0], [0], [1], [0, 0, 1, 1], [], []>} : vector<64x128xbf16>, vector<128x128xbf16>, vector<64x128xf32> -> vector<64x128xf32>
    %46 = arith.addf %41, %45 : vector<64x128xf32>
    %c0_34 = arith.constant 0 : index
    %c0_35 = arith.constant 0 : index
    %47 = vector.load %arg8[%c0_34, %c0_35] : memref<64x128xf32, #tpu.memory_space<vmem>>, vector<64x128xf32>
    tpu.vector_store %arg8[%c0_34, %c0_35], %46 {strides = array<i32>} : memref<64x128xf32, #tpu.memory_space<vmem>>, vector<64x128xf32>,
    %c0_36 = arith.constant 0 : index
    %c0_37 = arith.constant 0 : index
    %c2 = arith.constant 2 : index
    %c0_38 = arith.constant 0 : index
    %48 = vector.load %arg1[%c0_36, %c0_37, %c2, %c0_38] : memref<1x10x10x128xbf16, #tpu.memory_space<vmem>>, vector<1x8x8x128xbf16>
    %49 = vector.shape_cast %48 : vector<1x8x8x128xbf16> to vector<8x8x128xbf16>
    %50 = arith.extf %49 : vector<8x8x128xbf16> to vector<8x8x128xf32>
    %c0_39 = arith.constant 0 : index
    %c2_40 = arith.constant 2 : index
    %c0_41 = arith.constant 0 : index
    %51 = vector.load %arg5[%c0_39, %c2_40, %c0_41] : memref<10x10x1xf32, #tpu.memory_space<vmem>>, vector<8x8x1xf32>
    %52 = vector.shape_cast %0 : vector<1x128xf32> to vector<1x1x128xf32>
    %53 = vector.broadcast %52 : vector<1x1x128xf32> to vector<8x8x128xf32>
    %54 = arith.mulf %50, %53 : vector<8x8x128xf32>
    %55 = vector.shape_cast %1 : vector<1x128xf32> to vector<1x1x128xf32>
    %56 = vector.broadcast %55 : vector<1x1x128xf32> to vector<8x8x128xf32>
    %57 = arith.addf %54, %56 : vector<8x8x128xf32>
    %cst_42 = arith.constant 0.000000e+00 : f32
    %58 = vector.broadcast %cst_42 : f32 to vector<8x8x128xf32>
    %59 = arith.maximumf %57, %58 : vector<8x8x128xf32>
    %60 = vector.broadcast %51 : vector<8x8x1xf32> to vector<8x8x128xf32>
    %61 = arith.mulf %59, %60 : vector<8x8x128xf32>
    %62 = arith.truncf %61 : vector<8x8x128xf32> to vector<8x8x128xbf16>
    %c0_43 = arith.constant 0 : index
    %c0_44 = arith.constant 0 : index
    %63 = vector.load %arg8[%c0_43, %c0_44] : memref<64x128xf32, #tpu.memory_space<vmem>>, vector<64x128xf32>
    %64 = vector.shape_cast %62 : vector<8x8x128xbf16> to vector<64x128xbf16>
    %c2_45 = arith.constant 2 : index
    %c0_46 = arith.constant 0 : index
    %c0_47 = arith.constant 0 : index
    %65 = vector.load %arg2[%c2_45, %c0_46, %c0_47] : memref<9x128x128xbf16, #tpu.memory_space<vmem>>, vector<1x128x128xbf16>
    %66 = vector.shape_cast %65 : vector<1x128x128xbf16> to vector<128x128xbf16>
    %cst_48 = arith.constant dense<0.000000e+00> : vector<64x128xf32>
    %67 = tpu.matmul %64, %66, %cst_48 {dimension_numbers = #tpu.dot_dimension_numbers<[1], [0], [0], [1], [0, 0, 1, 1], [], []>} : vector<64x128xbf16>, vector<128x128xbf16>, vector<64x128xf32> -> vector<64x128xf32>
    %68 = arith.addf %63, %67 : vector<64x128xf32>
    %c0_49 = arith.constant 0 : index
    %c0_50 = arith.constant 0 : index
    %69 = vector.load %arg8[%c0_49, %c0_50] : memref<64x128xf32, #tpu.memory_space<vmem>>, vector<64x128xf32>
    tpu.vector_store %arg8[%c0_49, %c0_50], %68 {strides = array<i32>} : memref<64x128xf32, #tpu.memory_space<vmem>>, vector<64x128xf32>,
    %c0_51 = arith.constant 0 : index
    %c1_52 = arith.constant 1 : index
    %c0_53 = arith.constant 0 : index
    %c0_54 = arith.constant 0 : index
    %70 = vector.load %arg1[%c0_51, %c1_52, %c0_53, %c0_54] : memref<1x10x10x128xbf16, #tpu.memory_space<vmem>>, vector<1x8x8x128xbf16>
    %71 = vector.shape_cast %70 : vector<1x8x8x128xbf16> to vector<8x8x128xbf16>
    %72 = arith.extf %71 : vector<8x8x128xbf16> to vector<8x8x128xf32>
    %c1_55 = arith.constant 1 : index
    %c0_56 = arith.constant 0 : index
    %c0_57 = arith.constant 0 : index
    %73 = vector.load %arg5[%c1_55, %c0_56, %c0_57] : memref<10x10x1xf32, #tpu.memory_space<vmem>>, vector<8x8x1xf32>
    %74 = vector.shape_cast %0 : vector<1x128xf32> to vector<1x1x128xf32>
    %75 = vector.broadcast %74 : vector<1x1x128xf32> to vector<8x8x128xf32>
    %76 = arith.mulf %72, %75 : vector<8x8x128xf32>
    %77 = vector.shape_cast %1 : vector<1x128xf32> to vector<1x1x128xf32>
    %78 = vector.broadcast %77 : vector<1x1x128xf32> to vector<8x8x128xf32>
    %79 = arith.addf %76, %78 : vector<8x8x128xf32>
    %cst_58 = arith.constant 0.000000e+00 : f32
    %80 = vector.broadcast %cst_58 : f32 to vector<8x8x128xf32>
    %81 = arith.maximumf %79, %80 : vector<8x8x128xf32>
    %82 = vector.broadcast %73 : vector<8x8x1xf32> to vector<8x8x128xf32>
    %83 = arith.mulf %81, %82 : vector<8x8x128xf32>
    %84 = arith.truncf %83 : vector<8x8x128xf32> to vector<8x8x128xbf16>
    %c0_59 = arith.constant 0 : index
    %c0_60 = arith.constant 0 : index
    %85 = vector.load %arg8[%c0_59, %c0_60] : memref<64x128xf32, #tpu.memory_space<vmem>>, vector<64x128xf32>
    %86 = vector.shape_cast %84 : vector<8x8x128xbf16> to vector<64x128xbf16>
    %c3 = arith.constant 3 : index
    %c0_61 = arith.constant 0 : index
    %c0_62 = arith.constant 0 : index
    %87 = vector.load %arg2[%c3, %c0_61, %c0_62] : memref<9x128x128xbf16, #tpu.memory_space<vmem>>, vector<1x128x128xbf16>
    %88 = vector.shape_cast %87 : vector<1x128x128xbf16> to vector<128x128xbf16>
    %cst_63 = arith.constant dense<0.000000e+00> : vector<64x128xf32>
    %89 = tpu.matmul %86, %88, %cst_63 {dimension_numbers = #tpu.dot_dimension_numbers<[1], [0], [0], [1], [0, 0, 1, 1], [], []>} : vector<64x128xbf16>, vector<128x128xbf16>, vector<64x128xf32> -> vector<64x128xf32>
    %90 = arith.addf %85, %89 : vector<64x128xf32>
    %c0_64 = arith.constant 0 : index
    %c0_65 = arith.constant 0 : index
    %91 = vector.load %arg8[%c0_64, %c0_65] : memref<64x128xf32, #tpu.memory_space<vmem>>, vector<64x128xf32>
    tpu.vector_store %arg8[%c0_64, %c0_65], %90 {strides = array<i32>} : memref<64x128xf32, #tpu.memory_space<vmem>>, vector<64x128xf32>,
    %c0_66 = arith.constant 0 : index
    %c1_67 = arith.constant 1 : index
    %c1_68 = arith.constant 1 : index
    %c0_69 = arith.constant 0 : index
    %92 = vector.load %arg1[%c0_66, %c1_67, %c1_68, %c0_69] : memref<1x10x10x128xbf16, #tpu.memory_space<vmem>>, vector<1x8x8x128xbf16>
    %93 = vector.shape_cast %92 : vector<1x8x8x128xbf16> to vector<8x8x128xbf16>
    %94 = arith.extf %93 : vector<8x8x128xbf16> to vector<8x8x128xf32>
    %c1_70 = arith.constant 1 : index
    %c1_71 = arith.constant 1 : index
    %c0_72 = arith.constant 0 : index
    %95 = vector.load %arg5[%c1_70, %c1_71, %c0_72] : memref<10x10x1xf32, #tpu.memory_space<vmem>>, vector<8x8x1xf32>
    %96 = vector.shape_cast %0 : vector<1x128xf32> to vector<1x1x128xf32>
    %97 = vector.broadcast %96 : vector<1x1x128xf32> to vector<8x8x128xf32>
    %98 = arith.mulf %94, %97 : vector<8x8x128xf32>
    %99 = vector.shape_cast %1 : vector<1x128xf32> to vector<1x1x128xf32>
    %100 = vector.broadcast %99 : vector<1x1x128xf32> to vector<8x8x128xf32>
    %101 = arith.addf %98, %100 : vector<8x8x128xf32>
    %cst_73 = arith.constant 0.000000e+00 : f32
    %102 = vector.broadcast %cst_73 : f32 to vector<8x8x128xf32>
    %103 = arith.maximumf %101, %102 : vector<8x8x128xf32>
    %104 = vector.broadcast %95 : vector<8x8x1xf32> to vector<8x8x128xf32>
    %105 = arith.mulf %103, %104 : vector<8x8x128xf32>
    %106 = arith.truncf %105 : vector<8x8x128xf32> to vector<8x8x128xbf16>
    %c0_74 = arith.constant 0 : index
    %c0_75 = arith.constant 0 : index
    %107 = vector.load %arg8[%c0_74, %c0_75] : memref<64x128xf32, #tpu.memory_space<vmem>>, vector<64x128xf32>
    %108 = vector.shape_cast %106 : vector<8x8x128xbf16> to vector<64x128xbf16>
    %c4 = arith.constant 4 : index
    %c0_76 = arith.constant 0 : index
    %c0_77 = arith.constant 0 : index
    %109 = vector.load %arg2[%c4, %c0_76, %c0_77] : memref<9x128x128xbf16, #tpu.memory_space<vmem>>, vector<1x128x128xbf16>
    %110 = vector.shape_cast %109 : vector<1x128x128xbf16> to vector<128x128xbf16>
    %cst_78 = arith.constant dense<0.000000e+00> : vector<64x128xf32>
    %111 = tpu.matmul %108, %110, %cst_78 {dimension_numbers = #tpu.dot_dimension_numbers<[1], [0], [0], [1], [0, 0, 1, 1], [], []>} : vector<64x128xbf16>, vector<128x128xbf16>, vector<64x128xf32> -> vector<64x128xf32>
    %112 = arith.addf %107, %111 : vector<64x128xf32>
    %c0_79 = arith.constant 0 : index
    %c0_80 = arith.constant 0 : index
    %113 = vector.load %arg8[%c0_79, %c0_80] : memref<64x128xf32, #tpu.memory_space<vmem>>, vector<64x128xf32>
    tpu.vector_store %arg8[%c0_79, %c0_80], %112 {strides = array<i32>} : memref<64x128xf32, #tpu.memory_space<vmem>>, vector<64x128xf32>,
    %c0_81 = arith.constant 0 : index
    %c1_82 = arith.constant 1 : index
    %c2_83 = arith.constant 2 : index
    %c0_84 = arith.constant 0 : index
    %114 = vector.load %arg1[%c0_81, %c1_82, %c2_83, %c0_84] : memref<1x10x10x128xbf16, #tpu.memory_space<vmem>>, vector<1x8x8x128xbf16>
    %115 = vector.shape_cast %114 : vector<1x8x8x128xbf16> to vector<8x8x128xbf16>
    %116 = arith.extf %115 : vector<8x8x128xbf16> to vector<8x8x128xf32>
    %c1_85 = arith.constant 1 : index
    %c2_86 = arith.constant 2 : index
    %c0_87 = arith.constant 0 : index
    %117 = vector.load %arg5[%c1_85, %c2_86, %c0_87] : memref<10x10x1xf32, #tpu.memory_space<vmem>>, vector<8x8x1xf32>
    %118 = vector.shape_cast %0 : vector<1x128xf32> to vector<1x1x128xf32>
    %119 = vector.broadcast %118 : vector<1x1x128xf32> to vector<8x8x128xf32>
    %120 = arith.mulf %116, %119 : vector<8x8x128xf32>
    %121 = vector.shape_cast %1 : vector<1x128xf32> to vector<1x1x128xf32>
    %122 = vector.broadcast %121 : vector<1x1x128xf32> to vector<8x8x128xf32>
    %123 = arith.addf %120, %122 : vector<8x8x128xf32>
    %cst_88 = arith.constant 0.000000e+00 : f32
    %124 = vector.broadcast %cst_88 : f32 to vector<8x8x128xf32>
    %125 = arith.maximumf %123, %124 : vector<8x8x128xf32>
    %126 = vector.broadcast %117 : vector<8x8x1xf32> to vector<8x8x128xf32>
    %127 = arith.mulf %125, %126 : vector<8x8x128xf32>
    %128 = arith.truncf %127 : vector<8x8x128xf32> to vector<8x8x128xbf16>
    %c0_89 = arith.constant 0 : index
    %c0_90 = arith.constant 0 : index
    %129 = vector.load %arg8[%c0_89, %c0_90] : memref<64x128xf32, #tpu.memory_space<vmem>>, vector<64x128xf32>
    %130 = vector.shape_cast %128 : vector<8x8x128xbf16> to vector<64x128xbf16>
    %c5 = arith.constant 5 : index
    %c0_91 = arith.constant 0 : index
    %c0_92 = arith.constant 0 : index
    %131 = vector.load %arg2[%c5, %c0_91, %c0_92] : memref<9x128x128xbf16, #tpu.memory_space<vmem>>, vector<1x128x128xbf16>
    %132 = vector.shape_cast %131 : vector<1x128x128xbf16> to vector<128x128xbf16>
    %cst_93 = arith.constant dense<0.000000e+00> : vector<64x128xf32>
    %133 = tpu.matmul %130, %132, %cst_93 {dimension_numbers = #tpu.dot_dimension_numbers<[1], [0], [0], [1], [0, 0, 1, 1], [], []>} : vector<64x128xbf16>, vector<128x128xbf16>, vector<64x128xf32> -> vector<64x128xf32>
    %134 = arith.addf %129, %133 : vector<64x128xf32>
    %c0_94 = arith.constant 0 : index
    %c0_95 = arith.constant 0 : index
    %135 = vector.load %arg8[%c0_94, %c0_95] : memref<64x128xf32, #tpu.memory_space<vmem>>, vector<64x128xf32>
    tpu.vector_store %arg8[%c0_94, %c0_95], %134 {strides = array<i32>} : memref<64x128xf32, #tpu.memory_space<vmem>>, vector<64x128xf32>,
    %c0_96 = arith.constant 0 : index
    %c2_97 = arith.constant 2 : index
    %c0_98 = arith.constant 0 : index
    %c0_99 = arith.constant 0 : index
    %136 = vector.load %arg1[%c0_96, %c2_97, %c0_98, %c0_99] : memref<1x10x10x128xbf16, #tpu.memory_space<vmem>>, vector<1x8x8x128xbf16>
    %137 = vector.shape_cast %136 : vector<1x8x8x128xbf16> to vector<8x8x128xbf16>
    %138 = arith.extf %137 : vector<8x8x128xbf16> to vector<8x8x128xf32>
    %c2_100 = arith.constant 2 : index
    %c0_101 = arith.constant 0 : index
    %c0_102 = arith.constant 0 : index
    %139 = vector.load %arg5[%c2_100, %c0_101, %c0_102] : memref<10x10x1xf32, #tpu.memory_space<vmem>>, vector<8x8x1xf32>
    %140 = vector.shape_cast %0 : vector<1x128xf32> to vector<1x1x128xf32>
    %141 = vector.broadcast %140 : vector<1x1x128xf32> to vector<8x8x128xf32>
    %142 = arith.mulf %138, %141 : vector<8x8x128xf32>
    %143 = vector.shape_cast %1 : vector<1x128xf32> to vector<1x1x128xf32>
    %144 = vector.broadcast %143 : vector<1x1x128xf32> to vector<8x8x128xf32>
    %145 = arith.addf %142, %144 : vector<8x8x128xf32>
    %cst_103 = arith.constant 0.000000e+00 : f32
    %146 = vector.broadcast %cst_103 : f32 to vector<8x8x128xf32>
    %147 = arith.maximumf %145, %146 : vector<8x8x128xf32>
    %148 = vector.broadcast %139 : vector<8x8x1xf32> to vector<8x8x128xf32>
    %149 = arith.mulf %147, %148 : vector<8x8x128xf32>
    %150 = arith.truncf %149 : vector<8x8x128xf32> to vector<8x8x128xbf16>
    %c0_104 = arith.constant 0 : index
    %c0_105 = arith.constant 0 : index
    %151 = vector.load %arg8[%c0_104, %c0_105] : memref<64x128xf32, #tpu.memory_space<vmem>>, vector<64x128xf32>
    %152 = vector.shape_cast %150 : vector<8x8x128xbf16> to vector<64x128xbf16>
    %c6 = arith.constant 6 : index
    %c0_106 = arith.constant 0 : index
    %c0_107 = arith.constant 0 : index
    %153 = vector.load %arg2[%c6, %c0_106, %c0_107] : memref<9x128x128xbf16, #tpu.memory_space<vmem>>, vector<1x128x128xbf16>
    %154 = vector.shape_cast %153 : vector<1x128x128xbf16> to vector<128x128xbf16>
    %cst_108 = arith.constant dense<0.000000e+00> : vector<64x128xf32>
    %155 = tpu.matmul %152, %154, %cst_108 {dimension_numbers = #tpu.dot_dimension_numbers<[1], [0], [0], [1], [0, 0, 1, 1], [], []>} : vector<64x128xbf16>, vector<128x128xbf16>, vector<64x128xf32> -> vector<64x128xf32>
    %156 = arith.addf %151, %155 : vector<64x128xf32>
    %c0_109 = arith.constant 0 : index
    %c0_110 = arith.constant 0 : index
    %157 = vector.load %arg8[%c0_109, %c0_110] : memref<64x128xf32, #tpu.memory_space<vmem>>, vector<64x128xf32>
    tpu.vector_store %arg8[%c0_109, %c0_110], %156 {strides = array<i32>} : memref<64x128xf32, #tpu.memory_space<vmem>>, vector<64x128xf32>,
    %c0_111 = arith.constant 0 : index
    %c2_112 = arith.constant 2 : index
    %c1_113 = arith.constant 1 : index
    %c0_114 = arith.constant 0 : index
    %158 = vector.load %arg1[%c0_111, %c2_112, %c1_113, %c0_114] : memref<1x10x10x128xbf16, #tpu.memory_space<vmem>>, vector<1x8x8x128xbf16>
    %159 = vector.shape_cast %158 : vector<1x8x8x128xbf16> to vector<8x8x128xbf16>
    %160 = arith.extf %159 : vector<8x8x128xbf16> to vector<8x8x128xf32>
    %c2_115 = arith.constant 2 : index
    %c1_116 = arith.constant 1 : index
    %c0_117 = arith.constant 0 : index
    %161 = vector.load %arg5[%c2_115, %c1_116, %c0_117] : memref<10x10x1xf32, #tpu.memory_space<vmem>>, vector<8x8x1xf32>
    %162 = vector.shape_cast %0 : vector<1x128xf32> to vector<1x1x128xf32>
    %163 = vector.broadcast %162 : vector<1x1x128xf32> to vector<8x8x128xf32>
    %164 = arith.mulf %160, %163 : vector<8x8x128xf32>
    %165 = vector.shape_cast %1 : vector<1x128xf32> to vector<1x1x128xf32>
    %166 = vector.broadcast %165 : vector<1x1x128xf32> to vector<8x8x128xf32>
    %167 = arith.addf %164, %166 : vector<8x8x128xf32>
    %cst_118 = arith.constant 0.000000e+00 : f32
    %168 = vector.broadcast %cst_118 : f32 to vector<8x8x128xf32>
    %169 = arith.maximumf %167, %168 : vector<8x8x128xf32>
    %170 = vector.broadcast %161 : vector<8x8x1xf32> to vector<8x8x128xf32>
    %171 = arith.mulf %169, %170 : vector<8x8x128xf32>
    %172 = arith.truncf %171 : vector<8x8x128xf32> to vector<8x8x128xbf16>
    %c0_119 = arith.constant 0 : index
    %c0_120 = arith.constant 0 : index
    %173 = vector.load %arg8[%c0_119, %c0_120] : memref<64x128xf32, #tpu.memory_space<vmem>>, vector<64x128xf32>
    %174 = vector.shape_cast %172 : vector<8x8x128xbf16> to vector<64x128xbf16>
    %c7 = arith.constant 7 : index
    %c0_121 = arith.constant 0 : index
    %c0_122 = arith.constant 0 : index
    %175 = vector.load %arg2[%c7, %c0_121, %c0_122] : memref<9x128x128xbf16, #tpu.memory_space<vmem>>, vector<1x128x128xbf16>
    %176 = vector.shape_cast %175 : vector<1x128x128xbf16> to vector<128x128xbf16>
    %cst_123 = arith.constant dense<0.000000e+00> : vector<64x128xf32>
    %177 = tpu.matmul %174, %176, %cst_123 {dimension_numbers = #tpu.dot_dimension_numbers<[1], [0], [0], [1], [0, 0, 1, 1], [], []>} : vector<64x128xbf16>, vector<128x128xbf16>, vector<64x128xf32> -> vector<64x128xf32>
    %178 = arith.addf %173, %177 : vector<64x128xf32>
    %c0_124 = arith.constant 0 : index
    %c0_125 = arith.constant 0 : index
    %179 = vector.load %arg8[%c0_124, %c0_125] : memref<64x128xf32, #tpu.memory_space<vmem>>, vector<64x128xf32>
    tpu.vector_store %arg8[%c0_124, %c0_125], %178 {strides = array<i32>} : memref<64x128xf32, #tpu.memory_space<vmem>>, vector<64x128xf32>,
    %c0_126 = arith.constant 0 : index
    %c2_127 = arith.constant 2 : index
    %c2_128 = arith.constant 2 : index
    %c0_129 = arith.constant 0 : index
    %180 = vector.load %arg1[%c0_126, %c2_127, %c2_128, %c0_129] : memref<1x10x10x128xbf16, #tpu.memory_space<vmem>>, vector<1x8x8x128xbf16>
    %181 = vector.shape_cast %180 : vector<1x8x8x128xbf16> to vector<8x8x128xbf16>
    %182 = arith.extf %181 : vector<8x8x128xbf16> to vector<8x8x128xf32>
    %c2_130 = arith.constant 2 : index
    %c2_131 = arith.constant 2 : index
    %c0_132 = arith.constant 0 : index
    %183 = vector.load %arg5[%c2_130, %c2_131, %c0_132] : memref<10x10x1xf32, #tpu.memory_space<vmem>>, vector<8x8x1xf32>
    %184 = vector.shape_cast %0 : vector<1x128xf32> to vector<1x1x128xf32>
    %185 = vector.broadcast %184 : vector<1x1x128xf32> to vector<8x8x128xf32>
    %186 = arith.mulf %182, %185 : vector<8x8x128xf32>
    %187 = vector.shape_cast %1 : vector<1x128xf32> to vector<1x1x128xf32>
    %188 = vector.broadcast %187 : vector<1x1x128xf32> to vector<8x8x128xf32>
    %189 = arith.addf %186, %188 : vector<8x8x128xf32>
    %cst_133 = arith.constant 0.000000e+00 : f32
    %190 = vector.broadcast %cst_133 : f32 to vector<8x8x128xf32>
    %191 = arith.maximumf %189, %190 : vector<8x8x128xf32>
    %192 = vector.broadcast %183 : vector<8x8x1xf32> to vector<8x8x128xf32>
    %193 = arith.mulf %191, %192 : vector<8x8x128xf32>
    %194 = arith.truncf %193 : vector<8x8x128xf32> to vector<8x8x128xbf16>
    %c0_134 = arith.constant 0 : index
    %c0_135 = arith.constant 0 : index
    %195 = vector.load %arg8[%c0_134, %c0_135] : memref<64x128xf32, #tpu.memory_space<vmem>>, vector<64x128xf32>
    %196 = vector.shape_cast %194 : vector<8x8x128xbf16> to vector<64x128xbf16>
    %c8 = arith.constant 8 : index
    %c0_136 = arith.constant 0 : index
    %c0_137 = arith.constant 0 : index
    %197 = vector.load %arg2[%c8, %c0_136, %c0_137] : memref<9x128x128xbf16, #tpu.memory_space<vmem>>, vector<1x128x128xbf16>
    %198 = vector.shape_cast %197 : vector<1x128x128xbf16> to vector<128x128xbf16>
    %cst_138 = arith.constant dense<0.000000e+00> : vector<64x128xf32>
    %199 = tpu.matmul %196, %198, %cst_138 {dimension_numbers = #tpu.dot_dimension_numbers<[1], [0], [0], [1], [0, 0, 1, 1], [], []>} : vector<64x128xbf16>, vector<128x128xbf16>, vector<64x128xf32> -> vector<64x128xf32>
    %200 = arith.addf %195, %199 : vector<64x128xf32>
    %c0_139 = arith.constant 0 : index
    %c0_140 = arith.constant 0 : index
    %201 = vector.load %arg8[%c0_139, %c0_140] : memref<64x128xf32, #tpu.memory_space<vmem>>, vector<64x128xf32>
    tpu.vector_store %arg8[%c0_139, %c0_140], %200 {strides = array<i32>} : memref<64x128xf32, #tpu.memory_space<vmem>>, vector<64x128xf32>,
    %c0_141 = arith.constant 0 : index
    %c0_142 = arith.constant 0 : index
    %202 = vector.load %arg8[%c0_141, %c0_142] : memref<64x128xf32, #tpu.memory_space<vmem>>, vector<64x128xf32>
    %203 = arith.truncf %202 : vector<64x128xf32> to vector<64x128xbf16>
    %c0_143 = arith.constant 0 : index
    %c0_144 = arith.constant 0 : index
    %204 = vector.load %arg6[%c0_143, %c0_144] : memref<64x128xbf16, #tpu.memory_space<vmem>>, vector<64x128xbf16>
    tpu.vector_store %arg6[%c0_143, %c0_144], %203 {strides = array<i32>} : memref<64x128xbf16, #tpu.memory_space<vmem>>, vector<64x128xbf16>,
    %cst_145 = arith.constant dense<0.000000e+00> : vector<128xf32>
    %205 = vector.multi_reduction <add>, %202, %cst_145 [0] : vector<64x128xf32> to vector<128xf32>
    %206 = vector.shape_cast %205 : vector<128xf32> to vector<1x128xf32>
    %207 = arith.mulf %202, %202 : vector<64x128xf32>
    %cst_146 = arith.constant dense<0.000000e+00> : vector<128xf32>
    %208 = vector.multi_reduction <add>, %207, %cst_146 [0] : vector<64x128xf32> to vector<128xf32>
    %209 = vector.shape_cast %208 : vector<128xf32> to vector<1x128xf32>
    %210 = tpu.concatenate %206, %209 in 0 : vector<1x128xf32>, vector<1x128xf32> -> vector<2x128xf32>
    %211 = vector.shape_cast %210 : vector<2x128xf32> to vector<1x2x128xf32>
    %c0_147 = arith.constant 0 : index
    %c0_148 = arith.constant 0 : index
    %c0_149 = arith.constant 0 : index
    %212 = vector.load %arg7[%c0_147, %c0_148, %c0_149] : memref<1x2x128xf32, #tpu.memory_space<vmem>>, vector<1x2x128xf32>
    tpu.vector_store %arg7[%c0_147, %c0_148, %c0_149], %211 {strides = array<i32>} : memref<1x2x128xf32, #tpu.memory_space<vmem>>, vector<1x2x128xf32>,
    return
  }
  func.func @transform_0(%arg0: i32) -> (i32, i32, i32, i32) {
    %c0_i32 = arith.constant 0 : i32
    %c0_i32_0 = arith.constant 0 : i32
    %c0_i32_1 = arith.constant 0 : i32
    %c0_i32_2 = arith.constant 0 : i32
    return %arg0, %c0_i32, %c0_i32_0, %c0_i32_1 : i32, i32, i32, i32
  }
  func.func @transform_1(%arg0: i32) -> (i32, i32, i32) {
    %c0_i32 = arith.constant 0 : i32
    %c0_i32_0 = arith.constant 0 : i32
    %c0_i32_1 = arith.constant 0 : i32
    %c0_i32_2 = arith.constant 0 : i32
    return %c0_i32, %c0_i32_0, %c0_i32_1 : i32, i32, i32
  }
  func.func @transform_2(%arg0: i32) -> (i32, i32) {
    %c0_i32 = arith.constant 0 : i32
    %c0_i32_0 = arith.constant 0 : i32
    %c0_i32_1 = arith.constant 0 : i32
    return %c0_i32, %c0_i32_0 : i32, i32
  }
  func.func @transform_3(%arg0: i32) -> (i32, i32) {
    %c0_i32 = arith.constant 0 : i32
    %c0_i32_0 = arith.constant 0 : i32
    %c0_i32_1 = arith.constant 0 : i32
    return %c0_i32, %c0_i32_0 : i32, i32
  }
  func.func @transform_4(%arg0: i32) -> (i32, i32, i32) {
    %c0_i32 = arith.constant 0 : i32
    %c0_i32_0 = arith.constant 0 : i32
    %c0_i32_1 = arith.constant 0 : i32
    %c0_i32_2 = arith.constant 0 : i32
    return %c0_i32, %c0_i32_0, %c0_i32_1 : i32, i32, i32
  }
  func.func @transform_5(%arg0: i32) -> (i32, i32) {
    %c0_i32 = arith.constant 0 : i32
    %c0_i32_0 = arith.constant 0 : i32
    return %arg0, %c0_i32 : i32, i32
  }
  func.func @transform_6(%arg0: i32) -> (i32, i32, i32) {
    %c0_i32 = arith.constant 0 : i32
    %c0_i32_0 = arith.constant 0 : i32
    %c0_i32_1 = arith.constant 0 : i32
    return %arg0, %c0_i32, %c0_i32_0 : i32, i32, i32
  }
}

module attributes {stable_mosaic.version = 11 : i64} {
  func.func @_bn_add_proj_kernel(%arg0: i32, %arg1: memref<64x128xbf16, #tpu.memory_space<vmem>>, %arg2: memref<1x128xf32, #tpu.memory_space<vmem>>, %arg3: memref<1x128xf32, #tpu.memory_space<vmem>>, %arg4: memref<64x128xbf16, #tpu.memory_space<vmem>>, %arg5: memref<1x128xf32, #tpu.memory_space<vmem>>, %arg6: memref<1x128xf32, #tpu.memory_space<vmem>>, %arg7: memref<64x128xf32, #tpu.memory_space<vmem>>) attributes {dimension_semantics = [#tpu.dimension_semantics<parallel>], iteration_bounds = array<i64: 2>, scalar_prefetch = 0 : i64, scratch_operands = 0 : i64, tpu.core_type = #tpu.core_type<tc>, window_params = [{transform_indices = @transform_0, window_bounds = array<i64: 64, 128>}, {pipeline_mode = #tpu.pipeline_mode<synchronous>, transform_indices = @transform_1, window_bounds = array<i64: 1, 128>}, {pipeline_mode = #tpu.pipeline_mode<synchronous>, transform_indices = @transform_2, window_bounds = array<i64: 1, 128>}, {transform_indices = @transform_3, window_bounds = array<i64: 64, 128>}, {pipeline_mode = #tpu.pipeline_mode<synchronous>, transform_indices = @transform_4, window_bounds = array<i64: 1, 128>}, {pipeline_mode = #tpu.pipeline_mode<synchronous>, transform_indices = @transform_5, window_bounds = array<i64: 1, 128>}, {transform_indices = @transform_6, window_bounds = array<i64: 64, 128>}]} {
    %c0 = arith.constant 0 : index
    %c0_0 = arith.constant 0 : index
    %0 = vector.load %arg1[%c0, %c0_0] : memref<64x128xbf16, #tpu.memory_space<vmem>>, vector<64x128xbf16>
    %1 = arith.extf %0 : vector<64x128xbf16> to vector<64x128xf32>
    %c0_1 = arith.constant 0 : index
    %c0_2 = arith.constant 0 : index
    %2 = vector.load %arg4[%c0_1, %c0_2] : memref<64x128xbf16, #tpu.memory_space<vmem>>, vector<64x128xbf16>
    %3 = arith.extf %2 : vector<64x128xbf16> to vector<64x128xf32>
    %c0_3 = arith.constant 0 : index
    %c0_4 = arith.constant 0 : index
    %4 = vector.load %arg2[%c0_3, %c0_4] : memref<1x128xf32, #tpu.memory_space<vmem>>, vector<1x128xf32>
    %5 = vector.broadcast %4 : vector<1x128xf32> to vector<64x128xf32>
    %6 = arith.mulf %1, %5 : vector<64x128xf32>
    %c0_5 = arith.constant 0 : index
    %c0_6 = arith.constant 0 : index
    %7 = vector.load %arg3[%c0_5, %c0_6] : memref<1x128xf32, #tpu.memory_space<vmem>>, vector<1x128xf32>
    %8 = vector.broadcast %7 : vector<1x128xf32> to vector<64x128xf32>
    %9 = arith.addf %6, %8 : vector<64x128xf32>
    %c0_7 = arith.constant 0 : index
    %c0_8 = arith.constant 0 : index
    %10 = vector.load %arg5[%c0_7, %c0_8] : memref<1x128xf32, #tpu.memory_space<vmem>>, vector<1x128xf32>
    %11 = vector.broadcast %10 : vector<1x128xf32> to vector<64x128xf32>
    %12 = arith.mulf %3, %11 : vector<64x128xf32>
    %13 = arith.addf %9, %12 : vector<64x128xf32>
    %c0_9 = arith.constant 0 : index
    %c0_10 = arith.constant 0 : index
    %14 = vector.load %arg6[%c0_9, %c0_10] : memref<1x128xf32, #tpu.memory_space<vmem>>, vector<1x128xf32>
    %15 = vector.broadcast %14 : vector<1x128xf32> to vector<64x128xf32>
    %16 = arith.addf %13, %15 : vector<64x128xf32>
    %c0_11 = arith.constant 0 : index
    %c0_12 = arith.constant 0 : index
    %17 = vector.load %arg7[%c0_11, %c0_12] : memref<64x128xf32, #tpu.memory_space<vmem>>, vector<64x128xf32>
    tpu.vector_store %arg7[%c0_11, %c0_12], %16 {strides = array<i32>} : memref<64x128xf32, #tpu.memory_space<vmem>>, vector<64x128xf32>,
    return
  }
  func.func @transform_0(%arg0: i32) -> (i32, i32) {
    %c0_i32 = arith.constant 0 : i32
    %c0_i32_0 = arith.constant 0 : i32
    return %arg0, %c0_i32 : i32, i32
  }
  func.func @transform_1(%arg0: i32) -> (i32, i32) {
    %c0_i32 = arith.constant 0 : i32
    %c0_i32_0 = arith.constant 0 : i32
    %c0_i32_1 = arith.constant 0 : i32
    return %c0_i32, %c0_i32_0 : i32, i32
  }
  func.func @transform_2(%arg0: i32) -> (i32, i32) {
    %c0_i32 = arith.constant 0 : i32
    %c0_i32_0 = arith.constant 0 : i32
    %c0_i32_1 = arith.constant 0 : i32
    return %c0_i32, %c0_i32_0 : i32, i32
  }
  func.func @transform_3(%arg0: i32) -> (i32, i32) {
    %c0_i32 = arith.constant 0 : i32
    %c0_i32_0 = arith.constant 0 : i32
    return %arg0, %c0_i32 : i32, i32
  }
  func.func @transform_4(%arg0: i32) -> (i32, i32) {
    %c0_i32 = arith.constant 0 : i32
    %c0_i32_0 = arith.constant 0 : i32
    %c0_i32_1 = arith.constant 0 : i32
    return %c0_i32, %c0_i32_0 : i32, i32
  }
  func.func @transform_5(%arg0: i32) -> (i32, i32) {
    %c0_i32 = arith.constant 0 : i32
    %c0_i32_0 = arith.constant 0 : i32
    %c0_i32_1 = arith.constant 0 : i32
    return %c0_i32, %c0_i32_0 : i32, i32
  }
  func.func @transform_6(%arg0: i32) -> (i32, i32) {
    %c0_i32 = arith.constant 0 : i32
    %c0_i32_0 = arith.constant 0 : i32
    return %arg0, %c0_i32 : i32, i32
  }
}

</mosaic_0001>

<bundles_post_ra>
// kernel: basic_block_forward.7
= control target key start
LH: loop header
LB: loop body
LE: loop exit
PB: predicated region body
PF: predicated region fallthrough
CT: control target
= control target key end

     0   :  { %s559_s21 = smov 0   ;;  %s637_s0 = inlined_call_operand.vmem [shape: bf16[128,128], index: 0, kind: input, shape index: {}]   ;;  %s638_s1 = inlined_call_operand.vmem [shape: f32[1,128], index: 1, kind: input, shape index: {}]   ;;  %s639_s2 = inlined_call_operand.vmem [shape: f32[1,128], index: 2, kind: input, shape index: {}]   ;;  %s640_s3 = inlined_call_operand.vmem [shape: bf16[128,128], index: 3, kind: input, shape index: {}]   ;;  %s641_s4 = inlined_call_operand.vmem [shape: f32[1,128], index: 4, kind: input, shape index: {}]   ;;  %s642_s5 = inlined_call_operand.vmem [shape: f32[1,128], index: 5, kind: input, shape index: {}]   ;;  %s643_s6 = inlined_call_operand.vmem [shape: f32[128,128], index: 6, kind: output, shape index: {}]  }
   0x1 LB: > { %s453_s22 = sadd.s32 4294967295, %s522_s21   ;;  %p457_p0 = scmp.ge.s32.totalorder %s522_s21, 1  ;;  %s522_s21 = sphi %s559_s21, %s16_s21  }
   0x2   : > { %p224_p1 = scmp.lt.s32.totalorder %s522_s21, 3 }
   0x4   : > { %p225_p2 = pnand %p457_p0, %p224_p1 }
   0x5   : > { %s458_s23 = sshll.u32 (!%p225_p2), %s453_s22, 3 }
   0x6   : > { %228 = sbr.rel (%p225_p2) target bundleno = 36 (0x24), region = 44  ;;  %p260_p3 = scmp.lt.s32.totalorder (!%p225_p2), %s458_s23, 15 }
   0xb   : > { %s645_s23 = smov (!%p260_p3, %s458_s23), 15  ;;  %v583_v0 = vld [vmem:[%s638_s1] ss:$0 sm:$0xff] }
   0xc   : > { %s459_s24 = sshll.u32 %s645_s23, 2  ;;  %v588_v1 = vld [vmem:[%s641_s4] ss:$0 sm:$0xff]  ;;  %s463_s13 = sshll.u32 %s645_s23, 3 }
   0xd   : > { %s573_s27 = scalar_lea.vmem %s637_s0, %s459_s24  ;;  %s578_s30 = scalar_lea.vmem %s640_s3, %s459_s24  ;;  %v465_v10 = vld [vmem:[%s639_s2] ss:$0 sm:$0xff] }
   0xe   : > { %v471_v2 = vld [vmem:[%s573_s27] sm:$0xff]   ;;  %v502_v4 = vld [vmem:[%s573_s27 + $0x8] sm:$0xff]   ;;  %v503_v15 = vld [vmem:[%s573_s27 + $0x10] sm:$0xff]   ;;  %s618_s18 = scalar_lea.vmem %s643_s6, %s463_s13 }
   0xf   : > { %v487_v3 = vld [vmem:[%s578_s30] sm:$0xff]   ;;  %v472_v5 = vunpack.c.l.bf16 %v471_v2  ;;  %v473_v7 = vunpack.c.h.bf16 %v471_v2  ;;  %v505_v9 = vld [vmem:[%s578_s30 + $0x8] sm:$0xff]   ;;  %v476_v11 = vunpack.c.l.bf16 %v502_v4  ;;  %v477_v13 = vunpack.c.h.bf16 %v502_v4  ;;  %v506_v16 = vld [vmem:[%s578_s30 + $0x10] sm:$0xff]  }
  0x10   : > { %v488_v6 = vunpack.c.l.bf16 %v487_v3  ;;  %v489_v8 = vunpack.c.h.bf16 %v487_v3  ;;  %v492_v12 = vunpack.c.l.bf16 %v505_v9  ;;  %v493_v14 = vunpack.c.h.bf16 %v505_v9  ;;  %v467_v29 = vld [vmem:[%s642_s5] ss:$0 sm:$0xff]  ;;  %v504_v34 = vld [vmem:[%s573_s27 + $0x18] sm:$0xff]  }
  0x11   : > { %v316_v17 = vmul.f32 %v472_v5, %v583_v0  ;;  %v317_v19 = vmul.f32 %v473_v7, %v583_v0  ;;  %v318_v21 = vmul.f32 %v476_v11, %v583_v0  ;;  %v319_v23 = vmul.f32 %v477_v13, %v583_v0  ;;  %v507_v39 = vld [vmem:[%s578_s30 + $0x18] sm:$0xff]  }
  0x12   : > { %v346_v18 = vmul.f32 %v488_v6, %v588_v1  ;;  %v347_v20 = vmul.f32 %v489_v8, %v588_v1  ;;  %v348_v22 = vmul.f32 %v492_v12, %v588_v1  ;;  %v349_v24 = vmul.f32 %v493_v14, %v588_v1 }
  0x13   : > { %v331_v25 = vadd.f32 %v465_v10, %v316_v17  ;;  %v332_v26 = vadd.f32 %v465_v10, %v317_v19  ;;  %v480_v27 = vunpack.c.l.bf16 %v503_v15  ;;  %v496_v28 = vunpack.c.l.bf16 %v506_v16 }
  0x14   : > { %v333_v30 = vadd.f32 %v465_v10, %v318_v21  ;;  %v334_v31 = vadd.f32 %v465_v10, %v319_v23  ;;  %v481_v32 = vunpack.c.h.bf16 %v503_v15  ;;  %v497_v33 = vunpack.c.h.bf16 %v506_v16 }
  0x15   : > { %v354_v35 = vadd.f32 %v346_v18, %v331_v25  ;;  %v355_v36 = vadd.f32 %v347_v20, %v332_v26  ;;  %v320_v37 = vmul.f32 %v480_v27, %v583_v0  ;;  %v350_v38 = vmul.f32 %v496_v28, %v588_v1 }
  0x16   : > { %v356_v40 = vadd.f32 %v348_v22, %v333_v30  ;;  %v357_v41 = vadd.f32 %v349_v24, %v334_v31  ;;  %v321_v42 = vmul.f32 %v481_v32, %v583_v0  ;;  %v351_v43 = vmul.f32 %v497_v33, %v588_v1 }
  0x17   : > { %v369_v44 = vadd.f32 %v467_v29, %v354_v35  ;;  %v370_v45 = vadd.f32 %v467_v29, %v355_v36  ;;  %v335_v46 = vadd.f32 %v465_v10, %v320_v37  ;;  %v484_v47 = vunpack.c.l.bf16 %v504_v34 }
  0x18   : > { %v371_v48 = vadd.f32 %v467_v29, %v356_v40  ;;  %v372_v49 = vadd.f32 %v467_v29, %v357_v41  ;;  %v336_v50 = vadd.f32 %v465_v10, %v321_v42  ;;  %v500_v51 = vunpack.c.l.bf16 %v507_v39 }
  0x19   : > { %377 = vst [vmem:[%s618_s18] sm:$0xff] %v369_v44  ;;  %378 = vst [vmem:[%s618_s18 + $0x8] sm:$0xff] %v370_v45  ;;  %v358_v52 = vadd.f32 %v350_v38, %v335_v46  ;;  %v322_v53 = vmul.f32 %v484_v47, %v583_v0  ;;  %v485_v54 = vunpack.c.h.bf16 %v504_v34  ;;  %v501_v55 = vunpack.c.h.bf16 %v507_v39 }
  0x1a   : > { %379 = vst [vmem:[%s618_s18 + $0x10] sm:$0xff] %v371_v48  ;;  %380 = vst [vmem:[%s618_s18 + $0x18] sm:$0xff] %v372_v49  ;;  %v359_v56 = vadd.f32 %v351_v43, %v336_v50  ;;  %v352_v57 = vmul.f32 %v500_v51, %v588_v1 }
  0x1b   : > { %v373_v58 = vadd.f32 %v467_v29, %v358_v52  ;;  %v337_v59 = vadd.f32 %v465_v10, %v322_v53  ;;  %v323_v60 = vmul.f32 %v485_v54, %v583_v0  ;;  %v353_v61 = vmul.f32 %v501_v55, %v588_v1 }
  0x1c   : > { %v374_v62 = vadd.f32 %v467_v29, %v359_v56 }
  0x1d   : > { %381 = vst [vmem:[%s618_s18 + $0x20] sm:$0xff] %v373_v58  ;;  %v360_v63 = vadd.f32 %v352_v57, %v337_v59  ;;  %v338_v2 = vadd.f32 %v465_v10, %v323_v60 }
  0x1e   : > { %382 = vst [vmem:[%s618_s18 + $0x28] sm:$0xff] %v374_v62 }
  0x1f   : > { %v375_v3 = vadd.f32 %v467_v29, %v360_v63  ;;  %v361_v4 = vadd.f32 %v353_v61, %v338_v2 }
  0x21   : > { %383 = vst [vmem:[%s618_s18 + $0x30] sm:$0xff] %v375_v3  ;;  %v376_v5 = vadd.f32 %v467_v29, %v361_v4 }
  0x23   : > { %384 = vst [vmem:[%s618_s18 + $0x38] sm:$0xff] %v376_v5 }
  0x24 PF: > { %s16_s21 = sadd.s32 1, %s522_s21  }
  0x25   : > { %p13_p4 = scmp.ge.s32.totalorder %s16_s21, 4  }
  0x27   :  { %15 = sbr.rel (!%p13_p4) target bundleno = 1 (0x1), region = 77 }

// kernel: basic_block_forward.4
= control target key start
LH: loop header
LB: loop body
LE: loop exit
PB: predicated region body
PF: predicated region fallthrough
CT: control target
= control target key end

     0   :  { %s674_s12 = smov 0   ;;  %s736_s0 = inlined_call_operand.vmem [shape: bf16[128,128], index: 0, kind: input, shape index: {}]   ;;  %s737_s1 = inlined_call_operand.vmem [shape: bf16[128,128], index: 1, kind: input, shape index: {}]   ;;  %s738_s2 = inlined_call_operand.vmem [shape: bf16[128,128], index: 2, kind: output, shape index: {0}]   ;;  %s739_s3 = inlined_call_operand.vmem [shape: f32[2,2,128], index: 3, kind: output, shape index: {1}]  }
   0x1 LB: > { %s680_s13 = sadd.s32 4294967295, %s652_s12   ;;  %p515_p0 = scmp.ge.s32.totalorder %s652_s12, 1  ;;  %s652_s12 = sphi %s674_s12, %s14_s12  }
   0x2   : > { %p141_p1 = scmp.lt.s32.totalorder %s652_s12, 3 }
   0x4   : > { %p142_p2 = pnand %p515_p0, %p141_p1 }
   0x5   : > { %s516_s16 = sshll.u32 (!%p142_p2), %s680_s13, 3  ;;  %p181_p4 = scmp.lt.s32.totalorder (!%p142_p2), %s680_s13, 1 }
   0x6   : > { %145 = sbr.rel (%p142_p2) target bundleno = 273 (0x111), region = 28  ;;  %p170_p3 = scmp.lt.s32.totalorder (!%p142_p2), %s516_s16, 15 }
   0xb   : > { %v634_v0 = vld [vmem:[%s737_s1 + $0x38] sm:$0xff]   ;;  %v635_v1 = vld [vmem:[%s737_s1 + $0x30] sm:$0xff]   ;;  %s741_s16 = smov (!%p170_p3, %s516_s16), 15  ;;  %v636_v2 = vld [vmem:[%s737_s1 + $0x28] sm:$0xff]   ;;  %s743_s13 = smov (!%p181_p4, %s680_s13), 1  ;;  %vm421_vm0 = vcmask 1040384  }
   0xc   : > { %586 = vmatprep.subr.bf16.mxu0 %v634_v0  ;;  %610 = vmatprep.subr.bf16.mxu1 %v634_v0  ;;  %s517_s21 = sshll.u32 %s741_s16, 2  ;;  %v637_v3 = vld [vmem:[%s737_s1 + $0x20] sm:$0xff]   ;;  %v638_v6 = vld [vmem:[%s737_s1 + $0x18] sm:$0xff]   ;;  %v639_v7 = vld [vmem:[%s737_s1 + $0x10] sm:$0xff]   ;;  %s520_s11 = sshll.u32 %s743_s13, 1 }
   0xd   : > { %587 = vmatpush3.bf16.msra.mxu0 %v634_v0  ;;  %618 = vmatpush3.bf16.msra.mxu1 %v634_v0  ;;  %s702_s24 = scalar_lea.vmem %s736_s0, %s517_s21  ;;  %v640_v8 = vld [vmem:[%s737_s1 + $0x8] sm:$0xff]   ;;  %v641_v9 = vld [vmem:[%s737_s1] sm:$0xff]   ;;  %s179_s10 = scalar_lea.vmem %s738_s2, %s517_s21 }
   0xe   : > { %588 = vmatprep.subr.bf16.mxu0 %v635_v1  ;;  %611 = vmatprep.subr.bf16.mxu1 %v635_v1  ;;  %v642_v4 = vld [vmem:[%s702_s24] sm:$0xff]   ;;  %v644_v5 = vld [vmem:[%s702_s24 + $0x10] sm:$0xff]   ;;  %v643_v10 = vld [vmem:[%s702_s24 + $0x8] sm:$0xff]   ;;  %s184_s16 = scalar_lea.vmem %s739_s3, %s520_s11 }
   0xf   : > { %602 = vmatprep.mubr.bf16.mxu0 %v642_v4  ;;  %606 = vmatprep.mubr.bf16.mxu1 %v644_v5  ;;  %v645_v11 = vld [vmem:[%s702_s24 + $0x18] sm:$0xff]  }
  0x11   : > { %589 = vmatpush3.bf16.msra.mxu0 %v635_v1  ;;  %619 = vmatpush3.bf16.msra.mxu1 %v635_v1 }
  0x12   : > { %590 = vmatprep.subr.bf16.mxu0 %v636_v2  ;;  %612 = vmatprep.subr.bf16.mxu1 %v636_v2 }
  0x15   : > { %591 = vmatpush3.bf16.msra.mxu0 %v636_v2  ;;  %620 = vmatpush3.bf16.msra.mxu1 %v636_v2 }
  0x16   : > { %592 = vmatprep.subr.bf16.mxu0 %v637_v3  ;;  %613 = vmatprep.subr.bf16.mxu1 %v637_v3 }
  0x19   : > { %593 = vmatpush3.bf16.msra.mxu0 %v637_v3  ;;  %621 = vmatpush3.bf16.msra.mxu1 %v637_v3 }
  0x1a   : > { %594 = vmatprep.subr.bf16.mxu0 %v638_v6  ;;  %614 = vmatprep.subr.bf16.mxu1 %v638_v6 }
  0x1d   : > { %595 = vmatpush3.bf16.msra.mxu0 %v638_v6  ;;  %622 = vmatpush3.bf16.msra.mxu1 %v638_v6 }
  0x1e   : > { %596 = vmatprep.subr.bf16.mxu0 %v639_v7  ;;  %615 = vmatprep.subr.bf16.mxu1 %v639_v7 }
  0x21   : > { %597 = vmatpush3.bf16.msra.mxu0 %v639_v7  ;;  %623 = vmatpush3.bf16.msra.mxu1 %v639_v7 }
  0x22   : > { %598 = vmatprep.subr.bf16.mxu0 %v640_v8  ;;  %616 = vmatprep.subr.bf16.mxu1 %v640_v8 }
  0x25   : > { %599 = vmatpush3.bf16.msra.mxu0 %v640_v8  ;;  %624 = vmatpush3.bf16.msra.mxu1 %v640_v8 }
  0x26   : > { %600 = vmatprep.subr.bf16.mxu0 %v641_v9  ;;  %617 = vmatprep.subr.bf16.mxu1 %v641_v9 }
  0x29   : > { %601 = vmatpush3.bf16.msra.mxu0 %v641_v9  ;;  %625 = vmatpush3.bf16.msra.mxu1 %v641_v9 }
  0x2c   : > { %603 = vmatmul.mubr.bf16.vlgmr.msra.gmra.mxu0 %v643_v10  ;;  %607 = vmatmul.mubr.bf16.vlgmr.msra.gmra.mxu1 %v645_v11 }
  0xec   : > { %v604_v12 = vpop.f32.mrf.mxu0  ;;  %v608_v13 = vpop.f32.mrf.mxu1 }
  0xed   : > { %v402_v27 = vmul.f32 %v604_v12, %v604_v12  ;;  %v406_v39 = vmul.f32 %v608_v13, %v608_v13 }
  0xee   : > { %v316_v14 = vpop.f32.mrf.mxu0  ;;  %v332_v15 = vpop.f32.mrf.mxu1 }
  0xef   : > { %v400_v20 = vmul.f32 %v316_v14, %v316_v14  ;;  %v404_v33 = vmul.f32 %v332_v15, %v332_v15 }
  0xf0   : > { %v605_v16 = vpop.f32.mrf.mxu0  ;;  %v609_v17 = vpop.f32.mrf.mxu1 }
  0xf1   : > { %v559_v18 = vpack.c.bf16 %v605_v16, %v604_v12  ;;  %v569_v19 = vpack.c.bf16 %v609_v17, %v608_v13  ;;  %v403_v30 = vmul.f32 %v605_v16, %v605_v16  ;;  %v407_v42 = vmul.f32 %v609_v17, %v609_v17 }
  0xf2   : > { %v319_v21 = vpop.f32.mrf.mxu0  ;;  %v335_v22 = vpop.f32.mrf.mxu1 }
  0xf3   : > { %571 = vst [vmem:[%s179_s10 + $0x8] sm:$0xff] %v559_v18   ;;  %v554_v23 = vpack.c.bf16 %v319_v21, %v316_v14  ;;  %v387_v24 = vadd.f32 %v319_v21, %v316_v14  ;;  %v401_v25 = vmul.f32 %v319_v21, %v319_v21  ;;  %573 = vst [vmem:[%s179_s10 + $0x18] sm:$0xff] %v569_v19  }
  0xf4   : > { %v564_v26 = vpack.c.bf16 %v335_v22, %v332_v15  ;;  %v405_v37 = vmul.f32 %v335_v22, %v335_v22 }
  0xf5   : > { %555 = vst [vmem:[%s179_s10] sm:$0xff] %v554_v23   ;;  %v388_v28 = vadd.f32 %v604_v12, %v387_v24  ;;  %v408_v29 = vadd.f32 %v401_v25, %v400_v20 }
  0xf6   : > { %572 = vst [vmem:[%s179_s10 + $0x10] sm:$0xff] %v564_v26  }
  0xf7   : > { %v409_v31 = vadd.f32 %v408_v29, %v402_v27  ;;  %v389_v32 = vadd.f32 %v605_v16, %v388_v28 }
  0xf9   : > { %v390_v34 = vadd.f32 %v389_v32, %v332_v15  ;;  %v410_v35 = vadd.f32 %v409_v31, %v403_v30 }
  0xfb   : > { %v391_v36 = vadd.f32 %v390_v34, %v335_v22  ;;  %v411_v38 = vadd.f32 %v410_v35, %v404_v33 }
  0xfd   : > { %v392_v40 = vadd.f32 %v608_v13, %v391_v36  ;;  %v412_v41 = vadd.f32 %v411_v38, %v405_v37 }
  0xff   : > { %v393_v43 = vadd.f32 %v609_v17, %v392_v40  ;;  %v413_v44 = vadd.f32 %v412_v41, %v406_v39 }
 0x101   : > { %v394_v45 = vrot.slane %v393_v43, 4  ;;  %v414_v46 = vadd.f32 %v413_v44, %v407_v42 }
 0x103   : > { %v395_v47 = vadd.f32 %v394_v45, %v393_v43  ;;  %v415_v48 = vrot.slane %v414_v46, 4 }
 0x105   : > { %v396_v49 = vrot.slane %v395_v47, 2  ;;  %v416_v50 = vadd.f32 %v415_v48, %v414_v46 }
 0x107   : > { %v397_v51 = vadd.f32 %v396_v49, %v395_v47  ;;  %v417_v52 = vrot.slane %v416_v50, 2 }
 0x109   : > { %v398_v53 = vrot.slane %v397_v51, 1  ;;  %v418_v54 = vadd.f32 %v417_v52, %v416_v50 }
 0x10b   : > { %v419_v55 = vrot.slane %v418_v54, 1  ;;  %v399_v56 = vadd.f32 %v398_v53, %v397_v51 }
 0x10d   : > { %v420_v57 = vadd.f32 %v419_v55, %v418_v54 }
 0x10f   : > { %v422_v58 = vsel %vm421_vm0, %v399_v56, %v420_v57 }
 0x110   : > { %423 = vst [vmem:[%s184_s16] sm:$0x3] %v422_v58 }
 0x111 PF: > { %s14_s12 = sadd.s32 1, %s652_s12  }
 0x112   : > { %p11_p5 = scmp.ge.s32.totalorder %s14_s12, 4  }
 0x114   :  { %13 = sbr.rel (!%p11_p5) target bundleno = 1 (0x1), region = 70 }

// kernel: basic_block_forward.5
= control target key start
LH: loop header
LB: loop body
LE: loop exit
PB: predicated region body
PF: predicated region fallthrough
CT: control target
= control target key end

     0   :  { %s5100_s21 = smov 0   ;;  %s6891_s0 = inlined_call_operand.vmem [shape: bf16[2,10,10,128], index: 0, kind: input, shape index: {}]   ;;  %s6892_s1 = inlined_call_operand.vmem [shape: bf16[9,128,128], index: 1, kind: input, shape index: {}]   ;;  %s6893_s2 = inlined_call_operand.vmem [shape: f32[1,128], index: 2, kind: input, shape index: {}]   ;;  %s6894_s3 = inlined_call_operand.vmem [shape: f32[1,128], index: 3, kind: input, shape index: {}]   ;;  %s6895_s4 = inlined_call_operand.vmem [shape: f32[10,10,1], index: 4, kind: input, shape index: {}]   ;;  %s6896_s5 = inlined_call_operand.vmem [shape: bf16[128,128], index: 5, kind: output, shape index: {0}]   ;;  %s6897_s6 = inlined_call_operand.vmem [shape: f32[2,2,128], index: 6, kind: output, shape index: {1}]  }
   0x1 LB: > { %s5106_s22 = sadd.s32 4294967295, %s5062_s21   ;;  %p3970_p0 = scmp.ge.s32.totalorder %s5062_s21, 1  ;;  %s5062_s21 = sphi %s5100_s21, %s17_s21  }
   0x2   : > { %p215_p1 = scmp.lt.s32.totalorder %s5062_s21, 3 }
   0x4   : > { %p216_p2 = pnand %p3970_p0, %p215_p1 }
   0x6   : > { %219 = sbr.rel (%p216_p2) target bundleno = 564 (0x234), region = 40 }
   0xb   : > { %v5113_v0 = vld [vmem:[%s6895_s4 + $0x21] sm:$0xff]  ;;  %v5064_v2 = vmov 0   ;;  %v5122_v3 = vld [vmem:[%s6895_s4 + $0x31] sm:$0xff]  ;;  %p249_p3 = scmp.lt.s32.totalorder %s5106_s22, 1  ;;  %v5206_v20 = vld [vmem:[%s6893_s2] ss:$0 sm:$0xff] }
   0xc   : > { %v600_v1 = vld [vmem:[%s6895_s4 + $0x1] sm:$0xff]  ;;  %4961 = vset.pattern.permute.xlu1 %v5064_v2  ;;  %4960 = vset.pattern.permute.xlu0 %v5064_v2  ;;  %v5127_v4 = vld [vmem:[%s6895_s4 + $0x11] sm:$0xff]  ;;  %v5216_v24 = vld [vmem:[%s6894_s3] ss:$0 sm:$0xff]  ;;  %vm776_vm0 = vsmask.f32 3328 }
   0xd   : > { %666 = vperm.xlu1 %4961, %v5113_v0   ;;  %658 = vperm.xlu0 %4960, %v600_v1   ;;  %v5135_v5 = vld [vmem:[%s6895_s4 + $0x10] sm:$0xff]  ;;  %v291_v6 = vld [vmem:[%s6895_s4] sm:$0xff]  ;;  %s5141_s11 = scalar_select %p249_p3, %s5106_s22, 1  ;;  %v4962_v9 = vld [vmem:[%s6892_s1 + $0x38] sm:$0xff]   ;;  %vm777_vm1 = vsmask.f32 7440 }
   0xe   : > { %v5146_v7 = vld [vmem:[%s6895_s4 + $0x30] sm:$0xff]  ;;  %v5151_v8 = vld [vmem:[%s6895_s4 + $0x20] sm:$0xff]  ;;  %4718 = vmatprep.subr.bf16.mxu0 %v4962_v9  ;;  %v4964_v11 = vld [vmem:[%s6892_s1 + $0x78] sm:$0xff]   ;;  %vm1261_vm3 = vcmask 1042432   ;;  %vm1262_vm4 = vcmask 1046532   ;;  %vm3876_vm6 = vcmask 1040384  }
   0xf   : > { %v4963_v10 = vld [vmem:[%s6892_s1 + $0x30] sm:$0xff]   ;;  %s4950_s24 = smul.u32 80, %s5141_s11  ;;  %4719 = vmatpush3.bf16.msra.mxu0 %v4962_v9  ;;  %4742 = vmatprep.subr.bf16.mxu1 %v4964_v11  ;;  %v4965_v13 = vld [vmem:[%s6892_s1 + $0x28] sm:$0xff]   ;;  %v4967_v19 = vld [vmem:[%s6892_s1 + $0x20] sm:$0xff]   ;;  %s3974_s19 = sshll.u32 %s5141_s11, 1 }
  0x10   : > { %v5167_v12 = vld [vmem:[%s6895_s4 + $0x51] sm:$0xff]  ;;  %4720 = vmatprep.subr.bf16.mxu0 %v4963_v10  ;;  %v5180_v15 = vld [vmem:[%s6895_s4 + $0x41] sm:$0xff]  ;;  %4743 = vmatpush3.bf16.msra.mxu1 %v4964_v11  ;;  %vm6005_vm2 = vmor %vm776_vm0, %vm777_vm1 }
  0x11   : > { %670 = vperm.xlu1 %4961, %v5122_v3   ;;  %662 = vperm.xlu0 %4960, %v5127_v4   ;;  %v4966_v14 = vld [vmem:[%s6892_s1 + $0x70] sm:$0xff]   ;;  %s5185_s12 = scalar_lea.vmem %s6891_s0, %s4950_s24  ;;  %v4968_v16 = vld [vmem:[%s6892_s1 + $0x68] sm:$0xff]   ;;  %v4970_v29 = vld [vmem:[%s6892_s1 + $0x60] sm:$0xff]   ;;  %s263_s24 = scalar_lea.vmem %s6897_s6, %s3974_s19 }
  0x12   : > { %4744 = vmatprep.subr.bf16.mxu1 %v4966_v14  ;;  %v5193_v17 = vld [vmem:[%s6895_s4 + $0x71] sm:$0xff]  ;;  %v5198_v18 = vld [vmem:[%s6895_s4 + $0x61] sm:$0xff]  ;;  %v575_v37 = vld [vmem:[%s5185_s12 + $0x1c] sm:$0x1] }
  0x13   : > { %4721 = vmatpush3.bf16.msra.mxu0 %v4963_v10  ;;  %v572_v21 = vld [vmem:[%s5185_s12] ss:$16 sps:$4 sm:$0xff]   ;;  %v573_v22 = vld [vmem:[%s5185_s12 + $0x14] sm:$0x1]  ;;  %v569_v23 = vld [vmem:[%s5185_s12 + $0x4] sm:$0x1]  ;;  %v591_v39 = vunpack.c.l.bf16 %v575_v37 }
  0x14   : > { %4722 = vmatprep.subr.bf16.mxu0 %v4965_v13  ;;  %4745 = vmatpush3.bf16.msra.mxu1 %v4966_v14  ;;  %v588_v25 = vunpack.c.h.bf16 %v572_v21  ;;  %v589_v26 = vunpack.c.l.bf16 %v573_v22  ;;  %v584_v27 = vunpack.c.l.bf16 %v572_v21  ;;  %v585_v28 = vunpack.c.l.bf16 %v569_v23  ;;  %v5224_v30 = vld [vmem:[%s6895_s4 + $0x50] sm:$0xff]  ;;  %v4969_v31 = vld [vmem:[%s6892_s1 + $0x18] sm:$0xff]   ;;  %v571_v40 = vld [vmem:[%s5185_s12 + $0xc] sm:$0x1] }
  0x15   : > { %342 = vperm.xlu1 %4961, %v5135_v5   ;;  %337 = vperm.xlu0 %4960, %v291_v6   ;;  %v574_v36 = vld [vmem:[%s5185_s12 + $0x8] ss:$16 sps:$4 sm:$0xff]   ;;  %v5241_v42 = vld [vmem:[%s6895_s4 + $0x40] sm:$0xff]  ;;  %v615_v48 = vmul.f32 %v5206_v20, %v591_v39  ;;  %v587_v49 = vunpack.c.l.bf16 %v571_v40  ;;  %v5265_v53 = vld [vmem:[%s6895_s4 + $0x70] sm:$0xff] }
  0x16   : > { %4746 = vmatprep.subr.bf16.mxu1 %v4968_v16  ;;  %v612_v32 = vmul.f32 %v5206_v20, %v588_v25  ;;  %v613_v33 = vmul.f32 %v5206_v20, %v589_v26  ;;  %v608_v34 = vmul.f32 %v5206_v20, %v584_v27  ;;  %v609_v35 = vmul.f32 %v5206_v20, %v585_v28  ;;  %v4972_v51 = vld [vmem:[%s6892_s1 + $0x58] sm:$0xff]   ;;  %v276_v52 = vld [vmem:[%s5185_s12] ss:$8 sps:$4 sm:$0xff]   ;;  %v4971_v54 = vld [vmem:[%s6892_s1 + $0x10] sm:$0xff]  }
  0x17   : > { %4723 = vmatpush3.bf16.msra.mxu0 %v4965_v13  ;;  %v590_v38 = vunpack.c.h.bf16 %v574_v36  ;;  %v586_v41 = vunpack.c.l.bf16 %v574_v36  ;;  %v5275_v55 = vld [vmem:[%s6895_s4 + $0x60] sm:$0xff]  ;;  %v5281_v57 = vadd.f32 %v5216_v24, %v615_v48  ;;  %v611_v58 = vmul.f32 %v5206_v20, %v587_v49  ;;  %v278_v1 = vld [vmem:[%s5185_s12 + $0x10] ss:$8 sps:$4 sm:$0xff]   ;;  %v4976_v37 = vld [vmem:[%s6892_s1 + $0x48] sm:$0xff]  }
  0x18   : > { %4724 = vmatprep.subr.bf16.mxu0 %v4967_v19  ;;  %4747 = vmatpush3.bf16.msra.mxu1 %v4968_v16  ;;  %v5244_v43 = vadd.f32 %v5216_v24, %v612_v32  ;;  %v5247_v44 = vadd.f32 %v5216_v24, %v613_v33  ;;  %v5250_v45 = vadd.f32 %v5216_v24, %v608_v34  ;;  %v284_v59 = vunpack.c.h.bf16 %v276_v52  ;;  %v4974_v11 = vld [vmem:[%s6892_s1 + $0x50] sm:$0xff]   ;;  %v1085_v14 = vld [vmem:[%s6895_s4 + $0x2] sm:$0xff]  ;;  %vm6123_vm5 = vmor %vm1261_vm3, %vm1262_vm4 }
  0x19   : > { %352 = vperm.xlu1 %4961, %v5146_v7   ;;  %347 = vperm.xlu0 %4960, %v5151_v8   ;;  %v5253_v46 = vadd.f32 %v5216_v24, %v609_v35  ;;  %v614_v47 = vmul.f32 %v5206_v20, %v590_v38  ;;  %v610_v50 = vmul.f32 %v5206_v20, %v586_v41  ;;  %v283_v63 = vunpack.c.l.bf16 %v276_v52  ;;  %v5302_v13 = vld [vmem:[%s6895_s4 + $0x12] sm:$0xff]  ;;  %v578_v28 = vld [vmem:[%s5185_s12 + $0x20] ss:$8 sps:$4 sm:$0xff]   ;;  %v577_v35 = vld [vmem:[%s5185_s12 + $0x24] sm:$0x1] }
  0x1a   : > { %4748 = vmatprep.subr.bf16.mxu1 %v4970_v29  ;;  %v5293_v9 = vadd.f32 %v5216_v24, %v611_v58  ;;  %v306_v10 = vmul.f32 %v5206_v20, %v284_v59  ;;  %v286_v22 = vunpack.c.h.bf16 %v278_v1  ;;  %v285_v23 = vunpack.c.l.bf16 %v278_v1  ;;  %v582_v41 = vld [vmem:[%s5185_s12 + $0x30] ss:$8 sps:$4 sm:$0xff]   ;;  %v4975_v49 = vld [vmem:[%s6892_s1] sm:$0xff]   ;;  %v1063_v60 = vld [vmem:[%s5185_s12 + $0x28] sm:$0xe] }
  0x1b   : > { %4725 = vmatpush3.bf16.msra.mxu0 %v4967_v19  ;;  %v5278_v56 = vadd.f32 %v5216_v24, %v614_v47  ;;  %v5287_v62 = vadd.f32 %v5216_v24, %v610_v50  ;;  %v4973_v19 = vld [vmem:[%s6892_s1 + $0x8] sm:$0xff]   ;;  %v305_v21 = vmul.f32 %v5206_v20, %v283_v63  ;;  %v594_v34 = vunpack.c.h.bf16 %v578_v28  ;;  %v583_v47 = vld [vmem:[%s5185_s12 + $0x3c] sm:$0x1]  ;;  %v4088_v6 = vld [vmem:[%s5185_s12 + $0x18] ss:$8 sps:$4 sm:$0xff]  }
  0x1c   : > { %4726 = vmatprep.subr.bf16.mxu0 %v4969_v31  ;;  %4749 = vmatpush3.bf16.msra.mxu1 %v4970_v29  ;;  %v5317_v27 = vadd.f32 %v5216_v24, %v306_v10  ;;  %v579_v29 = vld [vmem:[%s5185_s12 + $0x2c] sm:$0x1]  ;;  %v308_v32 = vmul.f32 %v5206_v20, %v286_v22  ;;  %v307_v33 = vmul.f32 %v5206_v20, %v285_v23  ;;  %v592_v39 = vunpack.c.l.bf16 %v578_v28  ;;  %v5352_v10 = vld [vmem:[%s6895_s4 + $0x32] sm:$0xff]  ;;  %v1054_v22 = vld [vmem:[%s5185_s12 + $0x4] sm:$0x1] }
  0x1d   : > { %678 = vperm.xlu1 %4961, %v5167_v12   ;;  %674 = vperm.xlu0 %4960, %v5180_v15   ;;  %v595_v38 = vunpack.c.l.bf16 %v579_v29  ;;  %v593_v40 = vunpack.c.l.bf16 %v577_v35  ;;  %v618_v52 = vmul.f32 %v5206_v20, %v594_v34  ;;  %v598_v1 = vunpack.c.h.bf16 %v582_v41  ;;  %v4086_v26 = vld [vmem:[%s5185_s12 + $0x8] ss:$8 sps:$4 sm:$0xff]  }
  0x1e   : > { %4750 = vmatprep.subr.bf16.mxu1 %v4972_v51  ;;  %v5338_v50 = vadd.f32 %v5216_v24, %v308_v32  ;;  %v616_v59 = vmul.f32 %v5206_v20, %v592_v39  ;;  %v599_v28 = vunpack.c.l.bf16 %v583_v47  ;;  %v596_v34 = vunpack.c.l.bf16 %v582_v41  ;;  %v280_v47 = vld [vmem:[%s5185_s12 + $0x20] ss:$8 sps:$4 sm:$0xff]  }
  0x1f   : > { %4727 = vmatpush3.bf16.msra.mxu0 %v4969_v31  ;;  %v5322_v31 = vadd.f32 %v5216_v24, %v305_v21  ;;  %v619_v58 = vmul.f32 %v5206_v20, %v595_v38  ;;  %v617_v63 = vmul.f32 %v5206_v20, %v593_v40  ;;  %v5357_v21 = vld [vmem:[%s6895_s4 + $0x22] sm:$0xff]  ;;  %v5362_v23 = vadd.f32 %v5216_v24, %v618_v52 }
  0x20   : > { %4728 = vmatprep.subr.bf16.mxu0 %v4971_v54  ;;  %4751 = vmatpush3.bf16.msra.mxu1 %v4972_v51  ;;  %v5341_v51 = vadd.f32 %v5216_v24, %v307_v33  ;;  %v5368_v32 = vadd.f32 %v5216_v24, %v616_v59  ;;  %v622_v38 = vmul.f32 %v5206_v20, %v598_v1  ;;  %v282_v59 = vld [vmem:[%s5185_s12 + $0x30] ss:$8 sps:$4 sm:$0xff]   ;;  %v1055_v41 = vld [vmem:[%s5185_s12 + $0x8] sm:$0xe]  ;;  %v1467_v16 = vunpack.c.l.bf16 %v4086_v26 }
  0x21   : > { %686 = vperm.xlu1 %4961, %v5193_v17   ;;  %682 = vperm.xlu0 %4960, %v5198_v18   ;;  %v5365_v29 = vadd.f32 %v5216_v24, %v619_v58  ;;  %v5371_v33 = vadd.f32 %v5216_v24, %v617_v63  ;;  %v623_v39 = vmul.f32 %v5206_v20, %v599_v28  ;;  %v287_v63 = vunpack.c.l.bf16 %v280_v47 }
  0x22   : > { %4752 = vmatprep.subr.bf16.mxu1 %v4974_v11  ;;  %v620_v58 = vmul.f32 %v5206_v20, %v596_v34  ;;  %v5391_v1 = vadd.f32 %v5216_v24, %v622_v38  ;;  %v288_v38 = vunpack.c.h.bf16 %v280_v47  ;;  %v290_v52 = vunpack.c.h.bf16 %v282_v59 }
  0x23   : > { %4729 = vmatpush3.bf16.msra.mxu0 %v4971_v54  ;;  %v581_v54 = vld [vmem:[%s5185_s12 + $0x34] sm:$0x1]  ;;  %v289_v47 = vunpack.c.l.bf16 %v282_v59 }
  0x24   : > { %4730 = vmatprep.subr.bf16.mxu0 %v4973_v19  ;;  %4753 = vmatpush3.bf16.msra.mxu1 %v4974_v11  ;;  %v4978_v11 = vld [vmem:[%s6892_s1 + $0x40] sm:$0xff]   ;;  %v597_v40 = vunpack.c.l.bf16 %v581_v54  ;;  %v5394_v54 = vadd.f32 %v5216_v24, %v623_v39  ;;  %v5399_v34 = vadd.f32 %v5216_v24, %v620_v58  ;;  %v1056_v58 = vld [vmem:[%s5185_s12 + $0xc] sm:$0x1] }
  0x25   : > { %362 = vperm.xlu1 %4961, %v5224_v30   ;;  %357 = vperm.xlu0 %4960, %v5241_v42   ;;  %v1053_v39 = vld [vmem:[%s5185_s12] sm:$0xe]  ;;  %v1072_v48 = vunpack.c.l.bf16 %v1056_v58  ;;  %v311_v59 = vmul.f32 %v5206_v20, %v289_v47  ;;  %v1059_v58 = vld [vmem:[%s5185_s12 + $0x18] sm:$0xe] }
  0x26   : > { %4754 = vmatprep.subr.bf16.mxu1 %v4976_v37  ;;  %v621_v28 = vmul.f32 %v5206_v20, %v597_v40  ;;  %v312_v40 = vmul.f32 %v5206_v20, %v290_v52  ;;  %v1075_v25 = vunpack.c.l.bf16 %v1059_v58  ;;  %v5483_v58 = vld [vmem:[%s6895_s4 + $0x62] sm:$0xff] }
  0x27   : > { %4731 = vmatpush3.bf16.msra.mxu0 %v4973_v19  ;;  %v4977_v19 = vld [vmem:[%s6892_s1 + $0xb8] sm:$0xff]  }
  0x28   : > { %4732 = vmatprep.subr.bf16.mxu0 %v4975_v49  ;;  %4755 = vmatpush3.bf16.msra.mxu1 %v4976_v37  ;;  %v4980_v37 = vld [vmem:[%s6892_s1 + $0xf8] sm:$0xff]   ;;  %v5433_v52 = vadd.f32 %v5216_v24, %v312_v40  ;;  %v1058_v40 = vld [vmem:[%s5185_s12 + $0x14] sm:$0x1] }
  0x29   : > { %372 = vperm.xlu1 %4961, %v5265_v53   ;;  %367 = vperm.xlu0 %4960, %v5275_v55  }
  0x2a   : > { %4756 = vmatprep.subr.bf16.mxu1 %v4978_v11 }
  0x2b   : > { %4733 = vmatpush3.bf16.msra.mxu0 %v4975_v49  ;;  %v5407_v49 = vadd.f32 %v5216_v24, %v621_v28  ;;  %v1060_v28 = vld [vmem:[%s5185_s12 + $0x1c] sm:$0x1] }
  0x2c   : > { %4766 = vmatprep.subr.bf16.mxu0 %v4977_v19  ;;  %v309_v19 = vmul.f32 %v5206_v20, %v287_v63  ;;  %4757 = vmatpush3.bf16.msra.mxu1 %v4978_v11  ;;  %v5430_v11 = vld [vmem:[%s6895_s4 + $0x52] sm:$0xff]  ;;  %v1076_v35 = vunpack.c.l.bf16 %v1060_v28 }
  0x2d   : > { %1147 = vperm.xlu1 %4961, %v5302_v13   ;;  %1143 = vperm.xlu0 %4960, %v1085_v14   ;;  %v310_v14 = vmul.f32 %v5206_v20, %v288_v38  ;;  %v1069_v38 = vunpack.c.l.bf16 %v1053_v39  ;;  %v5443_v39 = vadd.f32 %v5216_v24, %v311_v59  ;;  %v1468_v59 = vunpack.c.h.bf16 %v4086_v26  ;;  %v1064_v26 = vld [vmem:[%s5185_s12 + $0x2c] sm:$0x1] }
  0x2e   : > { %4790 = vmatprep.subr.bf16.mxu1 %v4980_v37  ;;  %v5424_v63 = vadd.f32 %v5216_v24, %v309_v19  ;;  %v1070_v37 = vunpack.c.l.bf16 %v1054_v22  ;;  %v1057_v19 = vld [vmem:[%s5185_s12 + $0x10] sm:$0xe]  ;;  %v1100_v2 = vmul.f32 %v5206_v20, %v1076_v35 }
  0x2f   : > { %v1093_v47 = vmul.f32 %v5206_v20, %v1069_v38  ;;  %v1074_v38 = vunpack.c.l.bf16 %v1058_v40  ;;  %v1470_v40 = vunpack.c.h.bf16 %v4088_v6  ;;  %v1485_v61 = vmul.f32 %v5206_v20, %v1468_v59 }
  0x30   : > { %v5501_v35 = vadd.f32 %v5216_v24, %v1100_v2  ;;  %v1079_v59 = vunpack.c.l.bf16 %v1063_v60 }
  0x31   : > { %1155 = vperm.xlu1 %4961, %v5352_v10   ;;  %1151 = vperm.xlu0 %4960, %v5357_v21   ;;  %v5464_v36 = vadd.f32 %v5216_v24, %v1093_v47  ;;  %v1487_v2 = vmul.f32 %v5206_v20, %v1470_v40  ;;  %v1068_v40 = vld [vmem:[%s5185_s12 + $0x3c] sm:$0x1] }
  0x32   : > { %v1103_v60 = vmul.f32 %v5206_v20, %v1079_v59 }
  0x33   : > { %6958 = vst [vmem:[#allocation5_spill] sm:$0xff] %v5464_v36 }
  0x35   : > { %1515 = vperm.xlu1 %4961, %v5151_v8   ;;  %1510 = vperm.xlu0 %4960, %v5135_v5   ;;  %v1071_v8 = vunpack.c.l.bf16 %v1055_v41  ;;  %v5421_v5 = vadd.f32 %v5216_v24, %v310_v14  ;;  %v1096_v14 = vmul.f32 %v5206_v20, %v1072_v48  ;;  %v1073_v48 = vunpack.c.l.bf16 %v1057_v19 }
  0x36   : > { %v1098_v19 = vmul.f32 %v5206_v20, %v1074_v38 }
  0x37   : > { %v1095_v41 = vmul.f32 %v5206_v20, %v1071_v8  ;;  %v5450_v8 = vld [vmem:[%s6895_s4 + $0x42] sm:$0xff]  ;;  %v1097_v28 = vmul.f32 %v5206_v20, %v1073_v48 }
  0x38   : > { %v5507_v38 = vadd.f32 %v5216_v24, %v1098_v19 }
  0x39   : > { %1525 = vperm.xlu1 %4961, %v5241_v42   ;;  %1520 = vperm.xlu0 %4960, %v5146_v7   ;;  %v5454_v22 = vadd.f32 %v5216_v24, %v1095_v41  ;;  %v5457_v42 = vadd.f32 %v5216_v24, %v1096_v14  ;;  %v1094_v7 = vmul.f32 %v5206_v20, %v1070_v37  ;;  %v5477_v37 = vld [vmem:[%s6895_s4 + $0x72] sm:$0xff] }
  0x3a   : > { %v1099_v41 = vmul.f32 %v5206_v20, %v1075_v25  ;;  %v1469_v25 = vunpack.c.l.bf16 %v4088_v6  ;;  %v5504_v48 = vadd.f32 %v5216_v24, %v1097_v28  ;;  %v1062_v6 = vld [vmem:[%s5185_s12 + $0x24] sm:$0x1]  ;;  %v1065_v28 = vld [vmem:[%s5185_s12 + $0x30] sm:$0xe] }
  0x3b   : > { %6956 = vst [vmem:[#allocation3_spill] sm:$0xff] %v5454_v22  ;;  %6957 = vst [vmem:[#allocation4_spill] sm:$0xff] %v5457_v42  ;;  %v5470_v14 = vadd.f32 %v5216_v24, %v1094_v7  ;;  %v1484_v7 = vmul.f32 %v5206_v20, %v1467_v16  ;;  %v1061_v16 = vld [vmem:[%s5185_s12 + $0x20] sm:$0xe]  ;;  %v1067_v22 = vld [vmem:[%s5185_s12 + $0x38] sm:$0xe] }
  0x3c   : > { %v5492_v47 = vadd.f32 %v5216_v24, %v1099_v41  ;;  %v1486_v42 = vmul.f32 %v5206_v20, %v1469_v25  ;;  %v1077_v25 = vunpack.c.l.bf16 %v1061_v16  ;;  %v1078_v41 = vunpack.c.l.bf16 %v1062_v6 }
  0x3d   : > { %6959 = vst [vmem:[#allocation6_spill] sm:$0xff] %v5470_v14  ;;  %1163 = vperm.xlu1 %4961, %v5430_v11   ;;  %1159 = vperm.xlu0 %4960, %v5450_v8   ;;  %v5513_v14 = vadd.f32 %v5216_v24, %v1485_v61  ;;  %v5516_v36 = vadd.f32 %v5216_v24, %v1484_v7  ;;  %v1080_v7 = vunpack.c.l.bf16 %v1064_v26  ;;  %v1066_v61 = vld [vmem:[%s5185_s12 + $0x34] sm:$0x1] }
  0x3e   : > { %6960 = vst [vmem:[#allocation7_spill] sm:$0xff] %v5492_v47  ;;  %v5526_v47 = vadd.f32 %v5216_v24, %v1487_v2  ;;  %v5533_v19 = vadd.f32 %v5216_v24, %v1486_v42  ;;  %v1101_v42 = vmul.f32 %v5206_v20, %v1077_v25  ;;  %v1102_v59 = vmul.f32 %v5206_v20, %v1078_v41 }
  0x3f   : > { %6961 = vst [vmem:[#allocation8_spill] sm:$0xff] %v5513_v14  ;;  %6962 = vst [vmem:[#allocation9_spill] sm:$0xff] %v5516_v36  ;;  %v1104_v26 = vmul.f32 %v5206_v20, %v1080_v7  ;;  %v1083_v36 = vunpack.c.l.bf16 %v1067_v22  ;;  %v1084_v14 = vunpack.c.l.bf16 %v1068_v40  ;;  %v1081_v22 = vunpack.c.l.bf16 %v1065_v28  ;;  %v4131_v40 = vld [vmem:[%s5185_s12 + $0x8] ss:$8 sps:$4 sm:$0xff]   ;;  %v4130_v28 = vld [vmem:[%s5185_s12 + $0xc] sm:$0x1] }
  0x40   : > { %6963 = vst [vmem:[#allocation10_spill] sm:$0xff] %v5526_v47  ;;  %6964 = vst [vmem:[#allocation11_spill] sm:$0xff] %v5533_v19  ;;  %v5558_v41 = vadd.f32 %v5216_v24, %v1102_v59  ;;  %v1082_v25 = vunpack.c.l.bf16 %v1066_v61  ;;  %v1760_v2 = vunpack.c.h.bf16 %v4131_v40  ;;  %v4136_v19 = vld [vmem:[%s5185_s12 + $0x24] sm:$0x1] }
  0x41   : > { %1171 = vperm.xlu1 %4961, %v5477_v37   ;;  %1167 = vperm.xlu0 %4960, %v5483_v58   ;;  %v5547_v16 = vadd.f32 %v5216_v24, %v1104_v26  ;;  %v1107_v6 = vmul.f32 %v5206_v20, %v1083_v36  ;;  %v1108_v7 = vmul.f32 %v5206_v20, %v1084_v14  ;;  %v4132_v26 = vld [vmem:[%s5185_s12 + $0x14] sm:$0x1]  ;;  %v5585_v61 = vld [vmem:[%s6895_s4 + $0x80] sm:$0xff]  ;;  %v1765_v59 = vunpack.c.l.bf16 %v4136_v19 }
  0x42   : > { %6966 = vst [vmem:[#allocation13_spill] sm:$0xff] %v5558_v41  ;;  %v1105_v14 = vmul.f32 %v5206_v20, %v1081_v22 }
  0x43   : > { %v5562_v36 = vadd.f32 %v5216_v24, %v1107_v6  ;;  %v5574_v47 = vadd.f32 %v5216_v24, %v1108_v7  ;;  %v1761_v6 = vunpack.c.l.bf16 %v4132_v26 }
  0x44   : > { %v5579_v22 = vadd.f32 %v5216_v24, %v1105_v14 }
  0x45   : > { %1836 = vperm.xlu1 %4961, %v5113_v0   ;;  %1832 = vperm.xlu0 %4960, %v5127_v4   ;;  %v5542_v4 = vadd.f32 %v5216_v24, %v1103_v60  ;;  %v5555_v60 = vadd.f32 %v5216_v24, %v1101_v42  ;;  %6967 = vst [vmem:[#allocation14_spill] sm:$0xff] %v5562_v36  ;;  %v4135_v42 = vld [vmem:[%s5185_s12 + $0x18] ss:$8 sps:$4 sm:$0xff]   ;;  %v1759_v0 = vunpack.c.l.bf16 %v4130_v28  ;;  %v4134_v28 = vld [vmem:[%s5185_s12 + $0x1c] sm:$0x1] }
  0x46   : > { %v1785_v26 = vmul.f32 %v5206_v20, %v1761_v6  ;;  %v1789_v6 = vmul.f32 %v5206_v20, %v1765_v59  ;;  %v1762_v19 = vunpack.c.l.bf16 %v4135_v42  ;;  %v4090_v36 = vld [vmem:[%s5185_s12 + $0x28] ss:$8 sps:$4 sm:$0xff]  }
  0x47   : > { %6965 = vst [vmem:[#allocation12_spill] sm:$0xff] %v5555_v60  ;;  %v1472_v60 = vunpack.c.h.bf16 %v4090_v36 }
  0x48   : > { %v5599_v41 = vadd.f32 %v5216_v24, %v1785_v26  ;;  %v1763_v26 = vunpack.c.l.bf16 %v4134_v28  ;;  %v1786_v59 = vmul.f32 %v5206_v20, %v1762_v19  ;;  %v4198_v28 = vld [vmem:[%s5185_s12 + $0xc] sm:$0x1]  ;;  %v4201_v19 = vld [vmem:[%s5185_s12 + $0x18] sm:$0xe] }
  0x49   : > { %1844 = vperm.xlu1 %4961, %v5180_v15   ;;  %1840 = vperm.xlu0 %4960, %v5122_v3   ;;  %v1106_v3 = vmul.f32 %v5206_v20, %v1082_v25  ;;  %v1784_v25 = vmul.f32 %v5206_v20, %v1760_v2  ;;  %v1758_v15 = vunpack.c.l.bf16 %v4131_v40  ;;  %v1783_v40 = vmul.f32 %v5206_v20, %v1759_v0 }
  0x4a   : > { %6970 = vst [vmem:[#allocation17_spill] sm:$0xff] %v5599_v41  ;;  %v4200_v41 = vld [vmem:[%s5185_s12 + $0x14] sm:$0x1] }
  0x4b   : > { %v5593_v14 = vadd.f32 %v5216_v24, %v1784_v25  ;;  %v1782_v2 = vmul.f32 %v5206_v20, %v1758_v15  ;;  %v5612_v25 = vadd.f32 %v5216_v24, %v1783_v40  ;;  %v1471_v40 = vunpack.c.l.bf16 %v4090_v36 }
  0x4c   : > { %v2243_v36 = vunpack.c.l.bf16 %v4200_v41 }
  0x4d   : > { %1535 = vperm.xlu1 %4961, %v5275_v55   ;;  %1530 = vperm.xlu0 %4960, %v5224_v30   ;;  %v1764_v55 = vunpack.c.h.bf16 %v4135_v42  ;;  %v5590_v30 = vadd.f32 %v5216_v24, %v1106_v3  ;;  %6969 = vst [vmem:[#allocation16_spill] sm:$0xff] %v5593_v14  ;;  %v5609_v0 = vadd.f32 %v5216_v24, %v1782_v2  ;;  %6972 = vst [vmem:[#allocation19_spill] sm:$0xff] %v5612_v25  ;;  %v4092_v42 = vld [vmem:[%s5185_s12 + $0x38] ss:$8 sps:$4 sm:$0xff]   ;;  %v4199_v3 = vld [vmem:[%s5185_s12 + $0x10] sm:$0xe] }
  0x4e   : > { %v5623_v2 = vadd.f32 %v5216_v24, %v1789_v6  ;;  %v5633_v6 = vadd.f32 %v5216_v24, %v1786_v59  ;;  %v2242_v14 = vunpack.c.l.bf16 %v4199_v3  ;;  %v2241_v59 = vunpack.c.l.bf16 %v4198_v28 }
  0x4f   : > { %6968 = vst [vmem:[#allocation15_spill] sm:$0xff] %v5590_v30  ;;  %v1788_v7 = vmul.f32 %v5206_v20, %v1764_v55  ;;  %6971 = vst [vmem:[#allocation18_spill] sm:$0xff] %v5609_v0  ;;  %v1473_v55 = vunpack.c.l.bf16 %v4092_v42  ;;  %v4197_v30 = vld [vmem:[%s5185_s12 + $0x8] sm:$0xe]  ;;  %v2244_v25 = vunpack.c.l.bf16 %v4201_v19 }
  0x50   : > { %6974 = vst [vmem:[#allocation21_spill] sm:$0xff] %v5623_v2  ;;  %6975 = vst [vmem:[#allocation22_spill] sm:$0xff] %v5633_v6  ;;  %v4139_v6 = vld [vmem:[%s5185_s12 + $0x28] ss:$8 sps:$4 sm:$0xff]  }
  0x51   : > { %1545 = vperm.xlu1 %4961, %v5585_v61   ;;  %1540 = vperm.xlu0 %4960, %v5265_v53   ;;  %v5620_v15 = vadd.f32 %v5216_v24, %v1788_v7  ;;  %v1474_v53 = vunpack.c.h.bf16 %v4092_v42  ;;  %v1787_v7 = vmul.f32 %v5206_v20, %v1763_v26  ;;  %v1490_v41 = vmul.f32 %v5206_v20, %v1473_v55 }
  0x52   : > { %v2240_v55 = vunpack.c.l.bf16 %v4197_v30  ;;  %v5674_v30 = vld [vmem:[%s6895_s4 + $0x81] sm:$0xff] }
  0x53   : > { %6973 = vst [vmem:[#allocation20_spill] sm:$0xff] %v5620_v15  ;;  %v1491_v3 = vmul.f32 %v5206_v20, %v1474_v53  ;;  %v2265_v15 = vmul.f32 %v5206_v20, %v2241_v59 }
  0x54   : > { %v2264_v2 = vmul.f32 %v5206_v20, %v2240_v55  ;;  %v1766_v55 = vunpack.c.l.bf16 %v4139_v6 }
  0x55   : > { %2318 = vperm.xlu1 %4961, %v5357_v21   ;;  %2314 = vperm.xlu0 %4960, %v5302_v13   ;;  %v1489_v21 = vmul.f32 %v5206_v20, %v1472_v60  ;;  %v1488_v13 = vmul.f32 %v5206_v20, %v1471_v40  ;;  %v5646_v60 = vadd.f32 %v5216_v24, %v1787_v7  ;;  %v4203_v40 = vld [vmem:[%s5185_s12 + $0x20] sm:$0xe]  ;;  %v4204_v7 = vld [vmem:[%s5185_s12 + $0x24] sm:$0x1] }
  0x56   : > { %v2246_v42 = vunpack.c.l.bf16 %v4203_v40 }
  0x57   : > { %6976 = vst [vmem:[#allocation23_spill] sm:$0xff] %v5646_v60  ;;  %v5653_v26 = vadd.f32 %v5216_v24, %v1489_v21  ;;  %v5656_v53 = vadd.f32 %v5216_v24, %v1488_v13  ;;  %v4202_v21 = vld [vmem:[%s5185_s12 + $0x1c] sm:$0x1]  ;;  %v4140_v13 = vld [vmem:[%s5185_s12 + $0x34] sm:$0x1] }
  0x58   : > { %v2245_v0 = vunpack.c.l.bf16 %v4202_v21  ;;  %v1769_v60 = vunpack.c.l.bf16 %v4140_v13  ;;  %v2270_v40 = vmul.f32 %v5206_v20, %v2246_v42  ;;  %v4144_v13 = vld [vmem:[%s5185_s12 + $0x44] sm:$0x1]  ;;  %v4142_v42 = vld [vmem:[%s5185_s12 + $0x3c] sm:$0x1] }
  0x59   : > { %2326 = vperm.xlu1 %4961, %v5450_v8   ;;  %2322 = vperm.xlu0 %4960, %v5352_v10   ;;  %v2266_v8 = vmul.f32 %v5206_v20, %v2242_v14  ;;  %v2267_v10 = vmul.f32 %v5206_v20, %v2243_v36  ;;  %6977 = vst [vmem:[#allocation24_spill] sm:$0xff] %v5653_v26  ;;  %6978 = vst [vmem:[#allocation25_spill] sm:$0xff] %v5656_v53 }
  0x5a   : > { %v5663_v14 = vadd.f32 %v5216_v24, %v1491_v3  ;;  %v5666_v36 = vadd.f32 %v5216_v24, %v1490_v41  ;;  %v2247_v3 = vunpack.c.l.bf16 %v4204_v7  ;;  %v4143_v41 = vld [vmem:[%s5185_s12 + $0x38] ss:$8 sps:$4 sm:$0xff]   ;;  %v5699_v53 = vadd.f32 %v5216_v24, %v2264_v2 }
  0x5b   : > { %v5681_v28 = vadd.f32 %v5216_v24, %v2267_v10  ;;  %v1772_v10 = vunpack.c.h.bf16 %v4143_v41  ;;  %v2269_v59 = vmul.f32 %v5206_v20, %v2245_v0  ;;  %v5712_v2 = vadd.f32 %v5216_v24, %v2270_v40  ;;  %v5720_v0 = vld [vmem:[%s6895_s4 + $0x82] sm:$0xff] }
  0x5c   : > { %6979 = vst [vmem:[#allocation26_spill] sm:$0xff] %v5663_v14  ;;  %6980 = vst [vmem:[#allocation27_spill] sm:$0xff] %v5666_v36  ;;  %v2271_v21 = vmul.f32 %v5206_v20, %v2247_v3  ;;  %v1793_v3 = vmul.f32 %v5206_v20, %v1769_v60  ;;  %v4208_v36 = vld [vmem:[%s5185_s12 + $0x34] sm:$0x1]  ;;  %v1771_v60 = vunpack.c.l.bf16 %v4142_v42 }
  0x5d   : > { %1852 = vperm.xlu1 %4961, %v5198_v18   ;;  %1848 = vperm.xlu0 %4960, %v5167_v12   ;;  %v5678_v12 = vadd.f32 %v5216_v24, %v2266_v8  ;;  %6982 = vst [vmem:[#allocation29_spill] sm:$0xff] %v5681_v28  ;;  %v1768_v18 = vunpack.c.h.bf16 %v4139_v6  ;;  %v4138_v8 = vld [vmem:[%s5185_s12 + $0x2c] sm:$0x1]  ;;  %v2268_v6 = vmul.f32 %v5206_v20, %v2244_v25  ;;  %6984 = vst [vmem:[#allocation31_spill] sm:$0xff] %v5712_v2  ;;  %v5036_v14 = vld [vmem:[%s6895_s4 + $0x31] sm:$0xff] }
  0x5e   : > { %v1767_v7 = vunpack.c.l.bf16 %v4138_v8  ;;  %v1773_v8 = vunpack.c.l.bf16 %v4144_v13  ;;  %v1770_v28 = vunpack.c.l.bf16 %v4143_v41  ;;  %v5723_v25 = vadd.f32 %v5216_v24, %v2271_v21 }
  0x5f   : > { %6981 = vst [vmem:[#allocation28_spill] sm:$0xff] %v5678_v12  ;;  %v1792_v19 = vmul.f32 %v5206_v20, %v1768_v18  ;;  %v4207_v12 = vld [vmem:[%s5185_s12 + $0x30] sm:$0xe]  ;;  %v1796_v41 = vmul.f32 %v5206_v20, %v1772_v10  ;;  %v5730_v13 = vadd.f32 %v5216_v24, %v2268_v6  ;;  %v5733_v26 = vadd.f32 %v5216_v24, %v2269_v59  ;;  %v5750_v10 = vld [vmem:[%s6893_s2] ss:$0 sm:$0xff] }
  0x60   : > { %6985 = vst [vmem:[#allocation32_spill] sm:$0xff] %v5723_v25  ;;  %v2250_v18 = vunpack.c.l.bf16 %v4207_v12  ;;  %v1794_v59 = vmul.f32 %v5750_v10, %v1770_v28  ;;  %v1795_v42 = vmul.f32 %v5750_v10, %v1771_v60  ;;  %v4206_v28 = vld [vmem:[%s5185_s12 + $0x2c] sm:$0x1] }
  0x61   : > { %1860 = vperm.xlu1 %4961, %v5674_v30   ;;  %1856 = vperm.xlu0 %4960, %v5193_v17   ;;  %v5702_v17 = vadd.f32 %v5216_v24, %v2265_v15  ;;  %v1790_v15 = vmul.f32 %v5206_v20, %v1766_v55  ;;  %v1791_v55 = vmul.f32 %v5206_v20, %v1767_v7  ;;  %v4205_v20 = vld [vmem:[%s5185_s12 + $0x28] sm:$0xe] }
  0x62   : > { %6986 = vst [vmem:[#allocation33_spill] sm:$0xff] %v5730_v13  ;;  %6987 = vst [vmem:[#allocation34_spill] sm:$0xff] %v5733_v26  ;;  %v5736_v21 = vadd.f32 %v5216_v24, %v1792_v19  ;;  %v1797_v7 = vmul.f32 %v5750_v10, %v1773_v8  ;;  %v2274_v6 = vmul.f32 %v5750_v10, %v2250_v18 }
  0x63   : > { %6983 = vst [vmem:[#allocation30_spill] sm:$0xff] %v5702_v17  ;;  %v5745_v12 = vadd.f32 %v5216_v24, %v1790_v15 }
  0x64   : > { %6988 = vst [vmem:[#allocation35_spill] sm:$0xff] %v5736_v21  ;;  %v4320_v21 = vld [vmem:[%s5185_s12 + $0x1c] sm:$0x1] }
  0x65   : > { %2334 = vperm.xlu1 %4961, %v5483_v58   ;;  %2330 = vperm.xlu0 %4960, %v5430_v11   ;;  %v2251_v11 = vunpack.c.l.bf16 %v4208_v36  ;;  %v5739_v36 = vadd.f32 %v5216_v24, %v1793_v3  ;;  %6990 = vst [vmem:[#allocation37_spill] sm:$0xff] %v5745_v12  ;;  %v5762_v24 = vld [vmem:[%s6894_s3] ss:$0 sm:$0xff]  ;;  %v2929_v26 = vunpack.c.l.bf16 %v4320_v21 }
  0x66   : > { %v5765_v15 = vadd.f32 %v5762_v24, %v1791_v55  ;;  %v5768_v8 = vadd.f32 %v5762_v24, %v1796_v41  ;;  %v5037_v55 = vld [vmem:[%s6895_s4 + $0x21] sm:$0xff]  ;;  %v5783_v19 = vadd.f32 %v5762_v24, %v1797_v7  ;;  %v5786_v18 = vadd.f32 %v5762_v24, %v1794_v59  ;;  %v4209_v41 = vld [vmem:[%s5185_s12 + $0x38] sm:$0xe] }
  0x67   : > { %6989 = vst [vmem:[#allocation36_spill] sm:$0xff] %v5739_v36  ;;  %v2275_v3 = vmul.f32 %v5750_v10, %v2251_v11  ;;  %v2248_v11 = vunpack.c.l.bf16 %v4205_v20  ;;  %v5789_v60 = vadd.f32 %v5762_v24, %v1795_v42  ;;  %v4211_v59 = vld [vmem:[%s5185_s12 + $0x40] sm:$0xe]  ;;  %v5038_v20 = vld [vmem:[%s6895_s4 + $0x51] sm:$0xff]  ;;  %v4212_v7 = vld [vmem:[%s5185_s12 + $0x44] sm:$0x1]  ;;  %v2953_v2 = vmul.f32 %v5750_v10, %v2929_v26 }
  0x68   : > { %6991 = vst [vmem:[#allocation38_spill] sm:$0xff] %v5765_v15  ;;  %6992 = vst [vmem:[#allocation39_spill] sm:$0xff] %v5768_v8  ;;  %v5039_v42 = vld [vmem:[%s6895_s4 + $0x41] sm:$0xff]  ;;  %v4210_v36 = vld [vmem:[%s5185_s12 + $0x3c] sm:$0x1] }
  0x69   : > { %2342 = vperm.xlu1 %4961, %v5720_v0   ;;  %2338 = vperm.xlu0 %4960, %v5477_v37   ;;  %6993 = vst [vmem:[#allocation40_spill] sm:$0xff] %v5783_v19  ;;  %6994 = vst [vmem:[#allocation41_spill] sm:$0xff] %v5786_v18  ;;  %v5795_v40 = vadd.f32 %v5762_v24, %v2275_v3  ;;  %v5041_v8 = vld [vmem:[%s6895_s4 + $0x20] sm:$0xff]  ;;  %v4324_v18 = vld [vmem:[%s5185_s12 + $0x2c] sm:$0x1] }
  0x6a   : > { %6995 = vst [vmem:[#allocation42_spill] sm:$0xff] %v5789_v60  ;;  %v4323_v15 = vld [vmem:[%s5185_s12 + $0x20] ss:$8 sps:$4 sm:$0xff]   ;;  %v2253_v60 = vunpack.c.l.bf16 %v4210_v36  ;;  %v2933_v21 = vunpack.c.l.bf16 %v4324_v18  ;;  %v5044_v18 = vld [vmem:[%s6895_s4 + $0x71] sm:$0xff] }
  0x6b   : > { %6997 = vst [vmem:[#allocation44_spill] sm:$0xff] %v5795_v40  ;;  %v2255_v40 = vunpack.c.l.bf16 %v4212_v7  ;;  %v2930_v17 = vunpack.c.l.bf16 %v4323_v15  ;;  %v4276_v7 = vld [vmem:[%s5185_s12 + $0x20] ss:$8 sps:$4 sm:$0xff]  }
  0x6c   : > { %v2957_v26 = vmul.f32 %v5750_v10, %v2933_v21 }
  0x6d   : > { %3004 = vperm.xlu1 %4961, %v5036_v14   ;;  %3000 = vperm.xlu0 %4960, %v5037_v55   ;;  %v5792_v14 = vadd.f32 %v5762_v24, %v2274_v6  ;;  %v2249_v55 = vunpack.c.l.bf16 %v4206_v28  ;;  %v2272_v28 = vmul.f32 %v5750_v10, %v2248_v11  ;;  %v4318_v6 = vld [vmem:[%s5185_s12 + $0x14] sm:$0x1] }
  0x6e   : > { %v5040_v11 = vld [vmem:[%s6895_s4 + $0x30] sm:$0xff]  ;;  %v2927_v25 = vunpack.c.l.bf16 %v4318_v6  ;;  %v2279_v6 = vmul.f32 %v5750_v10, %v2255_v40  ;;  %v5045_v40 = vld [vmem:[%s6895_s4 + $0x61] sm:$0xff] }
  0x6f   : > { %6996 = vst [vmem:[#allocation43_spill] sm:$0xff] %v5792_v14  ;;  %v2273_v12 = vmul.f32 %v5750_v10, %v2249_v55  ;;  %v2254_v55 = vunpack.c.l.bf16 %v4211_v59  ;;  %v2252_v14 = vunpack.c.l.bf16 %v4209_v41  ;;  %v5043_v59 = vld [vmem:[%s6895_s4 + $0x40] sm:$0xff]  ;;  %v2932_v41 = vunpack.c.h.bf16 %v4323_v15 }
  0x71   : > { %3012 = vperm.xlu1 %4961, %v5038_v20   ;;  %3008 = vperm.xlu0 %4960, %v5039_v42   ;;  %v4319_v42 = vld [vmem:[%s5185_s12 + $0x10] ss:$8 sps:$4 sm:$0xff]   ;;  %v5826_v20 = vadd.f32 %v5762_v24, %v2272_v28  ;;  %v5830_v3 = vadd.f32 %v5762_v24, %v2273_v12  ;;  %v2278_v36 = vmul.f32 %v5750_v10, %v2254_v55 }
  0x72   : > { %v2928_v19 = vunpack.c.h.bf16 %v4319_v42  ;;  %v2926_v13 = vunpack.c.l.bf16 %v4319_v42  ;;  %v2276_v28 = vmul.f32 %v5750_v10, %v2252_v14  ;;  %v2277_v42 = vmul.f32 %v5750_v10, %v2253_v60 }
  0x73   : > { %6998 = vst [vmem:[#allocation45_spill] sm:$0xff] %v5826_v20  ;;  %v2951_v55 = vmul.f32 %v5750_v10, %v2927_v25  ;;  %v4274_v20 = vld [vmem:[%s5185_s12 + $0x10] ss:$8 sps:$4 sm:$0xff]   ;;  %v5863_v60 = vadd.f32 %v5762_v24, %v2278_v36  ;;  %v5866_v14 = vadd.f32 %v5762_v24, %v2279_v6 }
  0x74   : > { %v2950_v12 = vmul.f32 %v5750_v10, %v2926_v13  ;;  %v2636_v15 = vunpack.c.h.bf16 %v4274_v20  ;;  %v2635_v13 = vunpack.c.l.bf16 %v4274_v20  ;;  %v4340_v25 = vld [vmem:[%s6895_s4 + $0x91] sm:$0xff]  ;;  %v5878_v20 = vadd.f32 %v5762_v24, %v2953_v2 }
  0x75   : > { %2683 = vperm.xlu1 %4961, %v5040_v11   ;;  %2678 = vperm.xlu0 %4960, %v5041_v8   ;;  %v4322_v11 = vld [vmem:[%s5185_s12 + $0x24] sm:$0x1]  ;;  %v5042_v8 = vld [vmem:[%s6895_s4 + $0x50] sm:$0xff]  ;;  %v5886_v6 = vadd.f32 %v5762_v24, %v2951_v55 }
  0x76   : > { %7002 = vst [vmem:[#allocation49_spill] sm:$0xff] %v5878_v20  ;;  %v4326_v20 = vld [vmem:[%s5185_s12 + $0x34] sm:$0x1] }
  0x77   : > { %7004 = vst [vmem:[#allocation51_spill] sm:$0xff] %v5886_v6 }
  0x79   : > { %2693 = vperm.xlu1 %4961, %v5042_v8   ;;  %2688 = vperm.xlu0 %4960, %v5043_v59   ;;  %v2952_v8 = vmul.f32 %v5750_v10, %v2928_v19  ;;  %v2931_v59 = vunpack.c.l.bf16 %v4322_v11  ;;  %v2956_v19 = vmul.f32 %v5750_v10, %v2932_v41  ;;  %v5869_v11 = vadd.f32 %v5762_v24, %v2276_v28 }
  0x7a   : > { %v5872_v41 = vadd.f32 %v5762_v24, %v2277_v42  ;;  %v2653_v28 = vmul.f32 %v5750_v10, %v2636_v15  ;;  %v2652_v42 = vmul.f32 %v5750_v10, %v2635_v13 }
  0x7b   : > { %6999 = vst [vmem:[#allocation46_spill] sm:$0xff] %v5869_v11  ;;  %v5875_v21 = vadd.f32 %v5762_v24, %v2952_v8  ;;  %v2955_v36 = vmul.f32 %v5750_v10, %v2931_v59  ;;  %v5893_v2 = vadd.f32 %v5762_v24, %v2956_v19  ;;  %v2638_v8 = vunpack.c.h.bf16 %v4276_v7  ;;  %v4327_v59 = vld [vmem:[%s5185_s12 + $0x30] ss:$8 sps:$4 sm:$0xff]  }
  0x7c   : > { %7000 = vst [vmem:[#allocation47_spill] sm:$0xff] %v5872_v41  ;;  %v5913_v15 = vadd.f32 %v5762_v24, %v2653_v28  ;;  %v2936_v28 = vunpack.c.h.bf16 %v4327_v59 }
  0x7d   : > { %3020 = vperm.xlu1 %4961, %v5044_v18   ;;  %3016 = vperm.xlu0 %4960, %v5045_v40   ;;  %7001 = vst [vmem:[#allocation48_spill] sm:$0xff] %v5875_v21  ;;  %v2954_v18 = vmul.f32 %v5750_v10, %v2930_v17  ;;  %v5883_v40 = vadd.f32 %v5762_v24, %v2950_v12  ;;  %7005 = vst [vmem:[#allocation52_spill] sm:$0xff] %v5893_v2  ;;  %v2637_v12 = vunpack.c.l.bf16 %v4276_v7 }
  0x7e   : > { %v5896_v17 = vadd.f32 %v5762_v24, %v2957_v26  ;;  %v2655_v19 = vmul.f32 %v5750_v10, %v2638_v8  ;;  %7008 = vst [vmem:[#allocation55_spill] sm:$0xff] %v5913_v15  ;;  %v5047_v8 = vld [vmem:[%s6895_s4 + $0x60] sm:$0xff]  ;;  %v2960_v11 = vmul.f32 %v5750_v10, %v2936_v28 }
  0x7f   : > { %7003 = vst [vmem:[#allocation50_spill] sm:$0xff] %v5883_v40  ;;  %v2654_v26 = vmul.f32 %v5750_v10, %v2637_v12  ;;  %v4288_v12 = vld [vmem:[%s6895_s4 + $0x90] sm:$0xff] }
  0x80   : > { %7006 = vst [vmem:[#allocation53_spill] sm:$0xff] %v5896_v17  ;;  %v5932_v13 = vadd.f32 %v5762_v24, %v2655_v19  ;;  %v2934_v19 = vunpack.c.l.bf16 %v4327_v59  ;;  %v2935_v17 = vunpack.c.l.bf16 %v4326_v20  ;;  %v7012_v20 = vmax.f32 %v5244_v43, 0.0 }
  0x81   : > { %3028 = vperm.xlu1 %4961, %v4340_v25   ;;  %3024 = vperm.xlu0 %4960, %v5674_v30   ;;  %v5903_v25 = vadd.f32 %v5762_v24, %v2954_v18  ;;  %v5906_v30 = vadd.f32 %v5762_v24, %v2955_v36  ;;  %v5916_v18 = vadd.f32 %v5762_v24, %v2652_v42  ;;  %v5046_v36 = vld [vmem:[%s6895_s4 + $0x70] sm:$0xff] }
  0x82   : > { %7010 = vst [vmem:[#allocation57_spill] sm:$0xff] %v5932_v13  ;;  %v2958_v42 = vmul.f32 %v5750_v10, %v2934_v19  ;;  %v2959_v59 = vmul.f32 %v5750_v10, %v2935_v17  ;;  %v5960_v41 = vadd.f32 %v5762_v24, %v2960_v11 }
  0x83   : > { %7007 = vst [vmem:[#allocation54_spill] sm:$0xff] %v5906_v30  ;;  %7009 = vst [vmem:[#allocation56_spill] sm:$0xff] %v5916_v18 }
  0x84   : > { %7016 = vst [vmem:[#allocation59_spill] sm:$0xff] %v5960_v41  ;;  %v5966_v43 = vadd.f32 %v5762_v24, %v2958_v42 }
  0x85   : > { %2703 = vperm.xlu1 %4961, %v5046_v36   ;;  %2698 = vperm.xlu0 %4960, %v5047_v8   ;;  %v5935_v36 = vadd.f32 %v5762_v24, %v2654_v26  ;;  %v4328_v8 = vld [vmem:[%s5185_s12 + $0x3c] sm:$0x1] }
  0x86   : > { %v2937_v40 = vunpack.c.l.bf16 %v4328_v8 }
  0x87   : > { %7011 = vst [vmem:[#allocation58_spill] sm:$0xff] %v5935_v36 }
  0x88   : > { %v667_v55 = vpop.permute.xlu1 %666  ;;  %v659_v6 = vpop.permute.xlu0 %658  ;;  %v2961_v21 = vmul.f32 %v5750_v10, %v2937_v40  ;;  %v7015_v40 = vmax.f32 %v5253_v46, 0.0  ;;  %v5048_v46 = vld [vmem:[%s6895_s4 + $0x32] sm:$0xff] }
  0x89   : > { %v690_v2 = vrot.slane %v667_v55, 7  ;;  %v688_v26 = vrot.slane %v659_v6, 7  ;;  %2713 = vperm.xlu1 %4961, %v4288_v12   ;;  %2708 = vperm.xlu0 %4960, %v5585_v61   ;;  %v7013_v55 = vmax.f32 %v5247_v44, 0.0  ;;  %v7014_v12 = vmax.f32 %v5250_v45, 0.0 }
  0x8a   : > { %v5963_v19 = vadd.f32 %v5762_v24, %v2961_v21  ;;  %v5969_v44 = vadd.f32 %v5762_v24, %v2959_v59  ;;  %v5049_v21 = vld [vmem:[%s6895_s4 + $0x22] sm:$0xff] }
  0x8b   : > { %v708_v6 = vmul.f32 %v690_v2, %v7012_v20  ;;  %v709_v61 = vmul.f32 %v690_v2, %v7013_v55  ;;  %v704_v28 = vmul.f32 %v688_v26, %v7014_v12  ;;  %v705_v7 = vmul.f32 %v688_v26, %v7015_v40 }
  0x8c   : > { %v671_v18 = vpop.permute.xlu1 %670  ;;  %v663_v8 = vpop.permute.xlu0 %662  ;;  %7017 = vst [vmem:[#allocation60_spill] sm:$0xff] %v5963_v19  ;;  %v7018_v40 = vmax.f32 %v5278_v56, 0.0 }
  0x8d   : > { %v4479_v2 = vpack.c.bf16 %v708_v6, %v708_v6  ;;  %v4480_v45 = vpack.c.bf16 %v709_v61, %v709_v61  ;;  %v4475_v17 = vpack.c.bf16 %v704_v28, %v704_v28  ;;  %v4476_v20 = vpack.c.bf16 %v705_v7, %v705_v7  ;;  %3486 = vperm.xlu1 %4961, %v5048_v46  }
  0x8e   : > { %v691_v11 = vrot.slane %v671_v18, 7  ;;  %v689_v26 = vrot.slane %v663_v8, 7  ;;  %3482 = vperm.xlu0 %4960, %v5049_v21   ;;  %v7019_v8 = vmax.f32 %v5281_v57, 0.0  ;;  %v5051_v57 = vld [vmem:[%s6895_s4 + $0x42] sm:$0xff] }
  0x8f   : > { %v808_v6 = vshrl.u32 %v4479_v2, 16  ;;  %v811_v55 = vshll.u32 %v4479_v2, 16  ;;  %v817_v61 = vshll.u32 %v4480_v45, 16  ;;  %v780_v7 = vshrl.u32 %v4475_v17, 16  ;;  %v5050_v2 = vld [vmem:[%s6895_s4 + $0x52] sm:$0xff] }
  0x90   : > { %v783_v12 = vshll.u32 %v4475_v17, 16  ;;  %v5979_v28 = vshll.u32 %v4476_v20, 16  ;;  %v710_v18 = vmul.f32 %v691_v11, %v7018_v40  ;;  %v711_v46 = vmul.f32 %v691_v11, %v7019_v8  ;;  %v343_v36 = vpop.permute.xlu1 %342  ;;  %v338_v13 = vpop.permute.xlu0 %337 }
  0x91   : > { %v810_v21 = vrot.slane %v808_v6, 4  ;;  %v813_v15 = vrot.slane %v811_v55, 5  ;;  %v819_v42 = vrot.slane %v817_v61, 5  ;;  %v782_v41 = vrot.slane %v780_v7, 4  ;;  %3494 = vperm.xlu1 %4961, %v5050_v2  }
  0x92   : > { %v785_v45 = vrot.slane %v783_v12, 5  ;;  %v791_v17 = vrot.slane %v5979_v28, 5  ;;  %v4481_v20 = vpack.c.bf16 %v710_v18, %v710_v18  ;;  %v4482_v56 = vpack.c.bf16 %v711_v46, %v711_v46  ;;  %3490 = vperm.xlu0 %4960, %v5051_v57  }
  0x93   : > { %v814_v11 = vor.u32 %v813_v15, %v810_v21  ;;  %v7020_v6 = vmax.f32 %v5287_v62, 0.0  ;;  %v7021_v61 = vmax.f32 %v5293_v9, 0.0  ;;  %v7022_v40 = vmax.f32 %v5317_v27, 0.0 }
  0x94   : > { %v822_v12 = vshrl.u32 %v4481_v20, 16  ;;  %v825_v2 = vshll.u32 %v4481_v20, 16  ;;  %v831_v28 = vshll.u32 %v4482_v56, 16  ;;  %v7023_v18 = vmax.f32 %v5322_v31, 0.0  ;;  %v353_v59 = vpop.permute.xlu1 %352  ;;  %v348_v19 = vpop.permute.xlu0 %347 }
  0x95   : > { %v706_v55 = vmul.f32 %v689_v26, %v7020_v6  ;;  %v707_v7 = vmul.f32 %v689_v26, %v7021_v61  ;;  %v376_v8 = vmul.f32 %v343_v36, %v7022_v40  ;;  %v815_v30 = vrot.slane %v814_v11, 4  ;;  %3502 = vperm.xlu1 %4961, %v5477_v37  }
  0x96   : > { %v375_v46 = vmul.f32 %v338_v13, %v7023_v18  ;;  %v7024_v62 = vmax.f32 %v5338_v50, 0.0  ;;  %v824_v27 = vrot.slane %v822_v12, 4  ;;  %v827_v36 = vrot.slane %v825_v2, 5  ;;  %3498 = vperm.xlu0 %4960, %v5483_v58   ;;  %v4408_v50 = vld [vmem:[%s6895_s4 + $0x92] sm:$0xff] }
  0x97   : > { %v4477_v57 = vpack.c.bf16 %v706_v55, %v706_v55  ;;  %v4478_v15 = vpack.c.bf16 %v707_v7, %v707_v7  ;;  %v833_v31 = vrot.slane %v831_v28, 5  ;;  %v7027_v13 = vmax.f32 %v5341_v51, 0.0  ;;  %v4979_v51 = vld [vmem:[%s6892_s1 + $0xb0] sm:$0xff]  }
  0x98   : > { %v378_v21 = vmul.f32 %v353_v59, %v7024_v62  ;;  %v4471_v56 = vpack.c.bf16 %v376_v8, %v375_v46  ;;  %v828_v11 = vor.u32 %v827_v36, %v824_v27  ;;  %v679_v55 = vpop.permute.xlu1 %678  ;;  %v675_v61 = vpop.permute.xlu0 %674  ;;  %v6022_v58 = vsel %vm6005_vm2, %v815_v30, %v819_v42 }
  0x99   : > { %v377_v26 = vmul.f32 %v348_v19, %v7027_v13  ;;  %v794_v59 = vshrl.u32 %v4477_v57, 16  ;;  %v797_v37 = vshll.u32 %v4477_v57, 16  ;;  %v6015_v20 = vshll.u32 %v4478_v15, 16  ;;  %3510 = vperm.xlu1 %4961, %v4408_v50   ;;  %v5052_v57 = vld [vmem:[%s6892_s1 + $0xb8] sm:$0xff]   ;;  %v4981_v50 = vld [vmem:[%s6892_s1 + $0xa8] sm:$0xff]  }
  0x9a   : > { %v786_v19 = vor.u32 %v785_v45, %v782_v41  ;;  %4734 = vmatprep.mubr.bf16.mxu0 %v4471_v56  ;;  %v693_v2 = vrot.slane %v679_v55, 7  ;;  %v829_v8 = vrot.slane %v828_v11, 4  ;;  %v692_v28 = vrot.slane %v675_v61, 7  ;;  %3506 = vperm.xlu0 %4960, %v5720_v0  }
  0x9b   : > { %v4472_v6 = vpack.c.bf16 %v378_v21, %v377_v26  ;;  %v796_v7 = vrot.slane %v794_v59, 4  ;;  %v799_v40 = vrot.slane %v797_v37, 5  ;;  %v805_v12 = vrot.slane %v6015_v20, 5 }
  0x9c   : > { %v787_v18 = vrot.slane %v786_v19, 4  ;;  %v2990_v46 = vmax.f32 %v5966_v43, 0.0  ;;  %v7028_v41 = vmax.f32 %v5362_v23, 0.0  ;;  %v7029_v30 = vmax.f32 %v5365_v29, 0.0  ;;  %v687_v13 = vpop.permute.xlu1 %686  ;;  %v683_v23 = vpop.permute.xlu0 %682 }
  0x9d   : > { %4735 = vmatmul.mubr.bf16.vlgmr.msra.gmra.mxu0 %v4472_v6  ;;  %v800_v15 = vor.u32 %v799_v40, %v796_v7  ;;  %v2991_v62 = vmax.f32 %v5969_v44, 0.0  ;;  %v7030_v0 = vmax.f32 %v5368_v32, 0.0  ;;  %v7031_v27 = vmax.f32 %v5371_v33, 0.0 }
  0x9e   : > { %v714_v45 = vmul.f32 %v693_v2, %v7028_v41  ;;  %v715_v42 = vmul.f32 %v693_v2, %v7029_v30  ;;  %4767 = vmatpush3.bf16.msra.mxu0 %v5052_v57  ;;  %v792_v29 = vsel %vm6005_vm2, %v787_v18, %v791_v17  ;;  %v6043_v26 = vsel %vm6005_vm2, %v829_v8, %v833_v31 }
  0x9f   : > { %v712_v21 = vmul.f32 %v692_v28, %v7030_v0  ;;  %v713_v36 = vmul.f32 %v692_v28, %v7031_v27  ;;  %4768 = vmatprep.subr.bf16.mxu0 %v4979_v51  ;;  %v695_v37 = vrot.slane %v687_v13, 7  ;;  %v694_v20 = vrot.slane %v683_v23, 7 }
  0xa0   : > { %v4485_v59 = vpack.c.bf16 %v714_v45, %v714_v45  ;;  %v4486_v32 = vpack.c.bf16 %v715_v42, %v715_v42  ;;  %v801_v11 = vrot.slane %v800_v15, 4  ;;  %v4022_v6 = vcombine.low %v6022_v58, %v6043_v26  ;;  %v363_v18 = vpop.permute.xlu1 %362  ;;  %v358_v41 = vpop.permute.xlu0 %357  ;;  %v4983_v58 = vld [vmem:[%s6892_s1 + $0xa0] sm:$0xff]  }
  0xa1   : > { %v4483_v33 = vpack.c.bf16 %v712_v21, %v712_v21  ;;  %v4484_v56 = vpack.c.bf16 %v713_v36, %v713_v36  ;;  %v7032_v31 = vmax.f32 %v5391_v1, 0.0  ;;  %v7033_v8 = vmax.f32 %v5394_v54, 0.0 }
  0xa2   : > { %v850_v55 = vshrl.u32 %v4485_v59, 16  ;;  %v853_v17 = vshll.u32 %v4485_v59, 16  ;;  %v6050_v61 = vshll.u32 %v4486_v32, 16  ;;  %4769 = vmatpush3.bf16.msra.mxu0 %v4979_v51  ;;  %v7034_v36 = vmax.f32 %v5399_v34, 0.0 }
  0xa3   : > { %v718_v19 = vmul.f32 %v695_v37, %v7032_v31  ;;  %v836_v7 = vshrl.u32 %v4483_v33, 16  ;;  %v839_v40 = vshll.u32 %v4483_v33, 16  ;;  %v6054_v2 = vshll.u32 %v4484_v56, 16  ;;  %4770 = vmatprep.subr.bf16.mxu0 %v4981_v50 }
  0xa4   : > { %v719_v28 = vmul.f32 %v695_v37, %v7033_v8  ;;  %v852_v45 = vrot.slane %v850_v55, 4  ;;  %v855_v30 = vrot.slane %v853_v17, 5  ;;  %v861_v1 = vrot.slane %v6050_v61, 5  ;;  %v373_v33 = vpop.permute.xlu1 %372  ;;  %v368_v56 = vpop.permute.xlu0 %367  ;;  %v4985_v55 = vld [vmem:[%s6892_s1 + $0x98] sm:$0xff]  }
  0xa5   : > { %v4489_v42 = vpack.c.bf16 %v718_v19, %v718_v19  ;;  %v838_v51 = vrot.slane %v836_v7, 4  ;;  %v841_v57 = vrot.slane %v839_v40, 5  ;;  %v847_v15 = vrot.slane %v6054_v2, 5  ;;  %v4989_v2 = vld [vmem:[%s6892_s1 + $0x88] sm:$0xff]  }
  0xa6   : > { %v4490_v0 = vpack.c.bf16 %v719_v28, %v719_v28  ;;  %v856_v21 = vor.u32 %v855_v30, %v852_v45  ;;  %v716_v13 = vmul.f32 %v694_v20, %v7034_v36  ;;  %4771 = vmatpush3.bf16.msra.mxu0 %v4981_v50  ;;  %v7035_v59 = vmax.f32 %v5407_v49, 0.0  ;;  %v4982_v45 = vld [vmem:[%s6892_s1 + $0xf0] sm:$0xff]  }
  0xa7   : > { %v878_v54 = vshrl.u32 %v4489_v42, 16  ;;  %v881_v27 = vshll.u32 %v4489_v42, 16  ;;  %v842_v23 = vor.u32 %v841_v57, %v838_v51  ;;  %v806_v37 = vsel %vm6005_vm2, %v801_v11, %v805_v12  ;;  %4772 = vmatprep.subr.bf16.mxu0 %v4983_v58 }
  0xa8   : > { %v6065_v26 = vshll.u32 %v4490_v0, 16  ;;  %v717_v32 = vmul.f32 %v694_v20, %v7035_v59  ;;  %v857_v34 = vrot.slane %v856_v21, 4  ;;  %v4487_v31 = vpack.c.bf16 %v716_v13, %v716_v13 }
  0xa9   : > { %v880_v50 = vrot.slane %v878_v54, 4  ;;  %v883_v17 = vrot.slane %v881_v27, 5  ;;  %v843_v19 = vrot.slane %v842_v23, 4  ;;  %v4021_v7 = vcombine.low %v792_v29, %v806_v37  ;;  %v1148_v54 = vpop.permute.xlu1 %1147  ;;  %v1144_v27 = vpop.permute.xlu0 %1143  ;;  %v7040_v37 = vld [vmem:[#allocation3_spill] sm:$0xff] }
  0xaa   : > { %v889_v49 = vrot.slane %v6065_v26, 5  ;;  %v4488_v20 = vpack.c.bf16 %v717_v32, %v717_v32  ;;  %v864_v11 = vshrl.u32 %v4487_v31, 16  ;;  %v867_v40 = vshll.u32 %v4487_v31, 16  ;;  %4773 = vmatpush3.bf16.msra.mxu0 %v4983_v58 }
  0xab   : > { %v884_v12 = vor.u32 %v883_v17, %v880_v50  ;;  %v7036_v8 = vmax.f32 %v5421_v5, 0.0  ;;  %4758 = vmatprep.mubr.bf16.mxu1 %v4021_v7  ;;  %v7037_v42 = vmax.f32 %v5424_v63, 0.0  ;;  %v7038_v57 = vmax.f32 %v5433_v52, 0.0  ;;  %4774 = vmatprep.subr.bf16.mxu0 %v4985_v55  ;;  %v6087_v5 = vld [vmem:[%s5185_s12 + $0x40] ss:$8 sps:$4 sm:$0xff]   ;;  %v4987_v63 = vld [vmem:[%s6892_s1 + $0x90] sm:$0xff]  }
  0xac   : > { %v873_v30 = vshll.u32 %v4488_v20, 16  ;;  %v7039_v29 = vmax.f32 %v5443_v39, 0.0  ;;  %v866_v36 = vrot.slane %v864_v11, 4  ;;  %v869_v13 = vrot.slane %v867_v40, 5  ;;  %4759 = vmatmul.mubr.bf16.vlgmr.msra.gmra.mxu1 %v4022_v6  ;;  %v5053_v52 = vld [vmem:[%s6892_s1 + $0xf8] sm:$0xff]   ;;  %v4984_v6 = vld [vmem:[%s6892_s1 + $0xe8] sm:$0xff]  }
  0xad   : > { %v380_v28 = vmul.f32 %v363_v18, %v7036_v8  ;;  %v379_v51 = vmul.f32 %v358_v41, %v7037_v42  ;;  %v382_v0 = vmul.f32 %v373_v33, %v7038_v57  ;;  %v885_v18 = vrot.slane %v884_v12, 4  ;;  %4791 = vmatpush3.bf16.msra.mxu1 %v5053_v52  ;;  %v7042_v50 = vld [vmem:[#allocation4_spill] sm:$0xff]  ;;  %v7044_v7 = vld [vmem:[#allocation5_spill] sm:$0xff]  ;;  %v7046_v40 = vld [vmem:[#allocation6_spill] sm:$0xff] }
  0xae   : > { %v381_v21 = vmul.f32 %v368_v56, %v7039_v29  ;;  %v1174_v58 = vrot.slane %v1148_v54, 6  ;;  %v875_v41 = vrot.slane %v873_v30, 5  ;;  %v1173_v59 = vrot.slane %v1144_v27, 6  ;;  %4792 = vmatprep.subr.bf16.mxu1 %v4982_v45  ;;  %4775 = vmatpush3.bf16.msra.mxu0 %v4985_v55  ;;  %v1156_v55 = vpop.permute.xlu1 %1155  ;;  %v4986_v27 = vld [vmem:[%s6892_s1 + $0xe0] sm:$0xff]  }
  0xaf   : > { %v4473_v39 = vpack.c.bf16 %v380_v28, %v379_v51  ;;  %v870_v32 = vor.u32 %v869_v13, %v866_v36  ;;  %v7041_v33 = vmax.f32 %v7040_v37, 0.0  ;;  %v7043_v17 = vmax.f32 %v7042_v50, 0.0  ;;  %v1152_v51 = vpop.permute.xlu0 %1151  ;;  %4776 = vmatprep.subr.bf16.mxu0 %v4987_v63  ;;  %v4332_v50 = vld [vmem:[%s5185_s12 + $0x4c] sm:$0x1] }
  0xb0   : > { %v4474_v23 = vpack.c.bf16 %v382_v0, %v381_v21  ;;  %v2940_v20 = vunpack.c.h.bf16 %v6087_v5  ;;  %v7045_v12 = vmax.f32 %v7044_v7, 0.0  ;;  %v7047_v8 = vmax.f32 %v7046_v40, 0.0  ;;  %v7057_v40 = vld [vmem:[#allocation9_spill] sm:$0xff] }
  0xb1   : > { %v1191_v56 = vmul.f32 %v1174_v58, %v7041_v33  ;;  %v1192_v31 = vmul.f32 %v1174_v58, %v7043_v17  ;;  %4738 = vmatprep.mubr.bf16.mxu0 %v4473_v39  ;;  %v848_v30 = vsel %vm6005_vm2, %v843_v19, %v847_v15  ;;  %v862_v42 = vsel %vm6005_vm2, %v857_v34, %v861_v1  ;;  %v7050_v39 = vld [vmem:[#allocation7_spill] sm:$0xff] }
  0xb2   : > { %v1189_v11 = vmul.f32 %v1173_v59, %v7045_v12  ;;  %v1190_v28 = vmul.f32 %v1173_v59, %v7047_v8  ;;  %v871_v57 = vrot.slane %v870_v32, 4  ;;  %4739 = vmatmul.mubr.bf16.gmra.mxu0 %v4474_v23  ;;  %v4023_v21 = vcombine.low %v848_v30, %v862_v42  ;;  %4793 = vmatpush3.bf16.msra.mxu1 %v4982_v45  ;;  %v1516_v33 = vpop.permute.xlu1 %1515  ;;  %v4988_v42 = vld [vmem:[%s6892_s1 + $0xd8] sm:$0xff]  }
  0xb3   : > { %v4493_v0 = vpack.c.bf16 %v1191_v56, %v1191_v56  ;;  %v4494_v29 = vpack.c.bf16 %v1192_v31, %v1192_v31  ;;  %v1176_v19 = vrot.slane %v1156_v55, 6  ;;  %v1175_v61 = vrot.slane %v1152_v51, 6  ;;  %4794 = vmatprep.subr.bf16.mxu1 %v4984_v6  ;;  %4777 = vmatpush3.bf16.msra.mxu0 %v4987_v63  ;;  %v1511_v56 = vpop.permute.xlu0 %1510 }
  0xb4   : > { %v4491_v54 = vpack.c.bf16 %v1189_v11, %v1189_v11  ;;  %v4492_v15 = vpack.c.bf16 %v1190_v28, %v1190_v28  ;;  %4762 = vmatprep.mubr.bf16.mxu1 %v4023_v21  ;;  %v876_v45 = vsel %vm6005_vm2, %v871_v57, %v875_v41  ;;  %v890_v13 = vsel %vm6005_vm2, %v885_v18, %v889_v49  ;;  %v7055_v49 = vld [vmem:[#allocation8_spill] sm:$0xff] }
  0xb5   : > { %v4050_v1 = vrot.slane %v4493_v0, 9  ;;  %v1270_v34 = vrot.slane %v4494_v29, 5  ;;  %v7051_v23 = vmax.f32 %v7050_v39, 0.0  ;;  %v7052_v32 = vmax.f32 %v5501_v35, 0.0  ;;  %4778 = vmatprep.subr.bf16.mxu0 %v4989_v2  ;;  %v4991_v35 = vld [vmem:[%s6892_s1 + $0x80] sm:$0xff]  }
  0xb6   : > { %v4049_v58 = vrot.slane %v4491_v54, 9  ;;  %v1266_v52 = vrot.slane %v4492_v15, 5  ;;  %v7053_v17 = vmax.f32 %v5504_v48, 0.0  ;;  %v7054_v26 = vmax.f32 %v5507_v38, 0.0  ;;  %4795 = vmatpush3.bf16.msra.mxu1 %v4984_v6  ;;  %v1526_v29 = vpop.permute.xlu1 %1525  ;;  %v4330_v15 = vld [vmem:[%s5185_s12 + $0x44] sm:$0x1] }
  0xb7   : > { %v1195_v59 = vmul.f32 %v1176_v19, %v7051_v23  ;;  %v1196_v37 = vmul.f32 %v1176_v19, %v7052_v32  ;;  %v4024_v7 = vcombine.low %v876_v45, %v890_v13  ;;  %v7056_v18 = vmax.f32 %v7055_v49, 0.0  ;;  %4796 = vmatprep.subr.bf16.mxu1 %v4986_v27  ;;  %4779 = vmatpush3.bf16.msra.mxu0 %v4989_v2  ;;  %v1521_v21 = vpop.permute.xlu0 %1520  ;;  %v4278_v19 = vld [vmem:[%s5185_s12 + $0x30] ss:$8 sps:$4 sm:$0xff]   ;;  %v7061_v39 = vld [vmem:[#allocation11_spill] sm:$0xff] }
  0xb8   : > { %v1193_v41 = vmul.f32 %v1175_v61, %v7053_v17  ;;  %v1194_v31 = vmul.f32 %v1175_v61, %v7054_v26  ;;  %v7058_v8 = vmax.f32 %v7057_v40, 0.0  ;;  %v1267_v48 = vsel %vm6123_vm5, %v4049_v58, %v1266_v52  ;;  %v7059_v13 = vld [vmem:[#allocation10_spill] sm:$0xff]  ;;  %4780 = vmatprep.subr.bf16.mxu0 %v4991_v35 }
  0xb9   : > { %v1549_v12 = vmul.f32 %v1516_v33, %v7056_v18  ;;  %v4497_v63 = vpack.c.bf16 %v1195_v59, %v1195_v59  ;;  %v4498_v11 = vpack.c.bf16 %v1196_v37, %v1196_v37  ;;  %4763 = vmatmul.mubr.bf16.gmra.mxu1 %v4024_v7  ;;  %v1271_v6 = vsel %vm6123_vm5, %v4050_v1, %v1270_v34  ;;  %v4993_v2 = vld [vmem:[%s6892_s1 + $0x138] sm:$0xff]  }
  0xba   : > { %v1548_v28 = vmul.f32 %v1511_v56, %v7058_v8  ;;  %v4495_v38 = vpack.c.bf16 %v1193_v41, %v1193_v41  ;;  %v4496_v30 = vpack.c.bf16 %v1194_v31, %v1194_v31  ;;  %v2941_v55 = vunpack.c.l.bf16 %v4332_v50  ;;  %4797 = vmatpush3.bf16.msra.mxu1 %v4986_v27  ;;  %v4990_v27 = vld [vmem:[%s6892_s1 + $0xd0] sm:$0xff]  }
  0xbb   : > { %v4052_v51 = vrot.slane %v4497_v63, 9  ;;  %v1278_v57 = vrot.slane %v4498_v11, 5  ;;  %v4073_v54 = vcombine.low %v1267_v48, %v1271_v6  ;;  %v7060_v58 = vmax.f32 %v7059_v13, 0.0  ;;  %4798 = vmatprep.subr.bf16.mxu1 %v4988_v42  ;;  %4781 = vmatpush3.bf16.msra.mxu0 %v4991_v35  ;;  %v1160_v26 = vpop.permute.xlu0 %1159  ;;  %v4995_v35 = vld [vmem:[%s6892_s1 + $0x130] sm:$0xff]   ;;  %v4992_v48 = vld [vmem:[%s6892_s1 + $0xc8] sm:$0xff]  }
  0xbc   : > { %v4507_v0 = vpack.c.bf16 %v1549_v12, %v1548_v28  ;;  %v4051_v61 = vrot.slane %v4495_v38, 9  ;;  %v1274_v45 = vrot.slane %v4496_v30, 5  ;;  %v7062_v23 = vmax.f32 %v7061_v39, 0.0  ;;  %4814 = vmatprep.subr.bf16.mxu0 %v4993_v2 }
  0xbd   : > { %v6160_v52 = vmul.f32 %v1526_v29, %v7060_v58  ;;  %v1279_v1 = vsel %vm6123_vm5, %v4052_v51, %v1278_v57  ;;  %4782 = vmatprep.mubr.bf16.mxu0 %v4073_v54  ;;  %v2964_v34 = vmul.f32 %v5750_v10, %v2940_v20  ;;  %v2965_v32 = vmul.f32 %v5750_v10, %v2941_v55  ;;  %v1164_v20 = vpop.permute.xlu1 %1163  ;;  %v7065_v55 = vld [vmem:[#allocation12_spill] sm:$0xff] }
  0xbe   : > { %v6164_v59 = vmul.f32 %v1521_v21, %v7062_v23  ;;  %v2938_v37 = vunpack.c.l.bf16 %v6087_v5  ;;  %v1275_v33 = vsel %vm6123_vm5, %v4051_v61, %v1274_v45  ;;  %4806 = vmatprep.mubr.bf16.mxu1 %v4507_v0  ;;  %v2939_v50 = vunpack.c.l.bf16 %v4330_v15  ;;  %4799 = vmatpush3.bf16.msra.mxu1 %v4988_v42  ;;  %v7067_v0 = vld [vmem:[#allocation13_spill] sm:$0xff] }
  0xbf   : > { %v2640_v17 = vunpack.c.h.bf16 %v4278_v19  ;;  %v4074_v41 = vcombine.low %v1275_v33, %v1279_v1  ;;  %v6184_v5 = vadd.f32 %v5762_v24, %v2964_v34  ;;  %v6187_v31 = vadd.f32 %v5762_v24, %v2965_v32  ;;  %4800 = vmatprep.subr.bf16.mxu1 %v4990_v27  ;;  %v1168_v15 = vpop.permute.xlu0 %1167 }
  0xc0   : > { %v4508_v56 = vpack.c.bf16 %v6160_v52, %v6164_v59  ;;  %v2962_v7 = vmul.f32 %v5750_v10, %v2938_v37  ;;  %v1178_v49 = vrot.slane %v1164_v20, 6  ;;  %v1177_v18 = vrot.slane %v1160_v26, 6  ;;  %v7087_v52 = vld [vmem:[#allocation22_spill] sm:$0xff] }
  0xc1   : > { %v2963_v12 = vmul.f32 %v5750_v10, %v2939_v50  ;;  %v2657_v63 = vmul.f32 %v5750_v10, %v2640_v17  ;;  %v2996_v11 = vmax.f32 %v6184_v5, 0.0  ;;  %v2997_v40 = vmax.f32 %v6187_v31, 0.0  ;;  %4783 = vmatmul.mubr.bf16.vlgmr.msra.gmra.mxu0 %v4074_v41  ;;  %v1172_v54 = vpop.permute.xlu1 %1171  ;;  %v7069_v17 = vld [vmem:[#allocation14_spill] sm:$0xff]  ;;  %v5027_v31 = vld [vmem:[%s6892_s1 + $0x230] sm:$0xff]  }
  0xc2   : > { %v6198_v8 = vadd.f32 %v5762_v24, %v2962_v7  ;;  %v2639_v28 = vunpack.c.l.bf16 %v4278_v19  ;;  %v7063_v38 = vmax.f32 %v5542_v4, 0.0  ;;  %v7064_v42 = vmax.f32 %v5547_v16, 0.0  ;;  %4815 = vmatpush3.bf16.msra.mxu0 %v4993_v2  ;;  %4801 = vmatpush3.bf16.msra.mxu1 %v4990_v27 }
  0xc3   : > { %v7066_v51 = vmax.f32 %v7065_v55, 0.0  ;;  %v7068_v29 = vmax.f32 %v7067_v0, 0.0  ;;  %v6212_v19 = vadd.f32 %v5762_v24, %v2963_v12  ;;  %v6216_v4 = vadd.f32 %v5762_v24, %v2657_v63  ;;  %4816 = vmatprep.subr.bf16.mxu0 %v4995_v35  ;;  %4802 = vmatprep.subr.bf16.mxu1 %v4992_v48  ;;  %v4999_v0 = vld [vmem:[%s6892_s1 + $0x120] sm:$0xff]  }
  0xc4   : > { %v1199_v30 = vmul.f32 %v1178_v49, %v7063_v38  ;;  %v1200_v6 = vmul.f32 %v1178_v49, %v7064_v42  ;;  %v2994_v61 = vmax.f32 %v6198_v8, 0.0  ;;  %v6219_v16 = vmul.f32 %v5750_v10, %v2639_v28  ;;  %v4994_v10 = vld [vmem:[%s6892_s1 + $0xc0] sm:$0xff]   ;;  %v1833_v28 = vpop.permute.xlu0 %1832  ;;  %v4997_v38 = vld [vmem:[%s6892_s1 + $0x128] sm:$0xff]  }
  0xc5   : > { %v1197_v57 = vmul.f32 %v1177_v18, %v7066_v51  ;;  %v1198_v21 = vmul.f32 %v1177_v18, %v7068_v29  ;;  %v1180_v23 = vrot.slane %v1172_v54, 6  ;;  %v1179_v1 = vrot.slane %v1168_v15, 6  ;;  %v7073_v49 = vld [vmem:[#allocation15_spill] sm:$0xff]  ;;  %v1837_v63 = vpop.permute.xlu1 %1836  ;;  %v7075_v29 = vld [vmem:[#allocation16_spill] sm:$0xff]  ;;  %v7077_v15 = vld [vmem:[#allocation17_spill] sm:$0xff] }
  0xc6   : > { %v4501_v45 = vpack.c.bf16 %v1199_v30, %v1199_v30  ;;  %v4502_v13 = vpack.c.bf16 %v1200_v6, %v1200_v6  ;;  %v7070_v41 = vmax.f32 %v7069_v17, 0.0  ;;  %v7071_v27 = vmax.f32 %v5574_v47, 0.0  ;;  %4817 = vmatpush3.bf16.msra.mxu0 %v4995_v35  ;;  %4803 = vmatpush3.bf16.msra.mxu1 %v4992_v48  ;;  %v4996_v35 = vld [vmem:[%s6892_s1 + $0x178] sm:$0xff]  }
  0xc7   : > { %v4499_v58 = vpack.c.bf16 %v1197_v57, %v1197_v57  ;;  %v4500_v39 = vpack.c.bf16 %v1198_v21, %v1198_v21  ;;  %v7072_v26 = vmax.f32 %v5579_v22, 0.0  ;;  %v7074_v18 = vmax.f32 %v7073_v49, 0.0  ;;  %4804 = vmatprep.subr.bf16.mxu1 %v4994_v10  ;;  %v7079_v48 = vld [vmem:[#allocation18_spill] sm:$0xff]  ;;  %4818 = vmatprep.subr.bf16.mxu0 %v4997_v38 }
  0xc8   : > { %v4054_v37 = vrot.slane %v4501_v45, 9  ;;  %v1286_v24 = vrot.slane %v4502_v13, 5  ;;  %v1203_v2 = vmul.f32 %v1180_v23, %v7070_v41  ;;  %v1204_v20 = vmul.f32 %v1180_v23, %v7071_v27  ;;  %v7081_v23 = vld [vmem:[#allocation19_spill] sm:$0xff] }
  0xc9   : > { %v4053_v33 = vrot.slane %v4499_v58, 9  ;;  %v1282_v50 = vrot.slane %v4500_v39, 5  ;;  %v1201_v7 = vmul.f32 %v1179_v1, %v7072_v26  ;;  %v1202_v12 = vmul.f32 %v1179_v1, %v7074_v18  ;;  %v1845_v41 = vpop.permute.xlu1 %1844 }
  0xca   : > { %v1863_v30 = vrot.slane %v1837_v63, 7  ;;  %v1862_v42 = vrot.slane %v1833_v28, 7  ;;  %v1287_v47 = vsel %vm6123_vm5, %v4054_v37, %v1286_v24  ;;  %v4505_v22 = vpack.c.bf16 %v1203_v2, %v1203_v2  ;;  %v1841_v2 = vpop.permute.xlu0 %1840  ;;  %4819 = vmatpush3.bf16.msra.mxu0 %v4997_v38  ;;  %4805 = vmatpush3.bf16.msra.mxu1 %v4994_v10  ;;  %v5001_v28 = vld [vmem:[%s6892_s1 + $0x118] sm:$0xff]   ;;  %v4998_v10 = vld [vmem:[%s6892_s1 + $0x170] sm:$0xff]  }
  0xcb   : > { %v1283_v6 = vsel %vm6123_vm5, %v4053_v33, %v1282_v50  ;;  %v4506_v55 = vpack.c.bf16 %v1204_v20, %v1204_v20  ;;  %v4503_v51 = vpack.c.bf16 %v1201_v7, %v1201_v7  ;;  %v4504_v57 = vpack.c.bf16 %v1202_v12, %v1202_v12  ;;  %4820 = vmatprep.subr.bf16.mxu0 %v4999_v0 }
  0xcc   : > { %v7076_v21 = vmax.f32 %v7075_v29, 0.0  ;;  %v7078_v45 = vmax.f32 %v7077_v15, 0.0  ;;  %v7080_v58 = vmax.f32 %v7079_v48, 0.0  ;;  %v7082_v1 = vmax.f32 %v7081_v23, 0.0  ;;  %4838 = vmatprep.subr.bf16.mxu1 %v4996_v35  ;;  %v7085_v29 = vld [vmem:[#allocation21_spill] sm:$0xff] }
  0xcd   : > { %v6255_v24 = vrot.slane %v4505_v22, 9  ;;  %v6257_v33 = vrot.slane %v4506_v55, 5  ;;  %v6259_v50 = vrot.slane %v4503_v51, 9  ;;  %v6261_v17 = vrot.slane %v4504_v57, 5  ;;  %v7083_v55 = vld [vmem:[#allocation20_spill] sm:$0xff]  ;;  %v1536_v15 = vpop.permute.xlu1 %1535  ;;  %4807 = vmatmul.mubr.bf16.vlgmr.msra.gmra.mxu1 %v4508_v56 }
  0xce   : > { %v1880_v54 = vmul.f32 %v1863_v30, %v7076_v21  ;;  %v1881_v13 = vmul.f32 %v1863_v30, %v7078_v45  ;;  %v1878_v39 = vmul.f32 %v1862_v42, %v7080_v58  ;;  %v1879_v37 = vmul.f32 %v1862_v42, %v7082_v1  ;;  %v1531_v45 = vpop.permute.xlu0 %1530  ;;  %4821 = vmatpush3.bf16.msra.mxu0 %v4999_v0  ;;  %v5000_v0 = vld [vmem:[%s6892_s1 + $0x168] sm:$0xff]  }
  0xcf   : > { %v1865_v49 = vrot.slane %v1845_v41, 7  ;;  %v1864_v18 = vrot.slane %v1841_v2, 7  ;;  %v4075_v12 = vcombine.low %v1283_v6, %v1287_v47  ;;  %v1291_v63 = vsel %vm6123_vm5, %v6259_v50, %v6261_v17  ;;  %4839 = vmatpush3.bf16.msra.mxu1 %v4996_v35  ;;  %4822 = vmatprep.subr.bf16.mxu0 %v5001_v28  ;;  %v5003_v2 = vld [vmem:[%s6892_s1 + $0x110] sm:$0xff]   ;;  %v7091_v35 = vld [vmem:[#allocation24_spill] sm:$0xff]  ;;  %v5004_v50 = vld [vmem:[%s6892_s1 + $0x158] sm:$0xff]  }
  0xd0   : > { %v4513_v27 = vpack.c.bf16 %v1880_v54, %v1880_v54  ;;  %v4514_v20 = vpack.c.bf16 %v1881_v13, %v1881_v13  ;;  %v4511_v26 = vpack.c.bf16 %v1878_v39, %v1878_v39  ;;  %v4512_v7 = vpack.c.bf16 %v1879_v37, %v1879_v37  ;;  %4840 = vmatprep.subr.bf16.mxu1 %v4998_v10 }
  0xd1   : > { %v7084_v51 = vmax.f32 %v7083_v55, 0.0  ;;  %v7086_v21 = vmax.f32 %v7085_v29, 0.0  ;;  %4786 = vmatprep.mubr.bf16.mxu0 %v4075_v12  ;;  %v7088_v59 = vmax.f32 %v7087_v52, 0.0 }
  0xd2   : > { %v1965_v30 = vshrl.u32 %v4513_v27, 16  ;;  %v1968_v42 = vshll.u32 %v4513_v27, 16  ;;  %v6270_v22 = vshll.u32 %v4514_v20, 16  ;;  %v1951_v38 = vshrl.u32 %v4511_v26, 16  ;;  %v7089_v20 = vld [vmem:[#allocation23_spill] sm:$0xff]  ;;  %v1541_v55 = vpop.permute.xlu0 %1540  ;;  %4823 = vmatpush3.bf16.msra.mxu0 %v5001_v28 }
  0xd3   : > { %v1954_v6 = vshll.u32 %v4511_v26, 16  ;;  %v6275_v47 = vshll.u32 %v4512_v7, 16  ;;  %v1884_v57 = vmul.f32 %v1865_v49, %v7084_v51  ;;  %v1885_v54 = vmul.f32 %v1865_v49, %v7086_v21  ;;  %v7093_v21 = vld [vmem:[#allocation25_spill] sm:$0xff]  ;;  %4841 = vmatpush3.bf16.msra.mxu1 %v4998_v10  ;;  %4824 = vmatprep.subr.bf16.mxu0 %v5003_v2  ;;  %v5002_v28 = vld [vmem:[%s6892_s1 + $0x160] sm:$0xff]  }
  0xd4   : > { %v1967_v13 = vrot.slane %v1965_v30, 4  ;;  %v1970_v48 = vrot.slane %v1968_v42, 5  ;;  %v1976_v58 = vrot.slane %v6270_v22, 5  ;;  %v1953_v39 = vrot.slane %v1951_v38, 4  ;;  %4842 = vmatprep.subr.bf16.mxu1 %v5000_v0 }
  0xd5   : > { %v1956_v23 = vrot.slane %v1954_v6, 5  ;;  %v1962_v1 = vrot.slane %v6275_v47, 5  ;;  %v4517_v37 = vpack.c.bf16 %v1884_v57, %v1884_v57  ;;  %v4518_v41 = vpack.c.bf16 %v1885_v54, %v1885_v54  ;;  %v1546_v47 = vpop.permute.xlu1 %1545 }
  0xd6   : > { %v1971_v27 = vor.u32 %v1970_v48, %v1967_v13  ;;  %v1882_v56 = vmul.f32 %v1864_v18, %v7088_v59  ;;  %v7090_v26 = vmax.f32 %v7089_v20, 0.0  ;;  %v7092_v49 = vmax.f32 %v7091_v35, 0.0  ;;  %4825 = vmatpush3.bf16.msra.mxu0 %v5003_v2 }
  0xd7   : > { %v1957_v30 = vor.u32 %v1956_v23, %v1953_v39  ;;  %v1993_v42 = vshrl.u32 %v4517_v37, 16  ;;  %v1996_v38 = vshll.u32 %v4517_v37, 16  ;;  %v2002_v6 = vshll.u32 %v4518_v41, 16  ;;  %4843 = vmatpush3.bf16.msra.mxu1 %v5000_v0 }
  0xd8   : > { %v1883_v7 = vmul.f32 %v1864_v18, %v7090_v26  ;;  %v1553_v12 = vmul.f32 %v1536_v15, %v7092_v49  ;;  %v1972_v51 = vrot.slane %v1971_v27, 4  ;;  %v4515_v57 = vpack.c.bf16 %v1882_v56, %v1882_v56  ;;  %v5005_v15 = vld [vmem:[%s6892_s1 + $0x108] sm:$0xff]   ;;  %v7095_v27 = vld [vmem:[#allocation26_spill] sm:$0xff]  ;;  %v7097_v26 = vld [vmem:[#allocation27_spill] sm:$0xff]  ;;  %4844 = vmatprep.subr.bf16.mxu1 %v5002_v28 }
  0xd9   : > { %v7094_v54 = vmax.f32 %v7093_v21, 0.0  ;;  %v1958_v18 = vrot.slane %v1957_v30, 4  ;;  %v1995_v48 = vrot.slane %v1993_v42, 4  ;;  %v1998_v52 = vrot.slane %v1996_v38, 5  ;;  %v2319_v49 = vpop.permute.xlu1 %2318  ;;  %v2315_v30 = vpop.permute.xlu0 %2314  ;;  %v6315_v42 = vld [vmem:[%s5185_s12 + $0x40] ss:$8 sps:$4 sm:$0xff]   ;;  %4826 = vmatprep.subr.bf16.mxu0 %v5005_v15 }
  0xda   : > { %v4516_v29 = vpack.c.bf16 %v1883_v7, %v1883_v7  ;;  %v2004_v59 = vrot.slane %v2002_v6, 5  ;;  %v1979_v39 = vshrl.u32 %v4515_v57, 16  ;;  %v1982_v23 = vshll.u32 %v4515_v57, 16  ;;  %4827 = vmatpush3.bf16.msra.mxu0 %v5005_v15  ;;  %v5006_v15 = vld [vmem:[%s6892_s1 + $0x150] sm:$0xff]  }
  0xdb   : > { %v1552_v13 = vmul.f32 %v1531_v45, %v7094_v54  ;;  %v1999_v45 = vor.u32 %v1998_v52, %v1995_v48  ;;  %v1295_v10 = vsel %vm6123_vm5, %v6255_v24, %v6257_v33  ;;  %v7096_v56 = vmax.f32 %v7095_v27, 0.0  ;;  %v7099_v54 = vld [vmem:[#allocation28_spill] sm:$0xff]  ;;  %v7101_v52 = vld [vmem:[#allocation29_spill] sm:$0xff]  ;;  %4845 = vmatpush3.bf16.msra.mxu1 %v5002_v28  ;;  %v7106_v28 = vld [vmem:[#allocation31_spill] sm:$0xff] }
  0xdc   : > { %v1988_v37 = vshll.u32 %v4516_v29, 16  ;;  %v7098_v7 = vmax.f32 %v7097_v26, 0.0  ;;  %v1984_v38 = vrot.slane %v1982_v23, 5  ;;  %v4076_v57 = vcombine.low %v1291_v63, %v1295_v10  ;;  %v5007_v29 = vld [vmem:[%s6892_s1 + $0x100] sm:$0xff]   ;;  %4846 = vmatprep.subr.bf16.mxu1 %v5004_v50 }
  0xdd   : > { %v4509_v41 = vpack.c.bf16 %v1553_v12, %v1552_v13  ;;  %v1555_v20 = vmul.f32 %v1546_v47, %v7096_v56  ;;  %v1981_v12 = vrot.slane %v1979_v39, 4  ;;  %v2000_v24 = vrot.slane %v1999_v45, 4  ;;  %v2323_v22 = vpop.permute.xlu0 %2322  ;;  %v7104_v45 = vld [vmem:[#allocation30_spill] sm:$0xff]  ;;  %4828 = vmatprep.subr.bf16.mxu0 %v5007_v29 }
  0xde   : > { %v1554_v35 = vmul.f32 %v1541_v55, %v7098_v7  ;;  %v1990_v6 = vrot.slane %v1988_v37, 5  ;;  %v2345_v47 = vrot.slane %v2319_v49, 6  ;;  %v2344_v55 = vrot.slane %v2315_v30, 6  ;;  %4787 = vmatmul.mubr.bf16.gmra.mxu0 %v4076_v57 }
  0xdf   : > { %4810 = vmatprep.mubr.bf16.mxu1 %v4509_v41  ;;  %v1985_v21 = vor.u32 %v1984_v38, %v1981_v12  ;;  %v1963_v17 = vsel %vm6005_vm2, %v1958_v18, %v1962_v1  ;;  %v1977_v63 = vsel %vm6005_vm2, %v1972_v51, %v1976_v58  ;;  %v2005_v0 = vsel %vm6005_vm2, %v2000_v24, %v2004_v59  ;;  %v2327_v1 = vpop.permute.xlu1 %2326 }
  0xe0   : > { %v4510_v33 = vpack.c.bf16 %v1555_v20, %v1554_v35  ;;  %v7100_v13 = vmax.f32 %v7099_v54, 0.0  ;;  %v7102_v39 = vmax.f32 %v7101_v52, 0.0  ;;  %v7103_v37 = vmax.f32 %v5699_v53, 0.0  ;;  %v5009_v53 = vld [vmem:[%s6892_s1 + $0x1b8] sm:$0xff]   ;;  %4829 = vmatpush3.bf16.msra.mxu0 %v5007_v29  ;;  %4847 = vmatpush3.bf16.msra.mxu1 %v5004_v50  ;;  %v5008_v50 = vld [vmem:[%s6892_s1 + $0x148] sm:$0xff]  }
  0xe1   : > { %v1986_v18 = vrot.slane %v1985_v21, 4  ;;  %v7105_v58 = vmax.f32 %v7104_v45, 0.0  ;;  %v4185_v10 = vcombine.low %v1963_v17, %v1977_v63  ;;  %v2347_v27 = vrot.slane %v2327_v1, 6  ;;  %v7108_v21 = vld [vmem:[#allocation32_spill] sm:$0xff]  ;;  %4862 = vmatprep.subr.bf16.mxu0 %v5009_v53  ;;  %4848 = vmatprep.subr.bf16.mxu1 %v5006_v15 }
  0xe2   : > { %v2362_v48 = vmul.f32 %v2345_v47, %v7100_v13  ;;  %v2363_v23 = vmul.f32 %v2345_v47, %v7102_v39  ;;  %v2360_v41 = vmul.f32 %v2344_v55, %v7103_v37  ;;  %4811 = vmatmul.mubr.bf16.gmra.mxu1 %v4510_v33  ;;  %v2346_v26 = vrot.slane %v2323_v22, 6  ;;  %v1849_v47 = vpop.permute.xlu0 %1848  ;;  %v7110_v13 = vld [vmem:[#allocation33_spill] sm:$0xff] }
  0xe3   : > { %v2361_v51 = vmul.f32 %v2344_v55, %v7105_v58  ;;  %v1991_v7 = vsel %vm6005_vm2, %v1986_v18, %v1990_v6  ;;  %4830 = vmatprep.mubr.bf16.mxu0 %v4185_v10  ;;  %v7107_v49 = vmax.f32 %v7106_v28, 0.0  ;;  %v1853_v6 = vpop.permute.xlu1 %1852  ;;  %v7109_v17 = vmax.f32 %v7108_v21, 0.0  ;;  %v5011_v22 = vld [vmem:[%s6892_s1 + $0x1b0] sm:$0xff]   ;;  %v7114_v10 = vld [vmem:[#allocation35_spill] sm:$0xff]  ;;  %v7120_v21 = vld [vmem:[#allocation38_spill] sm:$0xff] }
  0xe4   : > { %v4529_v59 = vpack.c.bf16 %v2362_v48, %v2362_v48  ;;  %v4530_v56 = vpack.c.bf16 %v2363_v23, %v2363_v23  ;;  %v4527_v20 = vpack.c.bf16 %v2360_v41, %v2360_v41  ;;  %v4186_v38 = vcombine.low %v1991_v7, %v2005_v0  ;;  %v7112_v0 = vld [vmem:[#allocation34_spill] sm:$0xff]  ;;  %v7118_v7 = vld [vmem:[#allocation37_spill] sm:$0xff]  ;;  %4849 = vmatpush3.bf16.msra.mxu1 %v5006_v15 }
  0xe5   : > { %v4528_v35 = vpack.c.bf16 %v2361_v51, %v2361_v51  ;;  %v2366_v30 = vmul.f32 %v2347_v27, %v7107_v49  ;;  %v2367_v63 = vmul.f32 %v2347_v27, %v7109_v17  ;;  %v7111_v48 = vmax.f32 %v7110_v13, 0.0  ;;  %4850 = vmatprep.subr.bf16.mxu1 %v5008_v50 }
  0xe6   : > { %v6356_v57 = vrot.slane %v4529_v59, 9  ;;  %v6358_v24 = vrot.slane %v4530_v56, 5  ;;  %v6360_v33 = vrot.slane %v4527_v20, 9  ;;  %v7113_v39 = vmax.f32 %v7112_v0, 0.0  ;;  %v7116_v56 = vld [vmem:[#allocation36_spill] sm:$0xff]  ;;  %4831 = vmatmul.mubr.bf16.vlgmr.msra.gmra.mxu0 %v4186_v38 }
  0xe7   : > { %v6362_v55 = vrot.slane %v4528_v35, 5  ;;  %v4533_v54 = vpack.c.bf16 %v2366_v30, %v2366_v30  ;;  %v2364_v52 = vmul.f32 %v2346_v26, %v7111_v48  ;;  %v1867_v37 = vrot.slane %v1853_v6, 7  ;;  %v1861_v49 = vpop.permute.xlu1 %1860  ;;  %v6390_v30 = vpop.permute.xlu0 %1856  ;;  %4863 = vmatpush3.bf16.msra.mxu0 %v5009_v53  ;;  %v5013_v38 = vld [vmem:[%s6892_s1 + $0x1a8] sm:$0xff]   ;;  %v5010_v53 = vld [vmem:[%s6892_s1 + $0x140] sm:$0xff]  }
  0xe8   : > { %v2365_v23 = vmul.f32 %v2346_v26, %v7113_v39  ;;  %v1866_v41 = vrot.slane %v1849_v47, 7  ;;  %v2439_v1 = vsel %vm6123_vm5, %v6356_v57, %v6358_v24  ;;  %v4534_v18 = vpack.c.bf16 %v2367_v63, %v2367_v63  ;;  %4864 = vmatprep.subr.bf16.mxu0 %v5011_v22  ;;  %v7122_v39 = vld [vmem:[#allocation39_spill] sm:$0xff]  ;;  %4851 = vmatpush3.bf16.msra.mxu1 %v5008_v50  ;;  %v7128_v24 = vld [vmem:[#allocation42_spill] sm:$0xff] }
  0xe9   : > { %v4240_v45 = vrot.slane %v4533_v54, 9  ;;  %v4531_v29 = vpack.c.bf16 %v2364_v52, %v2364_v52  ;;  %v2435_v58 = vsel %vm6123_vm5, %v6360_v33, %v6362_v55  ;;  %v7115_v27 = vmax.f32 %v7114_v10, 0.0  ;;  %4852 = vmatprep.subr.bf16.mxu1 %v5010_v53 }
  0xea   : > { %v4532_v51 = vpack.c.bf16 %v2365_v23, %v2365_v23  ;;  %v7117_v20 = vmax.f32 %v7116_v56, 0.0  ;;  %v7119_v35 = vmax.f32 %v7118_v7, 0.0  ;;  %v2446_v6 = vrot.slane %v4534_v18, 5 }
  0xeb   : > { %v1888_v59 = vmul.f32 %v1867_v37, %v7115_v27  ;;  %v4239_v47 = vrot.slane %v4531_v29, 9  ;;  %v7121_v17 = vmax.f32 %v7120_v21, 0.0  ;;  %v1869_v33 = vrot.slane %v1861_v49, 7  ;;  %4865 = vmatpush3.bf16.msra.mxu0 %v5011_v22  ;;  %v5012_v22 = vld [vmem:[%s6892_s1 + $0x1f8] sm:$0xff]  }
  0xec   : > { %v1889_v26 = vmul.f32 %v1867_v37, %v7117_v20  ;;  %v1886_v28 = vmul.f32 %v1866_v41, %v7119_v35  ;;  %v2442_v55 = vrot.slane %v4532_v51, 5  ;;  %v2447_v52 = vsel %vm6123_vm5, %v4240_v45, %v2446_v6  ;;  %v7124_v37 = vld [vmem:[#allocation40_spill] sm:$0xff]  ;;  %v2335_v45 = vpop.permute.xlu1 %2334  ;;  %4866 = vmatprep.subr.bf16.mxu0 %v5013_v38  ;;  %4853 = vmatpush3.bf16.msra.mxu1 %v5010_v53  ;;  %v5014_v53 = vld [vmem:[%s6892_s1 + $0x1f0] sm:$0xff]  }
  0xed   : > { %v1887_v63 = vmul.f32 %v1866_v41, %v7121_v17  ;;  %v4521_v54 = vpack.c.bf16 %v1888_v59, %v1888_v59  ;;  %v7123_v23 = vmax.f32 %v7122_v39, 0.0  ;;  %v7125_v41 = vmax.f32 %v7124_v37, 0.0  ;;  %v6410_v59 = vpop.permute.xlu0 %2330  ;;  %4886 = vmatprep.subr.bf16.mxu1 %v5012_v22 }
  0xee   : > { %v4522_v13 = vpack.c.bf16 %v1889_v26, %v1889_v26  ;;  %v4519_v48 = vpack.c.bf16 %v1886_v28, %v1886_v28  ;;  %v2443_v29 = vsel %vm6123_vm5, %v4239_v47, %v2442_v55  ;;  %v5015_v47 = vld [vmem:[%s6892_s1 + $0x1a0] sm:$0xff]   ;;  %v1868_v50 = vrot.slane %v6390_v30, 7 }
  0xef   : > { %v4520_v0 = vpack.c.bf16 %v1887_v63, %v1887_v63  ;;  %v1892_v15 = vmul.f32 %v1869_v33, %v7123_v23  ;;  %v1893_v18 = vmul.f32 %v1869_v33, %v7125_v41  ;;  %v2021_v51 = vshrl.u32 %v4521_v54, 16  ;;  %4867 = vmatpush3.bf16.msra.mxu0 %v5013_v38  ;;  %v7130_v38 = vld [vmem:[#allocation43_spill] sm:$0xff] }
  0xf0   : > { %v2024_v10 = vshll.u32 %v4521_v54, 16  ;;  %v6408_v27 = vshll.u32 %v4522_v13, 16  ;;  %v4262_v56 = vcombine.low %v2443_v29, %v2447_v52  ;;  %v2007_v20 = vshrl.u32 %v4519_v48, 16  ;;  %v7126_v29 = vld [vmem:[#allocation41_spill] sm:$0xff]  ;;  %4868 = vmatprep.subr.bf16.mxu0 %v5015_v47 }
  0xf1   : > { %v2010_v26 = vshll.u32 %v4519_v48, 16  ;;  %v6412_v7 = vshll.u32 %v4520_v0, 16  ;;  %v2023_v35 = vrot.slane %v2021_v51, 4  ;;  %v4525_v6 = vpack.c.bf16 %v1892_v15, %v1892_v15  ;;  %v2343_v48 = vpop.permute.xlu1 %2342  ;;  %v2339_v52 = vpop.permute.xlu0 %2338 }
  0xf2   : > { %v2026_v28 = vrot.slane %v2024_v10, 5  ;;  %v2032_v49 = vrot.slane %v6408_v27, 5  ;;  %v2009_v21 = vrot.slane %v2007_v20, 4  ;;  %v4526_v33 = vpack.c.bf16 %v1893_v18, %v1893_v18  ;;  %v5017_v10 = vld [vmem:[%s6892_s1 + $0x198] sm:$0xff]  }
  0xf3   : > { %v2012_v17 = vrot.slane %v2010_v26, 5  ;;  %v2018_v63 = vrot.slane %v6412_v7, 5  ;;  %v2049_v54 = vshrl.u32 %v4525_v6, 16  ;;  %v2052_v13 = vshll.u32 %v4525_v6, 16  ;;  %v7132_v6 = vld [vmem:[#allocation44_spill] sm:$0xff]  ;;  %4869 = vmatpush3.bf16.msra.mxu0 %v5015_v47  ;;  %v5023_v7 = vld [vmem:[%s6892_s1 + $0x180] sm:$0xff]  }
  0xf4   : > { %v2027_v55 = vor.u32 %v2026_v28, %v2023_v35  ;;  %v6423_v39 = vshll.u32 %v4526_v33, 16  ;;  %v4261_v23 = vcombine.low %v2435_v58, %v2439_v1  ;;  %v2349_v15 = vrot.slane %v2335_v45, 6  ;;  %4870 = vmatprep.subr.bf16.mxu0 %v5017_v10  ;;  %v5016_v47 = vld [vmem:[%s6892_s1 + $0x1e8] sm:$0xff]  }
  0xf5   : > { %v2013_v0 = vor.u32 %v2012_v17, %v2009_v21  ;;  %v2051_v41 = vrot.slane %v2049_v54, 4  ;;  %v2054_v18 = vrot.slane %v2052_v13, 5  ;;  %v7127_v51 = vmax.f32 %v7126_v29, 0.0  ;;  %v6450_v54 = vpop.permute.xlu0 %3000 }
  0xf6   : > { %v6430_v37 = vrot.slane %v2027_v55, 4  ;;  %v2060_v57 = vrot.slane %v6423_v39, 5  ;;  %v7129_v1 = vmax.f32 %v7128_v24, 0.0  ;;  %4854 = vmatprep.mubr.bf16.mxu1 %v4261_v23  ;;  %v7131_v45 = vmax.f32 %v7130_v38, 0.0  ;;  %v3005_v55 = vpop.permute.xlu1 %3004 }
  0xf7   : > { %v1890_v30 = vmul.f32 %v1868_v50, %v7127_v51  ;;  %v6437_v20 = vrot.slane %v2013_v0, 4  ;;  %v2055_v35 = vor.u32 %v2054_v18, %v2051_v41  ;;  %v7133_v21 = vmax.f32 %v7132_v6, 0.0  ;;  %4855 = vmatmul.mubr.bf16.vlgmr.msra.gmra.mxu1 %v4262_v56  ;;  %4871 = vmatpush3.bf16.msra.mxu0 %v5017_v10 }
  0xf8   : > { %v1891_v58 = vmul.f32 %v1868_v50, %v7129_v1  ;;  %v2370_v26 = vmul.f32 %v2349_v15, %v7131_v45  ;;  %v2348_v33 = vrot.slane %v6410_v59, 6  ;;  %v2351_v0 = vrot.slane %v2343_v48, 6  ;;  %4887 = vmatpush3.bf16.msra.mxu1 %v5012_v22  ;;  %v7134_v59 = vld [vmem:[#allocation45_spill] sm:$0xff] }
  0xf9   : > { %v4523_v28 = vpack.c.bf16 %v1890_v30, %v1890_v30  ;;  %v2371_v17 = vmul.f32 %v2349_v15, %v7133_v21  ;;  %v2350_v23 = vrot.slane %v2339_v52, 6  ;;  %v6452_v29 = vrot.slane %v2055_v35, 4  ;;  %4888 = vmatprep.subr.bf16.mxu1 %v5014_v53  ;;  %v5019_v22 = vld [vmem:[%s6892_s1 + $0x190] sm:$0xff]  }
  0xfa   : > { %v4524_v13 = vpack.c.bf16 %v1891_v58, %v1891_v58  ;;  %v4537_v50 = vpack.c.bf16 %v2370_v26, %v2370_v26  ;;  %v7135_v30 = vmax.f32 %v7134_v59, 0.0  ;;  %v7136_v58 = vmax.f32 %v5830_v3, 0.0  ;;  %v3013_v35 = vpop.permute.xlu1 %3012  ;;  %v7141_v59 = vld [vmem:[#allocation47_spill] sm:$0xff]  ;;  %4872 = vmatprep.subr.bf16.mxu0 %v5019_v22 }
  0xfb   : > { %v2035_v51 = vshrl.u32 %v4523_v28, 16  ;;  %v2038_v24 = vshll.u32 %v4523_v28, 16  ;;  %v4538_v41 = vpack.c.bf16 %v2371_v17, %v2371_v17  ;;  %v7137_v45 = vmax.f32 %v5863_v60, 0.0  ;;  %v6472_v28 = vpop.permute.xlu0 %3008  ;;  %4873 = vmatpush3.bf16.msra.mxu0 %v5019_v22 }
  0xfc   : > { %v6454_v18 = vshll.u32 %v4524_v13, 16  ;;  %v6456_v15 = vrot.slane %v4537_v50, 9  ;;  %v2368_v1 = vmul.f32 %v2348_v33, %v7135_v30  ;;  %v2369_v56 = vmul.f32 %v2348_v33, %v7136_v58  ;;  %4889 = vmatpush3.bf16.msra.mxu1 %v5014_v53  ;;  %v5021_v58 = vld [vmem:[%s6892_s1 + $0x188] sm:$0xff]  }
  0xfd   : > { %v2037_v48 = vrot.slane %v2035_v51, 4  ;;  %v2040_v52 = vrot.slane %v2038_v24, 5  ;;  %v6468_v38 = vrot.slane %v4538_v41, 5  ;;  %v2374_v26 = vmul.f32 %v2351_v0, %v7137_v45  ;;  %v7139_v51 = vld [vmem:[#allocation46_spill] sm:$0xff]  ;;  %4890 = vmatprep.subr.bf16.mxu1 %v5016_v47  ;;  %4874 = vmatprep.subr.bf16.mxu0 %v5021_v58 }
  0xfe   : > { %v2046_v3 = vrot.slane %v6454_v18, 5  ;;  %v4535_v6 = vpack.c.bf16 %v2368_v1, %v2368_v1  ;;  %v4536_v21 = vpack.c.bf16 %v2369_v56, %v2369_v56  ;;  %v7138_v17 = vmax.f32 %v5866_v14, 0.0  ;;  %v7160_v18 = vld [vmem:[#allocation56_spill] sm:$0xff] }
  0xff   : > { %v2041_v13 = vor.u32 %v2040_v52, %v2037_v48  ;;  %v4541_v50 = vpack.c.bf16 %v2374_v26, %v2374_v26  ;;  %v7140_v24 = vmax.f32 %v7139_v51, 0.0  ;;  %v7142_v30 = vmax.f32 %v7141_v59, 0.0  ;;  %v6495_v52 = vpop.permute.xlu1 %2683  ;;  %v6497_v26 = vpop.permute.xlu0 %2678  ;;  %4875 = vmatpush3.bf16.msra.mxu0 %v5021_v58 }
 0x100   : > { %v2375_v33 = vmul.f32 %v2351_v0, %v7138_v17  ;;  %v6484_v45 = vrot.slane %v4535_v6, 9  ;;  %v6486_v1 = vrot.slane %v4536_v21, 5  ;;  %v3031_v10 = vrot.slane %v3005_v55, 7  ;;  %v5018_v0 = vld [vmem:[%s6892_s1 + $0x1e0] sm:$0xff]   ;;  %v7143_v21 = vld [vmem:[#allocation48_spill] sm:$0xff]  ;;  %4891 = vmatpush3.bf16.msra.mxu1 %v5016_v47  ;;  %4876 = vmatprep.subr.bf16.mxu0 %v5023_v7 }
 0x101   : > { %v2372_v41 = vmul.f32 %v2350_v23, %v7140_v24  ;;  %v2373_v60 = vmul.f32 %v2350_v23, %v7142_v30  ;;  %v6491_v56 = vrot.slane %v2041_v13, 4  ;;  %v6493_v23 = vrot.slane %v4541_v50, 9  ;;  %4892 = vmatprep.subr.bf16.mxu1 %v5018_v0 }
 0x102   : > { %v4542_v14 = vpack.c.bf16 %v2375_v33, %v2375_v33  ;;  %v7144_v17 = vmax.f32 %v7143_v21, 0.0  ;;  %v7145_v33 = vld [vmem:[#allocation49_spill] sm:$0xff]  ;;  %v3030_v59 = vrot.slane %v6450_v54, 7  ;;  %v2033_v30 = vsel %vm6005_vm2, %v6430_v37, %v2032_v49  ;;  %v5020_v37 = vld [vmem:[%s6892_s1 + $0x1d8] sm:$0xff]  }
 0x103   : > { %v4539_v53 = vpack.c.bf16 %v2372_v41, %v2372_v41  ;;  %v4540_v48 = vpack.c.bf16 %v2373_v60, %v2373_v60  ;;  %v7146_v51 = vmax.f32 %v7145_v33, 0.0  ;;  %v2019_v41 = vsel %vm6005_vm2, %v6437_v20, %v2018_v63  ;;  %v7147_v60 = vld [vmem:[#allocation50_spill] sm:$0xff]  ;;  %v6535_v21 = vpop.permute.xlu1 %2693  ;;  %4877 = vmatpush3.bf16.msra.mxu0 %v5023_v7  ;;  %v5024_v7 = vld [vmem:[%s6892_s1 + $0x1c8] sm:$0xff]  }
 0x104   : > { %v6499_v6 = vrot.slane %v4542_v14, 5  ;;  %v3048_v55 = vmul.f32 %v3031_v10, %v7144_v17  ;;  %v7148_v14 = vmax.f32 %v7147_v60, 0.0  ;;  %v4187_v63 = vcombine.low %v2019_v41, %v2033_v30  ;;  %4893 = vmatpush3.bf16.msra.mxu1 %v5018_v0 }
 0x105   : > { %v3049_v24 = vmul.f32 %v3031_v10, %v7146_v51  ;;  %v6506_v13 = vrot.slane %v4539_v53, 9  ;;  %v6508_v50 = vrot.slane %v4540_v48, 5  ;;  %v7149_v53 = vld [vmem:[#allocation51_spill] sm:$0xff]  ;;  %v3033_v27 = vrot.slane %v3013_v35, 7  ;;  %v6539_v35 = vpop.permute.xlu0 %2688  ;;  %4894 = vmatprep.subr.bf16.mxu1 %v5020_v37 }
 0x106   : > { %v4549_v54 = vpack.c.bf16 %v3048_v55, %v3048_v55  ;;  %v3046_v10 = vmul.f32 %v3030_v59, %v7148_v14  ;;  %v7150_v47 = vmax.f32 %v7149_v53, 0.0  ;;  %v3032_v20 = vrot.slane %v6472_v28, 7  ;;  %4834 = vmatprep.mubr.bf16.mxu0 %v4187_v63 }
 0x107   : > { %v4550_v22 = vpack.c.bf16 %v3049_v24, %v3049_v24  ;;  %v2451_v49 = vsel %vm6123_vm5, %v6484_v45, %v6486_v1  ;;  %v7151_v24 = vld [vmem:[#allocation52_spill] sm:$0xff]  ;;  %v7153_v45 = vld [vmem:[#allocation53_spill] sm:$0xff]  ;;  %v7155_v60 = vmax.f32 %v5903_v25, 0.0  ;;  %v2459_v39 = vsel %vm6123_vm5, %v6506_v13, %v6508_v50 }
 0x108   : > { %v3047_v48 = vmul.f32 %v3030_v59, %v7150_v47  ;;  %v3133_v17 = vshrl.u32 %v4549_v54, 16  ;;  %v3136_v55 = vshll.u32 %v4549_v54, 16  ;;  %v4547_v51 = vpack.c.bf16 %v3046_v10, %v3046_v10  ;;  %v6550_v54 = vld [vmem:[%s6892_s1 + $0x238] sm:$0xff]   ;;  %v5022_v25 = vld [vmem:[%s6892_s1 + $0x1d0] sm:$0xff]   ;;  %4895 = vmatpush3.bf16.msra.mxu1 %v5020_v37 }
 0x109   : > { %v6537_v33 = vshll.u32 %v4550_v22, 16  ;;  %v7152_v59 = vmax.f32 %v7151_v24, 0.0  ;;  %v7154_v1 = vmax.f32 %v7153_v45, 0.0  ;;  %v3050_v14 = vmul.f32 %v3032_v20, %v7155_v60  ;;  %v6558_v24 = vpop.permute.xlu1 %3020  ;;  %4910 = vmatprep.subr.bf16.mxu0 %v6550_v54  ;;  %v3017_v34 = vpop.permute.xlu0 %3016  ;;  %4896 = vmatprep.subr.bf16.mxu1 %v5022_v25 }
 0x10a   : > { %v4548_v28 = vpack.c.bf16 %v3047_v48, %v3047_v48  ;;  %v3135_v22 = vrot.slane %v3133_v17, 4  ;;  %v3138_v58 = vrot.slane %v3136_v55, 5  ;;  %v3119_v53 = vshrl.u32 %v4547_v51, 16  ;;  %v7156_v55 = vld [vmem:[#allocation54_spill] sm:$0xff] }
 0x10b   : > { %v3052_v41 = vmul.f32 %v3033_v27, %v7152_v59  ;;  %v3053_v30 = vmul.f32 %v3033_v27, %v7154_v1  ;;  %v3144_v10 = vrot.slane %v6537_v33, 5  ;;  %v3122_v47 = vshll.u32 %v4547_v51, 16 }
 0x10c   : > { %v6553_v48 = vshll.u32 %v4548_v28, 16  ;;  %v3139_v59 = vor.u32 %v3138_v58, %v3135_v22  ;;  %v3121_v17 = vrot.slane %v3119_v53, 4  ;;  %v7157_v45 = vmax.f32 %v7156_v55, 0.0  ;;  %4897 = vmatpush3.bf16.msra.mxu1 %v5022_v25 }
 0x10d   : > { %v4553_v63 = vpack.c.bf16 %v3052_v41, %v3052_v41  ;;  %v4554_v27 = vpack.c.bf16 %v3053_v30, %v3053_v30  ;;  %v4551_v60 = vpack.c.bf16 %v3050_v14, %v3050_v14  ;;  %v3124_v0 = vrot.slane %v3122_v47, 5  ;;  %4898 = vmatprep.subr.bf16.mxu1 %v5024_v7 }
 0x10e   : > { %v3051_v1 = vmul.f32 %v3032_v20, %v7157_v45  ;;  %v3130_v51 = vrot.slane %v6553_v48, 5  ;;  %v3140_v30 = vrot.slane %v3139_v59, 4  ;;  %v2455_v48 = vsel %vm6123_vm5, %v6456_v15, %v6468_v38 }
 0x10f   : > { %v3161_v28 = vshrl.u32 %v4553_v63, 16  ;;  %v3164_v41 = vshll.u32 %v4553_v63, 16  ;;  %v3170_v12 = vshll.u32 %v4554_v27, 16  ;;  %v3147_v32 = vshrl.u32 %v4551_v60, 16 }
 0x110   : > { %v4552_v2 = vpack.c.bf16 %v3051_v1, %v3051_v1  ;;  %v3125_v22 = vor.u32 %v3124_v0, %v3121_v17  ;;  %v3150_v55 = vshll.u32 %v4551_v60, 16  ;;  %v4263_v59 = vcombine.low %v2451_v49, %v2455_v48  ;;  %v3029_v17 = vpop.permute.xlu1 %3028  ;;  %4899 = vmatpush3.bf16.msra.mxu1 %v5024_v7 }
 0x111   : > { %v3163_v58 = vrot.slane %v3161_v28, 4  ;;  %v3166_v53 = vrot.slane %v3164_v41, 5  ;;  %v3172_v20 = vrot.slane %v3170_v12, 5  ;;  %v3149_v14 = vrot.slane %v3147_v32, 4 }
 0x112   : > { %v3156_v47 = vshll.u32 %v4552_v2, 16  ;;  %v3126_v63 = vrot.slane %v3125_v22, 4  ;;  %v3152_v27 = vrot.slane %v3150_v55, 5  ;;  %v2047_v1 = vsel %vm6005_vm2, %v6491_v56, %v2046_v3  ;;  %v7158_v2 = vld [vmem:[#allocation55_spill] sm:$0xff]  ;;  %4858 = vmatprep.mubr.bf16.mxu1 %v4263_v59  ;;  %v3025_v22 = vpop.permute.xlu0 %3024 }
 0x113   : > { %v3167_v37 = vor.u32 %v3166_v53, %v3163_v58  ;;  %v2061_v32 = vsel %vm6005_vm2, %v6452_v29, %v2060_v57  ;;  %v7159_v12 = vmax.f32 %v7158_v2, 0.0  ;;  %v7161_v0 = vmax.f32 %v7160_v18, 0.0  ;;  %v7162_v29 = vld [vmem:[#allocation57_spill] sm:$0xff] }
 0x114   : > { %v3158_v45 = vrot.slane %v3156_v47, 5  ;;  %v3153_v49 = vor.u32 %v3152_v27, %v3149_v14  ;;  %v4188_v60 = vcombine.low %v2047_v1, %v2061_v32  ;;  %v2463_v57 = vsel %vm6123_vm5, %v6493_v23, %v6499_v6  ;;  %v2704_v48 = vpop.permute.xlu1 %2703  ;;  %v7168_v27 = vld [vmem:[#allocation60_spill] sm:$0xff] }
 0x115   : > { %v2717_v15 = vmul.f32 %v6495_v52, %v7159_v12  ;;  %v3168_v38 = vrot.slane %v3167_v37, 4  ;;  %v2716_v28 = vmul.f32 %v6497_v26, %v7161_v0  ;;  %v7163_v3 = vmax.f32 %v7162_v29, 0.0  ;;  %v7164_v52 = vld [vmem:[#allocation58_spill] sm:$0xff]  ;;  %v5026_v26 = vld [vmem:[%s6892_s1 + $0x1c0] sm:$0xff]  }
 0x116   : > { %v7165_v25 = vmax.f32 %v7164_v52, 0.0  ;;  %v3154_v50 = vrot.slane %v3153_v49, 4  ;;  %4835 = vmatmul.mubr.bf16.gmra.mxu0 %v4188_v60  ;;  %v4264_v23 = vcombine.low %v2459_v39, %v2463_v57  ;;  %v3035_v53 = vrot.slane %v6558_v24, 7  ;;  %v7166_v24 = vld [vmem:[#allocation59_spill] sm:$0xff]  ;;  %4900 = vmatprep.subr.bf16.mxu1 %v5026_v26  ;;  %v6629_v43 = vpop.permute.xlu0 %2698  ;;  %v5028_v52 = vld [vmem:[%s6892_s1 + $0x228] sm:$0xff]  }
 0x117   : > { %v2719_v56 = vmul.f32 %v6535_v21, %v7163_v3  ;;  %v3173_v13 = vsel %vm6005_vm2, %v3168_v38, %v3172_v20  ;;  %v4543_v58 = vpack.c.bf16 %v2717_v15, %v2716_v28  ;;  %v3034_v21 = vrot.slane %v3017_v34, 7  ;;  %4901 = vmatpush3.bf16.msra.mxu1 %v5026_v26 }
 0x118   : > { %v2718_v41 = vmul.f32 %v6539_v35, %v7165_v25  ;;  %v3131_v35 = vsel %vm6005_vm2, %v3126_v63, %v3130_v51  ;;  %v3159_v55 = vsel %vm6005_vm2, %v3154_v50, %v3158_v45  ;;  %4859 = vmatmul.mubr.bf16.gmra.mxu1 %v4264_v23  ;;  %v3145_v20 = vsel %vm6005_vm2, %v3140_v30, %v3144_v10  ;;  %v6641_v18 = vpop.permute.xlu1 %2713 }
 0x119   : > { %4878 = vmatprep.mubr.bf16.mxu0 %v4543_v58  ;;  %v3037_v14 = vrot.slane %v3029_v17, 7  ;;  %v3036_v47 = vrot.slane %v3025_v22, 7  ;;  %v4374_v37 = vcombine.low %v3159_v55, %v3173_v13  ;;  %v7167_v34 = vmax.f32 %v7166_v24, 0.0  ;;  %4934 = vmatprep.subr.bf16.mxu1 %v6550_v54 }
 0x11a   : > { %v4544_v6 = vpack.c.bf16 %v2719_v56, %v2718_v41  ;;  %v7169_v59 = vmax.f32 %v7168_v27, 0.0  ;;  %v3054_v63 = vmul.f32 %v3034_v21, %v2990_v46  ;;  %v3055_v33 = vmul.f32 %v3034_v21, %v2991_v62  ;;  %v2709_v13 = vpop.permute.xlu0 %2708 }
 0x11b   : > { %v3056_v7 = vmul.f32 %v3035_v53, %v7167_v34  ;;  %v4373_v45 = vcombine.low %v3131_v35, %v3145_v20  ;;  %v3060_v10 = vmul.f32 %v3037_v14, %v2996_v11  ;;  %v3061_v30 = vmul.f32 %v3037_v14, %v2997_v40  ;;  %v4387_v35 = vld [vmem:[%s5185_s12 + $0x18] sm:$0xe] }
 0x11c   : > { %v3057_v51 = vmul.f32 %v3035_v53, %v7169_v59  ;;  %v4555_v32 = vpack.c.bf16 %v3054_v63, %v3054_v63  ;;  %v3058_v2 = vmul.f32 %v3036_v47, %v2994_v61  ;;  %v4556_v46 = vpack.c.bf16 %v3055_v33, %v3055_v33  ;;  %v6657_v53 = vld [vmem:[%s6894_s3] ss:$0 sm:$0xff]  ;;  %v3487_v34 = vpop.permute.xlu1 %3486 }
 0x11d   : > { %v4557_v17 = vpack.c.bf16 %v3056_v7, %v3056_v7  ;;  %4902 = vmatprep.mubr.bf16.mxu1 %v4373_v45  ;;  %v4561_v44 = vpack.c.bf16 %v3060_v10, %v3060_v10  ;;  %v4562_v62 = vpack.c.bf16 %v3061_v30, %v3061_v30  ;;  %v7170_v12 = vmax.f32 %v6212_v19, 0.0  ;;  %v6674_v59 = vld [vmem:[%s6893_s2] ss:$0 sm:$0xff]  ;;  %v4385_v10 = vld [vmem:[%s5185_s12 + $0x10] sm:$0xe] }
 0x11e   : > { %v4558_v1 = vpack.c.bf16 %v3057_v51, %v3057_v51  ;;  %v3175_v8 = vshrl.u32 %v4555_v32, 16  ;;  %v3178_v61 = vshll.u32 %v4555_v32, 16  ;;  %v6639_v38 = vshll.u32 %v4556_v46, 16  ;;  %4879 = vmatmul.mubr.bf16.vlgmr.msra.gmra.mxu0 %v4544_v6 }
 0x11f   : > { %v3059_v5 = vmul.f32 %v3036_v47, %v7170_v12  ;;  %v3189_v11 = vshrl.u32 %v4557_v17, 16  ;;  %v3192_v40 = vshll.u32 %v4557_v17, 16  ;;  %v3217_v49 = vshrl.u32 %v4561_v44, 16  ;;  %4911 = vmatpush3.bf16.msra.mxu0 %v6550_v54  ;;  %v4388_v47 = vld [vmem:[%s5185_s12 + $0x1c] sm:$0x1] }
 0x120   : > { %v6636_v15 = vshll.u32 %v4558_v1, 16  ;;  %v3220_v60 = vshll.u32 %v4561_v44, 16  ;;  %v3177_v39 = vrot.slane %v3175_v8, 4  ;;  %v3180_v57 = vrot.slane %v3178_v61, 5  ;;  %4912 = vmatprep.subr.bf16.mxu0 %v5027_v31  ;;  %4903 = vmatmul.mubr.bf16.vlgmr.msra.gmra.mxu1 %v4374_v37 }
 0x121   : > { %v3191_v19 = vrot.slane %v3189_v11, 4  ;;  %v3194_v0 = vrot.slane %v3192_v40, 5  ;;  %v3186_v29 = vrot.slane %v6639_v38, 5  ;;  %v3219_v3 = vrot.slane %v3217_v49, 4  ;;  %4942 = vmatpush3.bf16.msra.mxu1 %v6550_v54  ;;  %v5030_v40 = vld [vmem:[%s6892_s1 + $0x218] sm:$0xff]  }
 0x122   : > { %v3200_v28 = vrot.slane %v6636_v15, 5  ;;  %v3222_v56 = vrot.slane %v3220_v60, 5  ;;  %v6649_v41 = vshll.u32 %v4562_v62, 16  ;;  %v4559_v26 = vpack.c.bf16 %v3058_v2, %v3058_v2  ;;  %4935 = vmatprep.subr.bf16.mxu1 %v5027_v31  ;;  %v4386_v2 = vld [vmem:[%s5185_s12 + $0x14] sm:$0x1] }
 0x123   : > { %v3195_v25 = vor.u32 %v3194_v0, %v3191_v19  ;;  %v4560_v22 = vpack.c.bf16 %v3059_v5, %v3059_v5  ;;  %v3181_v50 = vor.u32 %v3180_v57, %v3177_v39  ;;  %v7171_v23 = vmax.f32 %v6216_v4, 0.0  ;;  %4913 = vmatpush3.bf16.msra.mxu0 %v5027_v31  ;;  %v4390_v15 = vld [vmem:[%s5185_s12 + $0x24] sm:$0x1] }
 0x124   : > { %v3223_v58 = vor.u32 %v3222_v56, %v3219_v3  ;;  %v2664_v21 = vadd.f32 %v6657_v53, %v6219_v16  ;;  %v3228_v20 = vrot.slane %v6649_v41, 5  ;;  %v3203_v54 = vshrl.u32 %v4559_v26, 16  ;;  %4914 = vmatprep.subr.bf16.mxu0 %v5028_v52  ;;  %v5029_v16 = vld [vmem:[%s6892_s1 + $0x220] sm:$0xff]   ;;  %v4391_v3 = vld [vmem:[%s5185_s12 + $0x28] sm:$0xe] }
 0x125   : > { %v2721_v6 = vmul.f32 %v2704_v48, %v7171_v23  ;;  %v3196_v55 = vrot.slane %v3195_v25, 4  ;;  %v3206_v14 = vshll.u32 %v4559_v26, 16  ;;  %v3182_v4 = vrot.slane %v3181_v50, 4  ;;  %4943 = vmatpush3.bf16.msra.mxu1 %v5027_v31 }
 0x126   : > { %v6664_v48 = vrot.slane %v3223_v58, 4  ;;  %v6666_v37 = vshll.u32 %v4560_v22, 16  ;;  %v2672_v24 = vmax.f32 %v2664_v21, 0.0  ;;  %v3205_v7 = vrot.slane %v3203_v54, 4  ;;  %4936 = vmatprep.subr.bf16.mxu1 %v5028_v52  ;;  %v4392_v22 = vld [vmem:[%s5185_s12 + $0x2c] sm:$0x1] }
 0x127   : > { %v3208_v27 = vrot.slane %v3206_v14, 5  ;;  %v7172_v51 = vunpack.c.h.bf16 %v6315_v42  ;;  %v7173_v33 = vunpack.c.l.bf16 %v6315_v42  ;;  %v3410_v1 = vunpack.c.l.bf16 %v4387_v35  ;;  %4915 = vmatpush3.bf16.msra.mxu0 %v5028_v52  ;;  %v3483_v42 = vpop.permute.xlu0 %3482 }
 0x128   : > { %v3214_v30 = vrot.slane %v6666_v37, 5  ;;  %v2720_v17 = vmul.f32 %v6629_v43, %v2672_v24  ;;  %v3411_v32 = vunpack.c.l.bf16 %v4388_v47  ;;  %v3513_v12 = vrot.slane %v3487_v34, 6  ;;  %4916 = vmatprep.subr.bf16.mxu0 %v5029_v16 }
 0x129   : > { %v2659_v63 = vmul.f32 %v6674_v59, %v7172_v51  ;;  %v2658_v45 = vmul.f32 %v6674_v59, %v7173_v33  ;;  %v3209_v46 = vor.u32 %v3208_v27, %v3205_v7  ;;  %v3434_v31 = vmul.f32 %v6674_v59, %v3410_v1  ;;  %4944 = vmatpush3.bf16.msra.mxu1 %v5028_v52 }
 0x12a   : > { %v4545_v5 = vpack.c.bf16 %v2721_v6, %v2720_v17  ;;  %v3435_v11 = vmul.f32 %v6674_v59, %v3411_v32  ;;  %v3408_v43 = vunpack.c.l.bf16 %v4385_v10  ;;  %v3409_v60 = vunpack.c.l.bf16 %v4386_v2  ;;  %4937 = vmatprep.subr.bf16.mxu1 %v5029_v16  ;;  %v4389_v6 = vld [vmem:[%s5185_s12 + $0x20] sm:$0xe]  ;;  %v5032_v32 = vld [vmem:[%s6892_s1 + $0x208] sm:$0xff]  }
 0x12b   : > { %v2667_v44 = vadd.f32 %v6657_v53, %v2659_v63  ;;  %v2666_v62 = vadd.f32 %v6657_v53, %v2658_v45  ;;  %v6693_v8 = vrot.slane %v3209_v46, 4  ;;  %v3450_v19 = vadd.f32 %v6657_v53, %v3434_v31  ;;  %4917 = vmatpush3.bf16.msra.mxu0 %v5029_v16  ;;  %v3491_v10 = vpop.permute.xlu0 %3490 }
 0x12c   : > { %4882 = vmatprep.mubr.bf16.mxu0 %v4545_v5  ;;  %v3451_v0 = vadd.f32 %v6657_v53, %v3435_v11  ;;  %v3432_v39 = vmul.f32 %v6674_v59, %v3408_v43  ;;  %v3512_v57 = vrot.slane %v3483_v42, 6  ;;  %v3433_v26 = vmul.f32 %v6674_v59, %v3409_v60  ;;  %4918 = vmatprep.subr.bf16.mxu0 %v5030_v40  ;;  %v4395_v11 = vld [vmem:[%s5185_s12 + $0x38] sm:$0xe]  ;;  %v4396_v43 = vld [vmem:[%s5185_s12 + $0x3c] sm:$0x1] }
 0x12d   : > { %v2675_v61 = vmax.f32 %v2667_v44, 0.0  ;;  %v2674_v49 = vmax.f32 %v2666_v62, 0.0  ;;  %v3187_v52 = vsel %vm6005_vm2, %v3182_v4, %v3186_v29  ;;  %v3466_v50 = vmax.f32 %v3450_v19, 0.0  ;;  %v5031_v29 = vld [vmem:[%s6892_s1 + $0x210] sm:$0xff]   ;;  %4945 = vmatpush3.bf16.msra.mxu1 %v5029_v16 }
 0x12e   : > { %v3467_v58 = vmax.f32 %v3451_v0, 0.0  ;;  %v3448_v23 = vadd.f32 %v6657_v53, %v3432_v39  ;;  %v3449_v38 = vadd.f32 %v6657_v53, %v3433_v26  ;;  %v3414_v54 = vunpack.c.l.bf16 %v4391_v3  ;;  %4938 = vmatprep.subr.bf16.mxu1 %v5030_v40  ;;  %v4393_v26 = vld [vmem:[%s5185_s12 + $0x30] sm:$0xe] }
 0x12f   : > { %v2723_v56 = vmul.f32 %v6641_v18, %v2675_v61  ;;  %v2722_v25 = vmul.f32 %v2709_v13, %v2674_v49  ;;  %v3201_v18 = vsel %vm6005_vm2, %v3196_v55, %v3200_v28  ;;  %v3495_v13 = vpop.permute.xlu1 %3494  ;;  %v3530_v14 = vmul.f32 %v3513_v12, %v3466_v50  ;;  %4919 = vmatpush3.bf16.msra.mxu0 %v5030_v40 }
 0x130   : > { %v4375_v35 = vcombine.low %v3187_v52, %v3201_v18  ;;  %v3531_v47 = vmul.f32 %v3513_v12, %v3467_v58  ;;  %v3464_v4 = vmax.f32 %v3448_v23, 0.0  ;;  %v3415_v24 = vunpack.c.l.bf16 %v4392_v22  ;;  %4920 = vmatprep.subr.bf16.mxu0 %v5031_v29  ;;  %v4394_v23 = vld [vmem:[%s5185_s12 + $0x34] sm:$0x1] }
 0x131   : > { %v4546_v21 = vpack.c.bf16 %v2723_v56, %v2722_v25  ;;  %v3465_v34 = vmax.f32 %v3449_v38, 0.0  ;;  %v3438_v28 = vmul.f32 %v6674_v59, %v3414_v54  ;;  %v3515_v55 = vrot.slane %v3495_v13, 6  ;;  %4946 = vmatpush3.bf16.msra.mxu1 %v5030_v40  ;;  %v5033_v56 = vld [vmem:[%s6892_s1 + $0x200] sm:$0xff]  }
 0x132   : > { %4906 = vmatprep.mubr.bf16.mxu1 %v4375_v35  ;;  %v3412_v7 = vunpack.c.l.bf16 %v4389_v6  ;;  %v4565_v27 = vpack.c.bf16 %v3530_v14, %v3530_v14  ;;  %v4566_v51 = vpack.c.bf16 %v3531_v47, %v3531_v47  ;;  %v3528_v63 = vmul.f32 %v3512_v57, %v3464_v4  ;;  %4939 = vmatprep.subr.bf16.mxu1 %v5031_v29  ;;  %v4399_v47 = vld [vmem:[%s5185_s12 + $0x48] sm:$0xe]  ;;  %v4400_v4 = vld [vmem:[%s5185_s12 + $0x4c] sm:$0x1] }
 0x133   : > { %4883 = vmatmul.mubr.bf16.gmra.mxu0 %v4546_v21  ;;  %v3439_v33 = vmul.f32 %v6674_v59, %v3415_v24  ;;  %v3529_v16 = vmul.f32 %v3512_v57, %v3465_v34  ;;  %v3454_v45 = vadd.f32 %v6657_v53, %v3438_v28  ;;  %v3413_v17 = vunpack.c.l.bf16 %v4390_v15  ;;  %v3503_v3 = vpop.permute.xlu1 %3502  ;;  %v3499_v21 = vpop.permute.xlu0 %3498 }
 0x134   : > { %v3436_v1 = vmul.f32 %v6674_v59, %v3412_v7  ;;  %v6724_v2 = vrot.slane %v4565_v27, 9  ;;  %v6726_v46 = vrot.slane %v4566_v51, 5  ;;  %v4563_v44 = vpack.c.bf16 %v3528_v63, %v3528_v63  ;;  %4921 = vmatpush3.bf16.msra.mxu0 %v5031_v29 }
 0x135   : > { %v3455_v62 = vadd.f32 %v6657_v53, %v3439_v33  ;;  %v4564_v12 = vpack.c.bf16 %v3529_v16, %v3529_v16  ;;  %v3470_v42 = vmax.f32 %v3454_v45, 0.0  ;;  %v3437_v5 = vmul.f32 %v6674_v59, %v3413_v17  ;;  %4922 = vmatprep.subr.bf16.mxu0 %v5032_v32  ;;  %4947 = vmatpush3.bf16.msra.mxu1 %v5031_v29 }
 0x136   : > { %v3452_v31 = vadd.f32 %v6657_v53, %v3436_v1  ;;  %v6733_v61 = vrot.slane %v4563_v44, 9  ;;  %v3514_v40 = vrot.slane %v3491_v10, 6  ;;  %v3215_v60 = vsel %vm6005_vm2, %v6693_v8, %v3214_v30  ;;  %4940 = vmatprep.subr.bf16.mxu1 %v5032_v32 }
 0x137   : > { %v3471_v49 = vmax.f32 %v3455_v62, 0.0  ;;  %v6740_v19 = vrot.slane %v4564_v12, 5  ;;  %v3534_v0 = vmul.f32 %v3515_v55, %v3470_v42  ;;  %v3453_v39 = vadd.f32 %v6657_v53, %v3437_v5  ;;  %v4397_v62 = vld [vmem:[%s5185_s12 + $0x40] sm:$0xe] }
 0x138   : > { %v3468_v57 = vmax.f32 %v3452_v31, 0.0  ;;  %v3229_v37 = vsel %vm6005_vm2, %v6664_v48, %v3228_v20  ;;  %v3418_v30 = vunpack.c.l.bf16 %v4395_v11  ;;  %v3419_v8 = vunpack.c.l.bf16 %v4396_v43  ;;  %4923 = vmatpush3.bf16.msra.mxu0 %v5032_v32  ;;  %v4398_v11 = vld [vmem:[%s5185_s12 + $0x44] sm:$0x1]  ;;  %s3972_s12 = sshll.u32 %s5106_s22, 3 }
 0x139   : > { %v3535_v25 = vmul.f32 %v3515_v55, %v3471_v49  ;;  %v4569_v52 = vpack.c.bf16 %v3534_v0, %v3534_v0  ;;  %v3469_v22 = vmax.f32 %v3453_v39, 0.0  ;;  %v4376_v58 = vcombine.low %v3215_v60, %v3229_v37  ;;  %4924 = vmatprep.subr.bf16.mxu0 %v5033_v56  ;;  %4948 = vmatpush3.bf16.msra.mxu1 %v5032_v32  ;;  %v3511_v55 = vpop.permute.xlu1 %3510  ;;  %p6842_p4 = scmp.lt.s32.totalorder %s3972_s12, 15 }
 0x13a   : > { %v3532_v50 = vmul.f32 %v3514_v40, %v3468_v57  ;;  %v3442_v13 = vmul.f32 %v6674_v59, %v3418_v30  ;;  %v3443_v41 = vmul.f32 %v6674_v59, %v3419_v8  ;;  %v3517_v6 = vrot.slane %v3503_v3, 6  ;;  %4941 = vmatprep.subr.bf16.mxu1 %v5033_v56  ;;  %v3507_v3 = vpop.permute.xlu0 %3506 }
 0x13b   : > { %v4570_v18 = vpack.c.bf16 %v3535_v25, %v3535_v25  ;;  %v4428_v9 = vrot.slane %v4569_v52, 9  ;;  %v3533_v20 = vmul.f32 %v3514_v40, %v3469_v22  ;;  %4907 = vmatmul.mubr.bf16.gmra.mxu1 %v4376_v58  ;;  %v3416_v38 = vunpack.c.l.bf16 %v4393_v26  ;;  %s7190_s12 = smov (!%p6842_p4, %s3972_s12), 15 }
 0x13c   : > { %v4567_v48 = vpack.c.bf16 %v3532_v50, %v3532_v50  ;;  %v3458_v54 = vadd.f32 %v6657_v53, %v3442_v13  ;;  %v3459_v29 = vadd.f32 %v6657_v53, %v3443_v41  ;;  %v3417_v14 = vunpack.c.l.bf16 %v4394_v23  ;;  %4925 = vmatpush3.bf16.msra.mxu0 %v5033_v56  ;;  %s3973_s22 = sshll.u32 %s7190_s12, 2 }
 0x13d   : > { %v3614_v35 = vrot.slane %v4570_v18, 5  ;;  %v4568_v24 = vpack.c.bf16 %v3533_v20, %v3533_v20  ;;  %v3440_v34 = vmul.f32 %v6674_v59, %v3416_v38  ;;  %v3516_v28 = vrot.slane %v3499_v21, 6  ;;  %4949 = vmatpush3.bf16.msra.mxu1 %v5033_v56  ;;  %s6871_s18 = scalar_lea.vmem %s6896_s5, %s3973_s22 }
 0x13e   : > { %v4427_v15 = vrot.slane %v4567_v48, 9  ;;  %v3474_v27 = vmax.f32 %v3458_v54, 0.0  ;;  %v3475_v51 = vmax.f32 %v3459_v29, 0.0  ;;  %v3441_v63 = vmul.f32 %v6674_v59, %v3417_v14 }
 0x13f   : > { %v3615_v7 = vsel %vm6123_vm5, %v4428_v9, %v3614_v35  ;;  %v3610_v33 = vrot.slane %v4568_v24, 5  ;;  %v3456_v16 = vadd.f32 %v6657_v53, %v3440_v34  ;;  %v3422_v45 = vunpack.c.l.bf16 %v4399_v47 }
 0x140   : > { %v3423_v10 = vunpack.c.l.bf16 %v4400_v4  ;;  %v3538_v17 = vmul.f32 %v3517_v6, %v3474_v27  ;;  %v3539_v1 = vmul.f32 %v3517_v6, %v3475_v51  ;;  %v3457_v32 = vadd.f32 %v6657_v53, %v3441_v63 }
 0x141   : > { %v3519_v44 = vrot.slane %v3511_v55, 6  ;;  %v3611_v12 = vsel %vm6123_vm5, %v4427_v15, %v3610_v33  ;;  %v3472_v42 = vmax.f32 %v3456_v16, 0.0  ;;  %v3446_v5 = vmul.f32 %v6674_v59, %v3422_v45 }
 0x142   : > { %v3447_v31 = vmul.f32 %v6674_v59, %v3423_v10  ;;  %v4450_v43 = vcombine.low %v3611_v12, %v3615_v7  ;;  %v4573_v49 = vpack.c.bf16 %v3538_v17, %v3538_v17  ;;  %v4574_v40 = vpack.c.bf16 %v3539_v1, %v3539_v1 }
 0x143   : > { %v3473_v60 = vmax.f32 %v3457_v32, 0.0  ;;  %v3536_v0 = vmul.f32 %v3516_v28, %v3472_v42  ;;  %v3462_v39 = vadd.f32 %v6657_v53, %v3446_v5  ;;  %v3420_v56 = vunpack.c.l.bf16 %v4397_v62 }
 0x144   : > { %v3463_v57 = vadd.f32 %v6657_v53, %v3447_v31  ;;  %v4430_v25 = vrot.slane %v4573_v49, 9  ;;  %v3622_v37 = vrot.slane %v4574_v40, 5  ;;  %v3421_v8 = vunpack.c.l.bf16 %v4398_v11 }
 0x145   : > { %v3537_v30 = vmul.f32 %v3516_v28, %v3473_v60  ;;  %v4571_v26 = vpack.c.bf16 %v3536_v0, %v3536_v0  ;;  %v3478_v52 = vmax.f32 %v3462_v39, 0.0  ;;  %v3444_v50 = vmul.f32 %v6674_v59, %v3420_v56 }
 0x146   : > { %v3479_v22 = vmax.f32 %v3463_v57, 0.0  ;;  %v3445_v23 = vmul.f32 %v6674_v59, %v3421_v8  ;;  %v3518_v18 = vrot.slane %v3507_v3, 6  ;;  %v3603_v13 = vsel %vm6123_vm5, %v6733_v61, %v6740_v19 }
 0x147   : > { %v4572_v58 = vpack.c.bf16 %v3537_v30, %v3537_v30  ;;  %v4429_v41 = vrot.slane %v4571_v26, 9  ;;  %v3542_v6 = vmul.f32 %v3519_v44, %v3478_v52  ;;  %v3460_v9 = vadd.f32 %v6657_v53, %v3444_v50 }
 0x148   : > { %v3543_v21 = vmul.f32 %v3519_v44, %v3479_v22  ;;  %v3461_v48 = vadd.f32 %v6657_v53, %v3445_v23  ;;  %v3607_v38 = vsel %vm6123_vm5, %v6724_v2, %v6726_v46  ;;  %v3623_v59 = vsel %vm6123_vm5, %v4430_v25, %v3622_v37 }
 0x149   : > { %v3618_v20 = vrot.slane %v4572_v58, 5  ;;  %v4577_v35 = vpack.c.bf16 %v3542_v6, %v3542_v6  ;;  %v3476_v29 = vmax.f32 %v3460_v9, 0.0  ;;  %v4449_v61 = vcombine.low %v3603_v13, %v3607_v38 }
 0x14a   : > { %v4578_v54 = vpack.c.bf16 %v3543_v21, %v3543_v21  ;;  %v3477_v19 = vmax.f32 %v3461_v48, 0.0 }
 0x14b   : > { %v3619_v14 = vsel %vm6123_vm5, %v4429_v41, %v3618_v20  ;;  %v3540_v47 = vmul.f32 %v3518_v18, %v3476_v29  ;;  %4926 = vmatprep.mubr.bf16.mxu0 %v4449_v61  ;;  %v4432_v53 = vrot.slane %v4577_v35, 9 }
 0x14c   : > { %v4451_v4 = vcombine.low %v3619_v14, %v3623_v59  ;;  %v3630_v24 = vrot.slane %v4578_v54, 5  ;;  %v3541_v15 = vmul.f32 %v3518_v18, %v3477_v19  ;;  %4927 = vmatmul.mubr.bf16.vlgmr.msra.gmra.mxu0 %v4450_v43 }
 0x14d   : > { %v4575_v34 = vpack.c.bf16 %v3540_v47, %v3540_v47 }
 0x14e   : > { %4930 = vmatprep.mubr.bf16.mxu1 %v4451_v4  ;;  %v4576_v2 = vpack.c.bf16 %v3541_v15, %v3541_v15  ;;  %v3631_v28 = vsel %vm6123_vm5, %v4432_v53, %v3630_v24 }
 0x14f   : > { %v4431_v46 = vrot.slane %v4575_v34, 9 }
 0x150   : > { %v3626_v55 = vrot.slane %v4576_v2, 5 }
 0x152   : > { %v3627_v7 = vsel %vm6123_vm5, %v4431_v46, %v3626_v55 }
 0x153   : > { %v4452_v27 = vcombine.low %v3627_v7, %v3631_v28 }
 0x155   : > { %4931 = vmatmul.mubr.bf16.vlgmr.msra.gmra.mxu1 %v4452_v27 }
 0x15d   : > { %v4736_v51 = vpop.f32.mrf.mxu0 }
 0x15f   : > { %v521_v63 = vpop.f32.mrf.mxu0 }
 0x161   : > { %v4737_v33 = vpop.f32.mrf.mxu0 }
 0x163   : > { %v524_v45 = vpop.f32.mrf.mxu0 }
 0x16c   : > { %v4760_v16 = vpop.f32.mrf.mxu1 }
 0x16d   : > { %v1039_v34 = vadd.f32 %v4760_v16, %v4736_v51 }
 0x16e   : > { %v1006_v10 = vpop.f32.mrf.mxu1 }
 0x16f   : > { %v1037_v2 = vadd.f32 %v1006_v10, %v521_v63 }
 0x170   : > { %v4761_v1 = vpop.f32.mrf.mxu1 }
 0x171   : > { %v1040_v46 = vadd.f32 %v4761_v1, %v4737_v33 }
 0x172   : > { %v6793_v17 = vpop.f32.mrf.mxu0  ;;  %v1009_v44 = vpop.f32.mrf.mxu1 }
 0x173   : > { %v1038_v28 = vadd.f32 %v1009_v44, %v524_v45 }
 0x174   : > { %v6795_v32 = vpop.f32.mrf.mxu0 }
 0x176   : > { %v6797_v62 = vpop.f32.mrf.mxu0 }
 0x178   : > { %v6801_v36 = vpop.f32.mrf.mxu0 }
 0x179   : > { %v6799_v12 = vpop.f32.mrf.mxu1 }
 0x17a   : > { %v1043_v10 = vadd.f32 %v6799_v12, %v6793_v17 }
 0x17b   : > { %v1022_v42 = vpop.f32.mrf.mxu1 }
 0x17c   : > { %v1041_v51 = vadd.f32 %v1022_v42, %v6795_v32 }
 0x17d   : > { %v6803_v31 = vpop.f32.mrf.mxu1 }
 0x17e   : > { %v1044_v1 = vadd.f32 %v6803_v31, %v6797_v62 }
 0x17f   : > { %v6805_v43 = vpop.f32.mrf.mxu1 }
 0x180   : > { %v1042_v32 = vadd.f32 %v6805_v43, %v6801_v36 }
 0x181   : > { %v4784_v5 = vpop.f32.mrf.mxu0 }
 0x182   : > { %v1444_v55 = vadd.f32 %v4784_v5, %v1039_v34 }
 0x183   : > { %v1411_v11 = vpop.f32.mrf.mxu0 }
 0x184   : > { %v1442_v7 = vadd.f32 %v1411_v11, %v1037_v2 }
 0x185   : > { %v4785_v49 = vpop.f32.mrf.mxu0 }
 0x186   : > { %v1445_v27 = vadd.f32 %v4785_v49, %v1040_v46 }
 0x187   : > { %v1414_v60 = vpop.f32.mrf.mxu0 }
 0x18d   : > { %v4808_v40 = vpop.f32.mrf.mxu1 }
 0x18f   : > { %v1695_v0 = vpop.f32.mrf.mxu1 }
 0x191   : > { %v4809_v57 = vpop.f32.mrf.mxu1 }
 0x193   : > { %v1698_v56 = vpop.f32.mrf.mxu1 }
 0x19e   : > { %v6807_v39 = vpop.f32.mrf.mxu0 }
 0x19f   : > { %v1448_v42 = vadd.f32 %v6807_v39, %v1043_v10 }
 0x1a0   : > { %v1427_v3 = vpop.f32.mrf.mxu0 }
 0x1a1   : > { %v1446_v44 = vadd.f32 %v1427_v3, %v1041_v51 }
 0x1a2   : > { %v6809_v25 = vpop.f32.mrf.mxu0  ;;  %v6811_v37 = vpop.f32.mrf.mxu1 }
 0x1a3   : > { %v1449_v17 = vadd.f32 %v6809_v25, %v1044_v1 }
 0x1a4   : > { %v6813_v30 = vpop.f32.mrf.mxu0  ;;  %v1711_v8 = vpop.f32.mrf.mxu1 }
 0x1a5   : > { %v1730_v12 = vadd.f32 %v1711_v8, %v1446_v44 }
 0x1a6   : > { %v4832_v26 = vpop.f32.mrf.mxu0  ;;  %v6815_v52 = vpop.f32.mrf.mxu1 }
 0x1a8   : > { %v2177_v22 = vpop.f32.mrf.mxu0  ;;  %v6817_v50 = vpop.f32.mrf.mxu1 }
 0x1aa   : > { %v4833_v58 = vpop.f32.mrf.mxu0 }
 0x1ac   : > { %v2180_v18 = vpop.f32.mrf.mxu0 }
 0x1b7   : > { %v4856_v23 = vpop.f32.mrf.mxu1 }
 0x1b9   : > { %v2579_v13 = vpop.f32.mrf.mxu1 }
 0x1bb   : > { %v4857_v6 = vpop.f32.mrf.mxu1 }
 0x1bd   : > { %v2582_v9 = vpop.f32.mrf.mxu1 }
 0x1d6   : > { %v6819_v41 = vpop.f32.mrf.mxu0 }
 0x1d7   : > { %7174 = vst [vmem:[#allocation3_spill] sm:$0xff] %v6819_v41 }
 0x1d8   : > { %v2193_v21 = vpop.f32.mrf.mxu0  ;;  %v6823_v48 = vpop.f32.mrf.mxu1 }
 0x1d9   : > { %7176 = vst [vmem:[#allocation5_spill] sm:$0xff] %v6823_v48 }
 0x1da   : > { %v6821_v20 = vpop.f32.mrf.mxu0  ;;  %v6827_v59 = vpop.f32.mrf.mxu1 }
 0x1db   : > { %7175 = vst [vmem:[#allocation4_spill] sm:$0xff] %v6821_v20  ;;  %7178 = vst [vmem:[#allocation7_spill] sm:$0xff] %v6827_v59  ;;  %v1726_v59 = vadd.f32 %v1695_v0, %v1442_v7  ;;  %v1729_v20 = vadd.f32 %v4809_v57, %v1445_v27 }
 0x1dc   : > { %v6825_v38 = vpop.f32.mrf.mxu0  ;;  %v6829_v54 = vpop.f32.mrf.mxu1 }
 0x1dd   : > { %7177 = vst [vmem:[#allocation6_spill] sm:$0xff] %v6825_v38  ;;  %7179 = vst [vmem:[#allocation8_spill] sm:$0xff] %v6829_v54  ;;  %v1728_v38 = vadd.f32 %v4808_v40, %v1444_v55  ;;  %v2208_v16 = vadd.f32 %v2177_v22, %v1726_v59  ;;  %v2211_v45 = vadd.f32 %v4833_v58, %v1729_v20 }
 0x1de   : > { %v4880_v35 = vpop.f32.mrf.mxu0  ;;  %v6831_v61 = vpop.f32.mrf.mxu1  ;;  %v1732_v22 = vadd.f32 %v6811_v37, %v1448_v42  ;;  %v1733_v58 = vadd.f32 %v6815_v52, %v1449_v17 }
 0x1df   : > { %7180 = vst [vmem:[#allocation9_spill] sm:$0xff] %v6831_v61  ;;  %v1443_v61 = vadd.f32 %v1414_v60, %v1038_v28  ;;  %v2210_v33 = vadd.f32 %v4832_v26, %v1728_v38  ;;  %v2610_v40 = vadd.f32 %v2579_v13, %v2208_v16  ;;  %v2613_v60 = vadd.f32 %v4857_v6, %v2211_v45  ;;  %v7182_v6 = vld [vmem:[#allocation3_spill] sm:$0xff] }
 0x1e0   : > { %v2863_v29 = vpop.f32.mrf.mxu0  ;;  %v4904_v14 = vpop.f32.mrf.mxu1  ;;  %v1447_v26 = vadd.f32 %v6813_v30, %v1042_v32 }
 0x1e1   : > { %v1727_v63 = vadd.f32 %v1698_v56, %v1443_v61  ;;  %v2612_v49 = vadd.f32 %v4856_v23, %v2210_v33  ;;  %v2894_v3 = vadd.f32 %v2863_v29, %v2610_v40  ;;  %v2212_v23 = vadd.f32 %v2193_v21, %v1730_v12 }
 0x1e2   : > { %v4881_v19 = vpop.f32.mrf.mxu0  ;;  %v3345_v4 = vpop.f32.mrf.mxu1  ;;  %v1731_v8 = vadd.f32 %v6817_v50, %v1447_v26  ;;  %v7183_v20 = vld [vmem:[#allocation4_spill] sm:$0xff]  ;;  %v7184_v52 = vld [vmem:[#allocation7_spill] sm:$0xff] }
 0x1e3   : > { %v2209_v11 = vadd.f32 %v2180_v18, %v1727_v63  ;;  %v2896_v57 = vadd.f32 %v4880_v35, %v2612_v49  ;;  %v2897_v56 = vadd.f32 %v4881_v19, %v2613_v60  ;;  %v3376_v39 = vadd.f32 %v3345_v4, %v2894_v3 }
 0x1e4   : > { %v2866_v47 = vpop.f32.mrf.mxu0  ;;  %v4905_v24 = vpop.f32.mrf.mxu1  ;;  %v2215_v38 = vadd.f32 %v7183_v20, %v1733_v58  ;;  %v2614_v21 = vadd.f32 %v7184_v52, %v2212_v23  ;;  %v7185_v61 = vld [vmem:[#allocation6_spill] sm:$0xff]  ;;  %v7187_v34 = vld [vmem:[#allocation8_spill] sm:$0xff] }
 0x1e5   : > { %v2611_v31 = vadd.f32 %v2582_v9, %v2209_v11  ;;  %v3378_v43 = vadd.f32 %v4904_v14, %v2896_v57  ;;  %v3379_v13 = vadd.f32 %v4905_v24, %v2897_v56  ;;  %v2214_v9 = vadd.f32 %v7182_v6, %v1732_v22  ;;  %v7186_v24 = vld [vmem:[#allocation5_spill] sm:$0xff] }
 0x1e6   : > { %v3348_v54 = vpop.f32.mrf.mxu1  ;;  %v2213_v19 = vadd.f32 %v7185_v61, %v1731_v8  ;;  %v2617_v2 = vadd.f32 %v7187_v34, %v2215_v38  ;;  %v7188_v63 = vld [vmem:[#allocation9_spill] sm:$0xff] }
 0x1e7   : > { %v2895_v36 = vadd.f32 %v2866_v47, %v2611_v31 }
 0x1e8   : > { %v2615_v33 = vadd.f32 %v7188_v63, %v2213_v19 }
 0x1e9   : > { %v3377_v30 = vadd.f32 %v3348_v54, %v2895_v36  ;;  %v2616_v54 = vadd.f32 %v7186_v24, %v2214_v9 }
 0x1f3   : > { %v6833_v53 = vpop.f32.mrf.mxu0 }
 0x1f4   : > { %v2900_v16 = vadd.f32 %v6833_v53, %v2616_v54 }
 0x1f5   : > { %v6835_v15 = vpop.f32.mrf.mxu0 }
 0x1f6   : > { %v2898_v46 = vadd.f32 %v6835_v15, %v2614_v21 }
 0x1f7   : > { %v6838_v48 = vpop.f32.mrf.mxu0 }
 0x1f8   : > { %v2901_v45 = vadd.f32 %v6838_v48, %v2617_v2 }
 0x1f9   : > { %v2882_v5 = vpop.f32.mrf.mxu0 }
 0x1fa   : > { %v2899_v40 = vadd.f32 %v2882_v5, %v2615_v33 }
 0x1fb   : > { %v6840_v41 = vpop.f32.mrf.mxu1 }
 0x1fc   : > { %v3382_v15 = vadd.f32 %v6840_v41, %v2900_v16 }
 0x1fd   : > { %v3361_v0 = vpop.f32.mrf.mxu1 }
 0x1fe   : > { %v3380_v10 = vadd.f32 %v3361_v0, %v2898_v46 }
 0x1ff   : > { %v4909_v25 = vpop.f32.mrf.mxu1 }
 0x200   : > { %v3383_v60 = vadd.f32 %v4909_v25, %v2901_v45 }
 0x201   : > { %v3364_v14 = vpop.f32.mrf.mxu1 }
 0x202   : > { %v3381_v53 = vadd.f32 %v3364_v14, %v2899_v40 }
 0x20c   : > { %v4928_v62 = vpop.f32.mrf.mxu0 }
 0x20d   : > { %v3780_v35 = vadd.f32 %v4928_v62, %v3378_v43 }
 0x20e   : > { %v3747_v18 = vpop.f32.mrf.mxu0 }
 0x20f   : > { %v3778_v37 = vadd.f32 %v3747_v18, %v3376_v39  ;;  %v3857_v1 = vmul.f32 %v3780_v35, %v3780_v35 }
 0x210   : > { %v4929_v59 = vpop.f32.mrf.mxu0 }
 0x211   : > { %v3781_v29 = vadd.f32 %v4929_v59, %v3379_v13  ;;  %v3855_v28 = vmul.f32 %v3778_v37, %v3778_v37 }
 0x212   : > { %v3750_v50 = vpop.f32.mrf.mxu0 }
 0x213   : > { %v4595_v47 = vpack.c.bf16 %v3781_v29, %v3780_v35  ;;  %v3779_v4 = vadd.f32 %v3750_v50, %v3377_v30  ;;  %v3858_v42 = vmul.f32 %v3781_v29, %v3781_v29 }
 0x215   : > { %4607 = vst [vmem:[%s6871_s18 + $0x8] sm:$0xff] %v4595_v47   ;;  %v4590_v55 = vpack.c.bf16 %v3779_v4, %v3778_v37  ;;  %v3842_v7 = vadd.f32 %v3779_v4, %v3778_v37  ;;  %v3856_v27 = vmul.f32 %v3779_v4, %v3779_v4  ;;  %v4932_v51 = vpop.f32.mrf.mxu1 }
 0x216   : > { %v3784_v31 = vadd.f32 %v4932_v51, %v3382_v15 }
 0x217   : > { %4591 = vst [vmem:[%s6871_s18] sm:$0xff] %v4590_v55   ;;  %v3843_v44 = vadd.f32 %v3842_v7, %v3780_v35  ;;  %v3863_v11 = vadd.f32 %v3856_v27, %v3855_v28  ;;  %v3763_v49 = vpop.f32.mrf.mxu1 }
 0x218   : > { %v3782_v32 = vadd.f32 %v3763_v49, %v3380_v10  ;;  %v3861_v18 = vmul.f32 %v3784_v31, %v3784_v31 }
 0x219   : > { %v3864_v17 = vadd.f32 %v3863_v11, %v3857_v1  ;;  %v3844_v12 = vadd.f32 %v3843_v44, %v3781_v29  ;;  %v4933_v62 = vpop.f32.mrf.mxu1 }
 0x21a   : > { %v3785_v48 = vadd.f32 %v4933_v62, %v3383_v60  ;;  %v3859_v57 = vmul.f32 %v3782_v32, %v3782_v32 }
 0x21b   : > { %v3845_v0 = vadd.f32 %v3844_v12, %v3782_v32  ;;  %v3865_v3 = vadd.f32 %v3864_v17, %v3858_v42  ;;  %v3766_v56 = vpop.f32.mrf.mxu1 }
 0x21c   : > { %v4605_v26 = vpack.c.bf16 %v3785_v48, %v3784_v31  ;;  %v3783_v22 = vadd.f32 %v3766_v56, %v3381_v53  ;;  %v3862_v39 = vmul.f32 %v3785_v48, %v3785_v48 }
 0x21d   : > { %v3866_v58 = vadd.f32 %v3865_v3, %v3859_v57 }
 0x21e   : > { %4609 = vst [vmem:[%s6871_s18 + $0x18] sm:$0xff] %v4605_v26   ;;  %v4600_v41 = vpack.c.bf16 %v3783_v22, %v3782_v32  ;;  %v3846_v5 = vadd.f32 %v3845_v0, %v3783_v22  ;;  %v3860_v23 = vmul.f32 %v3783_v22, %v3783_v22 }
 0x220   : > { %4608 = vst [vmem:[%s6871_s18 + $0x10] sm:$0xff] %v4600_v41   ;;  %v3847_v36 = vadd.f32 %v3846_v5, %v3784_v31  ;;  %v3867_v43 = vadd.f32 %v3866_v58, %v3860_v23 }
 0x222   : > { %v3848_v13 = vadd.f32 %v3847_v36, %v3785_v48  ;;  %v3868_v25 = vadd.f32 %v3867_v43, %v3861_v18 }
 0x224   : > { %v3849_v8 = vrot.slane %v3848_v13, 4  ;;  %v3869_v6 = vadd.f32 %v3868_v25, %v3862_v39 }
 0x226   : > { %v3850_v9 = vadd.f32 %v3849_v8, %v3848_v13  ;;  %v3870_v20 = vrot.slane %v3869_v6, 4 }
 0x228   : > { %v3851_v38 = vrot.slane %v3850_v9, 2  ;;  %v3871_v59 = vadd.f32 %v3870_v20, %v3869_v6 }
 0x22a   : > { %v3852_v30 = vadd.f32 %v3851_v38, %v3850_v9  ;;  %v3872_v35 = vrot.slane %v3871_v59, 2 }
 0x22c   : > { %v3853_v37 = vrot.slane %v3852_v30, 1  ;;  %v3873_v29 = vadd.f32 %v3872_v35, %v3871_v59 }
 0x22e   : > { %v3874_v52 = vrot.slane %v3873_v29, 1  ;;  %v3854_v21 = vadd.f32 %v3853_v37, %v3852_v30 }
 0x230   : > { %v3875_v61 = vadd.f32 %v3874_v52, %v3873_v29 }
 0x232   : > { %v3877_v19 = vsel %vm3876_vm6, %v3854_v21, %v3875_v61 }
 0x233   : > { %3878 = vst [vmem:[%s263_s24] sm:$0x3] %v3877_v19 }
 0x234 PF: > { %s17_s21 = sadd.s32 1, %s5062_s21  }
 0x235   : > { %p14_p5 = scmp.ge.s32.totalorder %s17_s21, 4  }
 0x237   :  { %16 = sbr.rel (!%p14_p5) target bundleno = 1 (0x1), region = 94 }

</bundles_post_ra>
